<compile_context>
chip_gen: v7x
topology: tpu7x:2x2x1
jax: 0.10.0
libtpu: 0.0.40
codegen_flags: <defaults>
</compile_context>

<pallas_src>
import jax
import jax.numpy as jnp
import numpy as np
from jax.experimental import pallas as pl
from jax.experimental.pallas import tpu as pltpu

C_IN = 128        # conv input channels
C_OUT = 224       # concatenated channels
# (channel offset, width) of each concat slab: x4, x11, x18, x25, conv(x32), x39
SLABS = ((0, 64), (64, 32), (96, 32), (128, 32), (160, 32), (192, 32))
CONV_CI = 32
EPS = 1e-5


def fused_conv_cat_bn_kernel(x31_ref, w_ref, x4_ref, x11_ref, x18_ref,
                             x25_ref, x39_ref, gamma_ref, beta_ref,
                             o_ref, xshift_ref, cat_ref, stats_ref):
    phase = pl.program_id(0)
    rb = pl.program_id(1)

    H = xshift_ref.shape[0] - 2
    W = xshift_ref.shape[1]
    br = o_ref.shape[0]                  # rows per block = BH * W
    bh = br // W
    inv_m = 1.0 / (H * W)                # batch-statistics count (N == 1)

    row0 = pl.multiple_of(rb * br, 8)    # start row of this block (flattened)
    slab_refs = (x4_ref, x11_ref, x18_ref, x25_ref, None, x39_ref)

    # ------------- phase 0: conv + concat cache + one-pass statistics --------
    @pl.when(phase == 0)
    def _phase0():
        @pl.when(rb == 0)
        def _init():
            stats_ref[...] = jnp.zeros_like(stats_ref)
            # Build the zero-padded, kw-pre-shifted copy of x31 once with the
            # three kw taps packed along the lane axis: xshift[hp, w, kw*128+c]
            # = x_pad[hp, w+kw-1, c].  Only the two padding row planes need
            # zeroing — rows 1..H are fully overwritten below.
            zero_row = jnp.zeros((W, 3 * C_IN), jnp.float32)
            xshift_ref[0, :, :] = zero_row
            xshift_ref[H + 1, :, :] = zero_row
            x = x31_ref[...].astype(jnp.float32)                   # (H, W, 128)
            col = jax.lax.broadcasted_iota(jnp.int32, (H, W, C_IN), 1)
            x_l = jnp.where(col >= 1, pltpu.roll(x, 1, axis=1), 0.0)
            x_r = jnp.where(col <= W - 2, pltpu.roll(x, W - 1, axis=1), 0.0)
            xshift_ref[1:H + 1, :, 0:C_IN] = x_l           # kw=0 tap: x[., w-1]
            xshift_ref[1:H + 1, :, C_IN:2 * C_IN] = x      # kw=1 tap: x[., w  ]
            xshift_ref[1:H + 1, :, 2 * C_IN:3 * C_IN] = x_r  # kw=2 tap: x[., w+1]

        # 3x3 conv collapsed to 3 (br,384)@(384,32) MXU matmuls per row block.
        acc = jnp.zeros((br, CONV_CI), jnp.float32)
        for kh in range(3):
            patch = xshift_ref[pl.ds(rb * bh + kh, bh), :, :]      # (bh, W, 384)
            acc = acc + jnp.dot(patch.reshape(br, 3 * C_IN), w_ref[kh],
                                preferred_element_type=jnp.float32)

        # Assemble the 224-wide concat block in VMEM (phase 1 never touches
        # the HBM inputs again).
        for ref, (off, ci) in zip(slab_refs, SLABS):
            if ref is None:
                cat_ref[pl.ds(row0, br), off:off + ci] = acc       # conv slab
            else:
                cat_ref[pl.ds(row0, br), off:off + ci] = \
                    ref[...].astype(jnp.float32)

        # One wide reduction pair per grid step (sum, sum of squares).
        blk = cat_ref[pl.ds(row0, br), :]
        stats_ref[0:1, :] += jnp.sum(blk, axis=0, keepdims=True)
        stats_ref[1:2, :] += jnp.sum(blk * blk, axis=0, keepdims=True)

    # --------- phase 1: normalize cached block + one lane-dense store --------
    @pl.when(phase == 1)
    def _phase1():
        @pl.when(rb == 0)
        def _finalize():
            mean = stats_ref[0:1, :] * inv_m
            # one-pass variance; slightly less stable than two-pass, fine @f32
            var = jnp.maximum(stats_ref[1:2, :] * inv_m - mean * mean, 0.0)
            scale = gamma_ref[...] * jax.lax.rsqrt(var + EPS)
            stats_ref[0:1, :] = scale
            stats_ref[1:2, :] = beta_ref[...] - mean * scale

        blk = cat_ref[pl.ds(row0, br), :]
        o_ref[...] = (blk * stats_ref[0:1, :]
                      + stats_ref[1:2, :]).astype(o_ref.dtype)


# --------------------------------- wrapper -----------------------------------

def _pick_bh(H, W, target_rows=2048):
    """Largest row block (divisor of H, sublane friendly) below target_rows."""
    cands = [bh for bh in range(1, H + 1)
             if H % bh == 0 and (bh * W) % 8 == 0]
    fits = [bh for bh in cands if bh * W <= target_rows]
    return max(fits) if fits else min(cands)


def model_forward(x31, x4, x11, x18, x25, x39, conv_w, gamma, beta):
    """Inputs NCHW (PyTorch), conv_w OIHW (32,128,3,3). Returns NCHW output."""
    N, Cin, H, W = x31.shape
    assert N == 1, "kernel assumes batch == 1 (as in the reference module)"
    assert Cin == C_IN
    assert W % 8 == 0

    bh = _pick_bh(H, W)          # e.g. whole image at 16x16, 28 rows at 56x56
    br = bh * W
    n_rb = H // bh

    # NCHW -> channels-last at the PyTorch boundary (channels on the lane axis)
    x31_hwc = jnp.transpose(x31, (0, 2, 3, 1)).reshape(H, W, Cin)

    def flat(t):                                       # (1,C,H,W) -> (H*W, C)
        return jnp.transpose(t, (0, 2, 3, 1)).reshape(H * W, t.shape[1])

    slabs = (flat(x4), flat(x11), flat(x18), flat(x25), flat(x39))
    # OIHW -> (kh, kw, cin, cout) -> (3, 3*128, 32): the kw taps are packed
    # along the K axis so the 3x3 conv becomes 3 matmuls of K=384.
    w3 = jnp.transpose(conv_w, (2, 3, 1, 0)).reshape(3, 3 * Cin, 32)

    def slab_spec(ci):
        # phase 0 streams row blocks; phase 1 parks on block 0 so Pallas skips
        # the (unused) phase-1 DMAs entirely.
        return pl.BlockSpec((br, ci), lambda p, r: (r * (1 - p), 0))

    # VMEM footprint estimate (f32): double-buffered inputs/outputs + scratch.
    vmem_est = 4 * (2 * H * W * Cin          # resident x31 window
                    + 2 * br * 160           # external slab windows
                    + 2 * 3 * 3 * Cin * 32   # conv weights
                    + 2 * br * C_OUT         # output window
                    + (H + 2) * W * 3 * Cin  # padded / kw-shifted x31 scratch
                    + H * W * C_OUT          # cached concat scratch
                    ) + (1 << 20)
    vmem_limit = min(max(vmem_est * 3 // 2, 16 << 20), 48 << 20)

    out_flat = pl.pallas_call(
        fused_conv_cat_bn_kernel,
        out_shape=jax.ShapeDtypeStruct((H * W, C_OUT), x31.dtype),
        grid_spec=pltpu.PrefetchScalarGridSpec(
            num_scalar_prefetch=0,
            grid=(2, n_rb),                            # (phase, row block)
            in_specs=[
                pl.BlockSpec((H, W, Cin), lambda p, r: (0, 0, 0)),   # x31 (resident, fetched once)
                pl.BlockSpec((3, 3 * Cin, 32), lambda p, r: (0, 0, 0)),  # conv weights
                slab_spec(64),                                       # x4
                slab_spec(32),                                       # x11
                slab_spec(32),                                       # x18
                slab_spec(32),                                       # x25
                slab_spec(32),                                       # x39
                pl.BlockSpec((1, C_OUT), lambda p, r: (0, 0)),       # gamma
                pl.BlockSpec((1, C_OUT), lambda p, r: (0, 0)),       # beta
            ],
            # phase 0 parks on block 0 (never written there); phase 1 writes
            # block r -> the output is written back to HBM exactly once.
            out_specs=pl.BlockSpec((br, C_OUT), lambda p, r: (p * r, 0)),
            scratch_shapes=[
                pltpu.VMEM((H + 2, W, 3 * Cin), jnp.float32),  # padded + kw-shifted x31
                pltpu.VMEM((H * W, C_OUT), jnp.float32),       # cached concat block
                pltpu.VMEM((2, C_OUT), jnp.float32),           # sum/sumsq -> scale/shift
            ]),
        compiler_params=pltpu.CompilerParams(
            # both axes carry the sequential two-sweep BN statistics dependency
            dimension_semantics=("arbitrary", "arbitrary"),
            vmem_limit_bytes=int(vmem_limit)),
    )(x31_hwc, w3, *slabs, gamma.reshape(1, C_OUT), beta.reshape(1, C_OUT))

    return out_flat.reshape(1, H, W, C_OUT).transpose(0, 3, 1, 2)   # back to NCHW


# ----------------------------- reference + test -------------------------------

def reference_forward(x31, x4, x11, x18, x25, x39, conv_w, gamma, beta):
    conv = jax.lax.conv_general_dilated(
        x31, conv_w, window_strides=(1, 1), padding=((1, 1), (1, 1)),
        dimension_numbers=("NCHW", "OIHW", "NCHW"))
    cat = jnp.concatenate([x4, x11, x18, x25, conv, x39], axis=1)
    mean = cat.mean(axis=(0, 2, 3), keepdims=True)
    var = ((cat - mean) ** 2).mean(axis=(0, 2, 3), keepdims=True)
    norm = (cat - mean) / jnp.sqrt(var + EPS)
    return norm * gamma[None, :, None, None] + beta[None, :, None, None]


if __name__ == "__main__":
    # Small shapes consistent with the module: channel counts fixed by the
    # architecture (conv 128->32, BN 224); spatial reduced 56 -> 16, batch = 1.
    N, H, W = 1, 16, 16
    key = jax.random.PRNGKey(0)
    ks = jax.random.split(key, 7)

    x31 = jax.random.normal(ks[0], (N, 128, H, W), jnp.float32)
    x4  = jax.random.normal(ks[1], (N, 64,  H, W), jnp.float32)
    x11 = jax.random.normal(ks[2], (N, 32,  H, W), jnp.float32)
    x18 = jax.random.normal(ks[3], (N, 32,  H, W), jnp.float32)
    x25 = jax.random.normal(ks[4], (N, 32,  H, W), jnp.float32)
    x39 = jax.random.normal(ks[5], (N, 32,  H, W), jnp.float32)

    fan_in = 128 * 3 * 3
    conv_w = jax.random.uniform(ks[6], (32, 128, 3, 3), jnp.float32,
                                minval=-1.0, maxval=1.0) / np.sqrt(fan_in)
    gamma = jnp.ones((224,), jnp.float32)
    beta = jnp.zeros((224,), jnp.float32)

    out = jax.block_until_ready(
        model_forward(x31, x4, x11, x18, x25, x39, conv_w, gamma, beta))
    ref = reference_forward(x31, x4, x11, x18, x25, x39, conv_w, gamma, beta)

    assert out.shape == (N, 224, H, W), out.shape
    np.testing.assert_allclose(np.asarray(out), np.asarray(ref),
                               rtol=2e-2, atol=2e-2)
    print("KERNEL_OK")
</pallas_src>

<mosaic_0001>
module attributes {stable_mosaic.version = 11 : i64} {
  func.func @fused_conv_cat_bn_kernel(%arg0: i32, %arg1: i32, %arg2: memref<16x16x128xf32, #tpu.memory_space<vmem>>, %arg3: memref<3x384x32xf32, #tpu.memory_space<vmem>>, %arg4: memref<256x64xf32, #tpu.memory_space<vmem>>, %arg5: memref<256x32xf32, #tpu.memory_space<vmem>>, %arg6: memref<256x32xf32, #tpu.memory_space<vmem>>, %arg7: memref<256x32xf32, #tpu.memory_space<vmem>>, %arg8: memref<256x32xf32, #tpu.memory_space<vmem>>, %arg9: memref<1x224xf32, #tpu.memory_space<vmem>>, %arg10: memref<1x224xf32, #tpu.memory_space<vmem>>, %arg11: memref<256x224xf32, #tpu.memory_space<vmem>>, %arg12: memref<18x16x384xf32, #tpu.memory_space<vmem>>, %arg13: memref<256x224xf32, #tpu.memory_space<vmem>>, %arg14: memref<2x224xf32, #tpu.memory_space<vmem>>) attributes {dimension_semantics = [#tpu.dimension_semantics<arbitrary>, #tpu.dimension_semantics<arbitrary>], iteration_bounds = array<i64: 2, 1>, scalar_prefetch = 0 : i64, scratch_operands = 3 : i64, tpu.core_type = #tpu.core_type<tc>, window_params = [{pipeline_mode = #tpu.pipeline_mode<synchronous>, transform_indices = @transform_0, window_bounds = array<i64: 16, 16, 128>}, {pipeline_mode = #tpu.pipeline_mode<synchronous>, transform_indices = @transform_1, window_bounds = array<i64: 3, 384, 32>}, {transform_indices = @transform_2, window_bounds = array<i64: 256, 64>}, {transform_indices = @transform_3, window_bounds = array<i64: 256, 32>}, {transform_indices = @transform_4, window_bounds = array<i64: 256, 32>}, {transform_indices = @transform_5, window_bounds = array<i64: 256, 32>}, {transform_indices = @transform_6, window_bounds = array<i64: 256, 32>}, {pipeline_mode = #tpu.pipeline_mode<synchronous>, transform_indices = @transform_7, window_bounds = array<i64: 1, 224>}, {pipeline_mode = #tpu.pipeline_mode<synchronous>, transform_indices = @transform_8, window_bounds = array<i64: 1, 224>}, {transform_indices = @transform_9, window_bounds = array<i64: 256, 224>}]} {
    %c256_i32 = arith.constant 256 : i32
    %0 = arith.muli %arg1, %c256_i32 : i32
    %1 = tpu.assume_multiple %0, 8 : i32
    %c0_i32 = arith.constant 0 : i32
    %2 = arith.cmpi eq, %arg0, %c0_i32 : i32
    %3 = arith.extui %2 : i1 to i32
    %c0_i32_0 = arith.constant 0 : i32
    %4 = arith.cmpi ne, %3, %c0_i32_0 : i32
    scf.if %4 {
      %c0_i32_2 = arith.constant 0 : i32
      %8 = arith.cmpi eq, %arg1, %c0_i32_2 : i32
      %9 = arith.extui %8 : i1 to i32
      %c0_i32_3 = arith.constant 0 : i32
      %10 = arith.cmpi ne, %9, %c0_i32_3 : i32
      scf.if %10 {
        %cst_45 = arith.constant 0.000000e+00 : f32
        %69 = vector.broadcast %cst_45 : f32 to vector<2x224xf32>
        %c0_46 = arith.constant 0 : index
        %c0_47 = arith.constant 0 : index
        %70 = vector.load %arg14[%c0_46, %c0_47] : memref<2x224xf32, #tpu.memory_space<vmem>>, vector<2x224xf32>
        tpu.vector_store %arg14[%c0_46, %c0_47], %69 {strides = array<i32>} : memref<2x224xf32, #tpu.memory_space<vmem>>, vector<2x224xf32>,
        %cst_48 = arith.constant 0.000000e+00 : f32
        %71 = vector.broadcast %cst_48 : f32 to vector<16x384xf32>
        %c0_49 = arith.constant 0 : index
        %c0_50 = arith.constant 0 : index
        %c0_51 = arith.constant 0 : index
        %72 = vector.load %arg12[%c0_49, %c0_50, %c0_51] : memref<18x16x384xf32, #tpu.memory_space<vmem>>, vector<1x16x384xf32>
        %73 = vector.shape_cast %72 : vector<1x16x384xf32> to vector<16x384xf32>
        %74 = vector.shape_cast %71 : vector<16x384xf32> to vector<1x16x384xf32>
        tpu.vector_store %arg12[%c0_49, %c0_50, %c0_51], %74 {strides = array<i32>} : memref<18x16x384xf32, #tpu.memory_space<vmem>>, vector<1x16x384xf32>,
        %c17 = arith.constant 17 : index
        %c0_52 = arith.constant 0 : index
        %c0_53 = arith.constant 0 : index
        %75 = vector.load %arg12[%c17, %c0_52, %c0_53] : memref<18x16x384xf32, #tpu.memory_space<vmem>>, vector<1x16x384xf32>
        %76 = vector.shape_cast %75 : vector<1x16x384xf32> to vector<16x384xf32>
        %77 = vector.shape_cast %71 : vector<16x384xf32> to vector<1x16x384xf32>
        tpu.vector_store %arg12[%c17, %c0_52, %c0_53], %77 {strides = array<i32>} : memref<18x16x384xf32, #tpu.memory_space<vmem>>, vector<1x16x384xf32>,
        %c0_54 = arith.constant 0 : index
        %c0_55 = arith.constant 0 : index
        %c0_56 = arith.constant 0 : index
        %78 = vector.load %arg2[%c0_54, %c0_55, %c0_56] : memref<16x16x128xf32, #tpu.memory_space<vmem>>, vector<16x16x128xf32>
        %79 = tpu.iota {dimensions = array<i32: 1>} : vector<16x16x128xi32>
        %c1_i32_57 = arith.constant 1 : i32
        %80 = vector.broadcast %c1_i32_57 : i32 to vector<16x16x128xi32>
        %81 = arith.cmpi sge, %79, %80 : vector<16x16x128xi32>
        %c1_i32_58 = arith.constant 1 : i32
        %82 = tpu.dynamic_rotate %78 by %c1_i32_58 dim 1 : vector<16x16x128xf32>, i32 -> vector<16x16x128xf32>
        %cst_59 = arith.constant 0.000000e+00 : f32
        %83 = vector.broadcast %cst_59 : f32 to vector<16x16x128xf32>
        %84 = arith.select %81, %82, %83 : vector<16x16x128xi1>, vector<16x16x128xf32>
        %c14_i32 = arith.constant 14 : i32
        %85 = vector.broadcast %c14_i32 : i32 to vector<16x16x128xi32>
        %86 = arith.cmpi sle, %79, %85 : vector<16x16x128xi32>
        %c15_i32 = arith.constant 15 : i32
        %87 = tpu.dynamic_rotate %78 by %c15_i32 dim 1 : vector<16x16x128xf32>, i32 -> vector<16x16x128xf32>
        %cst_60 = arith.constant 0.000000e+00 : f32
        %88 = vector.broadcast %cst_60 : f32 to vector<16x16x128xf32>
        %89 = arith.select %86, %87, %88 : vector<16x16x128xi1>, vector<16x16x128xf32>
        %c1_61 = arith.constant 1 : index
        %c0_62 = arith.constant 0 : index
        %c0_63 = arith.constant 0 : index
        %90 = vector.load %arg12[%c1_61, %c0_62, %c0_63] : memref<18x16x384xf32, #tpu.memory_space<vmem>>, vector<16x16x128xf32>
        tpu.vector_store %arg12[%c1_61, %c0_62, %c0_63], %84 {strides = array<i32>} : memref<18x16x384xf32, #tpu.memory_space<vmem>>, vector<16x16x128xf32>,
        %c1_64 = arith.constant 1 : index
        %c0_65 = arith.constant 0 : index
        %c128_66 = arith.constant 128 : index
        %91 = vector.load %arg12[%c1_64, %c0_65, %c128_66] : memref<18x16x384xf32, #tpu.memory_space<vmem>>, vector<16x16x128xf32>
        tpu.vector_store %arg12[%c1_64, %c0_65, %c128_66], %78 {strides = array<i32>} : memref<18x16x384xf32, #tpu.memory_space<vmem>>, vector<16x16x128xf32>,
        %c1_67 = arith.constant 1 : index
        %c0_68 = arith.constant 0 : index
        %c256 = arith.constant 256 : index
        %92 = vector.load %arg12[%c1_67, %c0_68, %c256] : memref<18x16x384xf32, #tpu.memory_space<vmem>>, vector<16x16x128xf32>
        tpu.vector_store %arg12[%c1_67, %c0_68, %c256], %89 {strides = array<i32>} : memref<18x16x384xf32, #tpu.memory_space<vmem>>, vector<16x16x128xf32>,
      } else {
      }
      %cst = arith.constant 0.000000e+00 : f32
      %11 = vector.broadcast %cst : f32 to vector<256x32xf32>
      %c16_i32 = arith.constant 16 : i32
      %12 = arith.muli %arg1, %c16_i32 : i32
      %c0_i32_4 = arith.constant 0 : i32
      %13 = arith.addi %12, %c0_i32_4 : i32
      %14 = arith.index_cast %13 : i32 to index
      %c0 = arith.constant 0 : index
      %c0_5 = arith.constant 0 : index
      %15 = vector.load %arg12[%14, %c0, %c0_5] : memref<18x16x384xf32, #tpu.memory_space<vmem>>, vector<16x16x384xf32>
      %16 = vector.shape_cast %15 : vector<16x16x384xf32> to vector<256x384xf32>
      %c0_6 = arith.constant 0 : index
      %c0_7 = arith.constant 0 : index
      %c0_8 = arith.constant 0 : index
      %17 = vector.load %arg3[%c0_6, %c0_7, %c0_8] : memref<3x384x32xf32, #tpu.memory_space<vmem>>, vector<1x384x32xf32>
      %18 = vector.shape_cast %17 : vector<1x384x32xf32> to vector<384x32xf32>
      %cst_9 = arith.constant dense<0.000000e+00> : vector<256x32xf32>
      %19 = tpu.matmul %16, %18, %cst_9 {dimension_numbers = #tpu.dot_dimension_numbers<[1], [0], [0], [1], [0, 0, 1, 1], [], []>} : vector<256x384xf32>, vector<384x32xf32>, vector<256x32xf32> -> vector<256x32xf32>
      %20 = arith.addf %11, %19 : vector<256x32xf32>
      %c16_i32_10 = arith.constant 16 : i32
      %21 = arith.muli %arg1, %c16_i32_10 : i32
      %c1_i32_11 = arith.constant 1 : i32
      %22 = arith.addi %21, %c1_i32_11 : i32
      %23 = arith.index_cast %22 : i32 to index
      %c0_12 = arith.constant 0 : index
      %c0_13 = arith.constant 0 : index
      %24 = vector.load %arg12[%23, %c0_12, %c0_13] : memref<18x16x384xf32, #tpu.memory_space<vmem>>, vector<16x16x384xf32>
      %25 = vector.shape_cast %24 : vector<16x16x384xf32> to vector<256x384xf32>
      %c1 = arith.constant 1 : index
      %c0_14 = arith.constant 0 : index
      %c0_15 = arith.constant 0 : index
      %26 = vector.load %arg3[%c1, %c0_14, %c0_15] : memref<3x384x32xf32, #tpu.memory_space<vmem>>, vector<1x384x32xf32>
      %27 = vector.shape_cast %26 : vector<1x384x32xf32> to vector<384x32xf32>
      %cst_16 = arith.constant dense<0.000000e+00> : vector<256x32xf32>
      %28 = tpu.matmul %25, %27, %cst_16 {dimension_numbers = #tpu.dot_dimension_numbers<[1], [0], [0], [1], [0, 0, 1, 1], [], []>} : vector<256x384xf32>, vector<384x32xf32>, vector<256x32xf32> -> vector<256x32xf32>
      %29 = arith.addf %20, %28 : vector<256x32xf32>
      %c16_i32_17 = arith.constant 16 : i32
      %30 = arith.muli %arg1, %c16_i32_17 : i32
      %c2_i32 = arith.constant 2 : i32
      %31 = arith.addi %30, %c2_i32 : i32
      %32 = arith.index_cast %31 : i32 to index
      %c0_18 = arith.constant 0 : index
      %c0_19 = arith.constant 0 : index
      %33 = vector.load %arg12[%32, %c0_18, %c0_19] : memref<18x16x384xf32, #tpu.memory_space<vmem>>, vector<16x16x384xf32>
      %34 = vector.shape_cast %33 : vector<16x16x384xf32> to vector<256x384xf32>
      %c2 = arith.constant 2 : index
      %c0_20 = arith.constant 0 : index
      %c0_21 = arith.constant 0 : index
      %35 = vector.load %arg3[%c2, %c0_20, %c0_21] : memref<3x384x32xf32, #tpu.memory_space<vmem>>, vector<1x384x32xf32>
      %36 = vector.shape_cast %35 : vector<1x384x32xf32> to vector<384x32xf32>
      %cst_22 = arith.constant dense<0.000000e+00> : vector<256x32xf32>
      %37 = tpu.matmul %34, %36, %cst_22 {dimension_numbers = #tpu.dot_dimension_numbers<[1], [0], [0], [1], [0, 0, 1, 1], [], []>} : vector<256x384xf32>, vector<384x32xf32>, vector<256x32xf32> -> vector<256x32xf32>
      %38 = arith.addf %29, %37 : vector<256x32xf32>
      %c0_23 = arith.constant 0 : index
      %c0_24 = arith.constant 0 : index
      %39 = vector.load %arg4[%c0_23, %c0_24] : memref<256x64xf32, #tpu.memory_space<vmem>>, vector<256x64xf32>
      %40 = arith.index_cast %1 : i32 to index
      %c0_25 = arith.constant 0 : index
      %41 = vector.load %arg13[%40, %c0_25] : memref<256x224xf32, #tpu.memory_space<vmem>>, vector<256x64xf32>
      tpu.vector_store %arg13[%40, %c0_25], %39 {strides = array<i32>} : memref<256x224xf32, #tpu.memory_space<vmem>>, vector<256x64xf32>,
      %c0_26 = arith.constant 0 : index
      %c0_27 = arith.constant 0 : index
      %42 = vector.load %arg5[%c0_26, %c0_27] : memref<256x32xf32, #tpu.memory_space<vmem>>, vector<256x32xf32>
      %43 = arith.index_cast %1 : i32 to index
      %c64 = arith.constant 64 : index
      %44 = vector.load %arg13[%43, %c64] : memref<256x224xf32, #tpu.memory_space<vmem>>, vector<256x32xf32>
      tpu.vector_store %arg13[%43, %c64], %42 {strides = array<i32>} : memref<256x224xf32, #tpu.memory_space<vmem>>, vector<256x32xf32>,
      %c0_28 = arith.constant 0 : index
      %c0_29 = arith.constant 0 : index
      %45 = vector.load %arg6[%c0_28, %c0_29] : memref<256x32xf32, #tpu.memory_space<vmem>>, vector<256x32xf32>
      %46 = arith.index_cast %1 : i32 to index
      %c96 = arith.constant 96 : index
      %47 = vector.load %arg13[%46, %c96] : memref<256x224xf32, #tpu.memory_space<vmem>>, vector<256x32xf32>
      tpu.vector_store %arg13[%46, %c96], %45 {strides = array<i32>} : memref<256x224xf32, #tpu.memory_space<vmem>>, vector<256x32xf32>,
      %c0_30 = arith.constant 0 : index
      %c0_31 = arith.constant 0 : index
      %48 = vector.load %arg7[%c0_30, %c0_31] : memref<256x32xf32, #tpu.memory_space<vmem>>, vector<256x32xf32>
      %49 = arith.index_cast %1 : i32 to index
      %c128 = arith.constant 128 : index
      %50 = vector.load %arg13[%49, %c128] : memref<256x224xf32, #tpu.memory_space<vmem>>, vector<256x32xf32>
      tpu.vector_store %arg13[%49, %c128], %48 {strides = array<i32>} : memref<256x224xf32, #tpu.memory_space<vmem>>, vector<256x32xf32>,
      %51 = arith.index_cast %1 : i32 to index
      %c160 = arith.constant 160 : index
      %52 = vector.load %arg13[%51, %c160] : memref<256x224xf32, #tpu.memory_space<vmem>>, vector<256x32xf32>
      tpu.vector_store %arg13[%51, %c160], %38 {strides = array<i32>} : memref<256x224xf32, #tpu.memory_space<vmem>>, vector<256x32xf32>,
      %c0_32 = arith.constant 0 : index
      %c0_33 = arith.constant 0 : index
      %53 = vector.load %arg8[%c0_32, %c0_33] : memref<256x32xf32, #tpu.memory_space<vmem>>, vector<256x32xf32>
      %54 = arith.index_cast %1 : i32 to index
      %c192 = arith.constant 192 : index
      %55 = vector.load %arg13[%54, %c192] : memref<256x224xf32, #tpu.memory_space<vmem>>, vector<256x32xf32>
      tpu.vector_store %arg13[%54, %c192], %53 {strides = array<i32>} : memref<256x224xf32, #tpu.memory_space<vmem>>, vector<256x32xf32>,
      %56 = arith.index_cast %1 : i32 to index
      %c0_34 = arith.constant 0 : index
      %57 = vector.load %arg13[%56, %c0_34] : memref<256x224xf32, #tpu.memory_space<vmem>>, vector<256x224xf32>
      %c0_35 = arith.constant 0 : index
      %c0_36 = arith.constant 0 : index
      %58 = vector.load %arg14[%c0_35, %c0_36] : memref<2x224xf32, #tpu.memory_space<vmem>>, vector<1x224xf32>
      %cst_37 = arith.constant dense<0.000000e+00> : vector<224xf32>
      %59 = vector.multi_reduction <add>, %57, %cst_37 [0] : vector<256x224xf32> to vector<224xf32>
      %60 = vector.shape_cast %59 : vector<224xf32> to vector<1x224xf32>
      %61 = arith.addf %58, %60 : vector<1x224xf32>
      %c0_38 = arith.constant 0 : index
      %c0_39 = arith.constant 0 : index
      %62 = vector.load %arg14[%c0_38, %c0_39] : memref<2x224xf32, #tpu.memory_space<vmem>>, vector<1x224xf32>
      tpu.vector_store %arg14[%c0_38, %c0_39], %61 {strides = array<i32>} : memref<2x224xf32, #tpu.memory_space<vmem>>, vector<1x224xf32>,
      %c1_40 = arith.constant 1 : index
      %c0_41 = arith.constant 0 : index
      %63 = vector.load %arg14[%c1_40, %c0_41] : memref<2x224xf32, #tpu.memory_space<vmem>>, vector<1x224xf32>
      %64 = arith.mulf %57, %57 : vector<256x224xf32>
      %cst_42 = arith.constant dense<0.000000e+00> : vector<224xf32>
      %65 = vector.multi_reduction <add>, %64, %cst_42 [0] : vector<256x224xf32> to vector<224xf32>
      %66 = vector.shape_cast %65 : vector<224xf32> to vector<1x224xf32>
      %67 = arith.addf %63, %66 : vector<1x224xf32>
      %c1_43 = arith.constant 1 : index
      %c0_44 = arith.constant 0 : index
      %68 = vector.load %arg14[%c1_43, %c0_44] : memref<2x224xf32, #tpu.memory_space<vmem>>, vector<1x224xf32>
      tpu.vector_store %arg14[%c1_43, %c0_44], %67 {strides = array<i32>} : memref<2x224xf32, #tpu.memory_space<vmem>>, vector<1x224xf32>,
    } else {
    }
    %c1_i32 = arith.constant 1 : i32
    %5 = arith.cmpi eq, %arg0, %c1_i32 : i32
    %6 = arith.extui %5 : i1 to i32
    %c0_i32_1 = arith.constant 0 : i32
    %7 = arith.cmpi ne, %6, %c0_i32_1 : i32
    scf.if %7 {
      %c0_i32_2 = arith.constant 0 : i32
      %8 = arith.cmpi eq, %arg1, %c0_i32_2 : i32
      %9 = arith.extui %8 : i1 to i32
      %c0_i32_3 = arith.constant 0 : i32
      %10 = arith.cmpi ne, %9, %c0_i32_3 : i32
      scf.if %10 {
        %c0_9 = arith.constant 0 : index
        %c0_10 = arith.constant 0 : index
        %20 = vector.load %arg14[%c0_9, %c0_10] : memref<2x224xf32, #tpu.memory_space<vmem>>, vector<1x224xf32>
        %cst = arith.constant 3.906250e-03 : f32
        %21 = vector.broadcast %cst : f32 to vector<1x224xf32>
        %22 = arith.mulf %20, %21 : vector<1x224xf32>
        %c1_11 = arith.constant 1 : index
        %c0_12 = arith.constant 0 : index
        %23 = vector.load %arg14[%c1_11, %c0_12] : memref<2x224xf32, #tpu.memory_space<vmem>>, vector<1x224xf32>
        %cst_13 = arith.constant 3.906250e-03 : f32
        %24 = vector.broadcast %cst_13 : f32 to vector<1x224xf32>
        %25 = arith.mulf %23, %24 : vector<1x224xf32>
        %26 = arith.mulf %22, %22 : vector<1x224xf32>
        %27 = arith.subf %25, %26 : vector<1x224xf32>
        %cst_14 = arith.constant 0.000000e+00 : f32
        %28 = vector.broadcast %cst_14 : f32 to vector<1x224xf32>
        %29 = arith.maximumf %27, %28 : vector<1x224xf32>
        %c0_15 = arith.constant 0 : index
        %c0_16 = arith.constant 0 : index
        %30 = vector.load %arg9[%c0_15, %c0_16] : memref<1x224xf32, #tpu.memory_space<vmem>>, vector<1x224xf32>
        %cst_17 = arith.constant 9.99999974E-6 : f32
        %31 = vector.broadcast %cst_17 : f32 to vector<1x224xf32>
        %32 = arith.addf %29, %31 : vector<1x224xf32>
        %33 = math.rsqrt %32 : vector<1x224xf32>
        %34 = arith.mulf %30, %33 : vector<1x224xf32>
        %c0_18 = arith.constant 0 : index
        %c0_19 = arith.constant 0 : index
        %35 = vector.load %arg14[%c0_18, %c0_19] : memref<2x224xf32, #tpu.memory_space<vmem>>, vector<1x224xf32>
        tpu.vector_store %arg14[%c0_18, %c0_19], %34 {strides = array<i32>} : memref<2x224xf32, #tpu.memory_space<vmem>>, vector<1x224xf32>,
        %c0_20 = arith.constant 0 : index
        %c0_21 = arith.constant 0 : index
        %36 = vector.load %arg10[%c0_20, %c0_21] : memref<1x224xf32, #tpu.memory_space<vmem>>, vector<1x224xf32>
        %37 = arith.mulf %22, %34 : vector<1x224xf32>
        %38 = arith.subf %36, %37 : vector<1x224xf32>
        %c1_22 = arith.constant 1 : index
        %c0_23 = arith.constant 0 : index
        %39 = vector.load %arg14[%c1_22, %c0_23] : memref<2x224xf32, #tpu.memory_space<vmem>>, vector<1x224xf32>
        tpu.vector_store %arg14[%c1_22, %c0_23], %38 {strides = array<i32>} : memref<2x224xf32, #tpu.memory_space<vmem>>, vector<1x224xf32>,
      } else {
      }
      %11 = arith.index_cast %1 : i32 to index
      %c0 = arith.constant 0 : index
      %12 = vector.load %arg13[%11, %c0] : memref<256x224xf32, #tpu.memory_space<vmem>>, vector<256x224xf32>
      %c0_4 = arith.constant 0 : index
      %c0_5 = arith.constant 0 : index
      %13 = vector.load %arg14[%c0_4, %c0_5] : memref<2x224xf32, #tpu.memory_space<vmem>>, vector<1x224xf32>
      %14 = vector.broadcast %13 : vector<1x224xf32> to vector<256x224xf32>
      %15 = arith.mulf %12, %14 : vector<256x224xf32>
      %c1 = arith.constant 1 : index
      %c0_6 = arith.constant 0 : index
      %16 = vector.load %arg14[%c1, %c0_6] : memref<2x224xf32, #tpu.memory_space<vmem>>, vector<1x224xf32>
      %17 = vector.broadcast %16 : vector<1x224xf32> to vector<256x224xf32>
      %18 = arith.addf %15, %17 : vector<256x224xf32>
      %c0_7 = arith.constant 0 : index
      %c0_8 = arith.constant 0 : index
      %19 = vector.load %arg11[%c0_7, %c0_8] : memref<256x224xf32, #tpu.memory_space<vmem>>, vector<256x224xf32>
      tpu.vector_store %arg11[%c0_7, %c0_8], %18 {strides = array<i32>} : memref<256x224xf32, #tpu.memory_space<vmem>>, vector<256x224xf32>,
    } else {
    }
    return
  }
  func.func @transform_0(%arg0: i32, %arg1: i32) -> (i32, i32, i32) {
    %c0_i32 = arith.constant 0 : i32
    %c0_i32_0 = arith.constant 0 : i32
    %c0_i32_1 = arith.constant 0 : i32
    %c0_i32_2 = arith.constant 0 : i32
    return %c0_i32, %c0_i32_0, %c0_i32_1 : i32, i32, i32
  }
  func.func @transform_1(%arg0: i32, %arg1: i32) -> (i32, i32, i32) {
    %c0_i32 = arith.constant 0 : i32
    %c0_i32_0 = arith.constant 0 : i32
    %c0_i32_1 = arith.constant 0 : i32
    %c0_i32_2 = arith.constant 0 : i32
    return %c0_i32, %c0_i32_0, %c0_i32_1 : i32, i32, i32
  }
  func.func @transform_2(%arg0: i32, %arg1: i32) -> (i32, i32) {
    %c1_i32 = arith.constant 1 : i32
    %0 = arith.subi %c1_i32, %arg0 : i32
    %1 = arith.muli %arg1, %0 : i32
    %c0_i32 = arith.constant 0 : i32
    %c0_i32_0 = arith.constant 0 : i32
    return %1, %c0_i32 : i32, i32
  }
  func.func @transform_3(%arg0: i32, %arg1: i32) -> (i32, i32) {
    %c1_i32 = arith.constant 1 : i32
    %0 = arith.subi %c1_i32, %arg0 : i32
    %1 = arith.muli %arg1, %0 : i32
    %c0_i32 = arith.constant 0 : i32
    %c0_i32_0 = arith.constant 0 : i32
    return %1, %c0_i32 : i32, i32
  }
  func.func @transform_4(%arg0: i32, %arg1: i32) -> (i32, i32) {
    %c1_i32 = arith.constant 1 : i32
    %0 = arith.subi %c1_i32, %arg0 : i32
    %1 = arith.muli %arg1, %0 : i32
    %c0_i32 = arith.constant 0 : i32
    %c0_i32_0 = arith.constant 0 : i32
    return %1, %c0_i32 : i32, i32
  }
  func.func @transform_5(%arg0: i32, %arg1: i32) -> (i32, i32) {
    %c1_i32 = arith.constant 1 : i32
    %0 = arith.subi %c1_i32, %arg0 : i32
    %1 = arith.muli %arg1, %0 : i32
    %c0_i32 = arith.constant 0 : i32
    %c0_i32_0 = arith.constant 0 : i32
    return %1, %c0_i32 : i32, i32
  }
  func.func @transform_6(%arg0: i32, %arg1: i32) -> (i32, i32) {
    %c1_i32 = arith.constant 1 : i32
    %0 = arith.subi %c1_i32, %arg0 : i32
    %1 = arith.muli %arg1, %0 : i32
    %c0_i32 = arith.constant 0 : i32
    %c0_i32_0 = arith.constant 0 : i32
    return %1, %c0_i32 : i32, i32
  }
  func.func @transform_7(%arg0: i32, %arg1: i32) -> (i32, i32) {
    %c0_i32 = arith.constant 0 : i32
    %c0_i32_0 = arith.constant 0 : i32
    %c0_i32_1 = arith.constant 0 : i32
    return %c0_i32, %c0_i32_0 : i32, i32
  }
  func.func @transform_8(%arg0: i32, %arg1: i32) -> (i32, i32) {
    %c0_i32 = arith.constant 0 : i32
    %c0_i32_0 = arith.constant 0 : i32
    %c0_i32_1 = arith.constant 0 : i32
    return %c0_i32, %c0_i32_0 : i32, i32
  }
  func.func @transform_9(%arg0: i32, %arg1: i32) -> (i32, i32) {
    %0 = arith.muli %arg0, %arg1 : i32
    %c0_i32 = arith.constant 0 : i32
    %c0_i32_0 = arith.constant 0 : i32
    return %0, %c0_i32 : i32, i32
  }
}

</mosaic_0001>

<bundles_post_ra>
// kernel: tpu_custom_call.1
= control target key start
LH: loop header
LB: loop body
LE: loop exit
PB: predicated region body
PF: predicated region fallthrough
CT: control target
= control target key end

     0   :  { %s5569_s30 = smov 0   ;;  %s5571_s10 = smov 0   ;;  %s8862_s0 = inlined_call_operand.vmem [shape: f32[16,16,128], index: 0, kind: input, shape index: {}]   ;;  %s8863_s1 = inlined_call_operand.vmem [shape: f32[3,384,32], index: 1, kind: input, shape index: {}]   ;;  %s8864_s2 = inlined_call_operand.vmem [shape: f32[256,64], index: 2, kind: input, shape index: {}]   ;;  %s8865_s3 = inlined_call_operand.vmem [shape: f32[256,32], index: 3, kind: input, shape index: {}]   ;;  %s8866_s4 = inlined_call_operand.vmem [shape: f32[256,32], index: 4, kind: input, shape index: {}]   ;;  %s8867_s5 = inlined_call_operand.vmem [shape: f32[256,32], index: 5, kind: input, shape index: {}]   ;;  %s8868_s6 = inlined_call_operand.vmem [shape: f32[256,32], index: 6, kind: input, shape index: {}]   ;;  %s8869_s7 = inlined_call_operand.vmem [shape: f32[1,224], index: 7, kind: input, shape index: {}]   ;;  %s8870_s8 = inlined_call_operand.vmem [shape: f32[1,224], index: 8, kind: input, shape index: {}]   ;;  %s8871_s9 = inlined_call_operand.vmem [shape: f32[256,224], index: 9, kind: output, shape index: {}]  }
   0x1   :  { %s5573_s11 = smov 0  }
   0x2 LB: > { %s31_s12 = sadd.s32 1, %s5507_s10  ;;  %p4416_p0 = scmp.ge.s32.totalorder %s5511_s11, 1  ;;  %s5511_s11 = sphi %s5573_s11, %s19_s11   ;;  %s5507_s10 = sphi %s5571_s10, %s9019_s10   ;;  %s5503_s30 = sphi %s5569_s30, %s9018_s30  }
   0x3   : > { %p33_p1 = scmp.ge.s32.totalorder %s31_s12, 2  ;;  %p386_p2 = scmp.lt.s32.totalorder %s5511_s11, 3 }
   0x5   : > { %s9021_s12 = smov (%p33_p1, %s31_s12), 0  ;;  %p387_p3 = pnand %p4416_p0, %p386_p2 }
   0x6   : > { %p4417_p4 = scmp.ne.s32.totalorder (!%p387_p3), %s5503_s30, 0 }
   0x7   : > { %390 = sbr.rel (%p387_p3) target bundleno = 826 (0x33a), region = 56 }
   0xe   : > { %517 = sbr.rel (%p4417_p4) target bundleno = 745 (0x2e9), region = 60 }
  0x15   : > { %v4514_v0 = vld [vmem:[%s8863_s1 + $0x180] sm:$0xff]  ;;  %v4515_v1 = vld [vmem:[%s8863_s1 + $0x188] sm:$0xff]  ;;  %v8873_v3 = vmov 0.0|0.0   ;;  %v4516_v6 = vld [vmem:[%s8863_s1 + $0x190] sm:$0xff]  ;;  %v8872_v15 = vlaneseq  ;;  %s5515_s27 = smov 64   ;;  %s5516_s19 = smov 96  }
  0x16   : > { %v4546_v2 = vld [vmem:[%s8863_s1 + $0x280] sm:$0xff]  ;;  %5187 = vmatprep.subr.bf16.mxu0 %v8873_v3  ;;  %v5188_v4 = vpack.c.bf16 %v4515_v1, %v4514_v0  ;;  %v4547_v5 = vld [vmem:[%s8863_s1 + $0x288] sm:$0xff]  ;;  %v4517_v7 = vld [vmem:[%s8863_s1 + $0x198] sm:$0xff]  ;;  %vm2927_vm4 = vcmask 785920   ;;  %vm2734_vm5 = vcmask 523264   ;;  %vm3120_vm6 = vcmask 1048320  }
  0x17   : > { %v5235_v8 = vpack.c.bf16 %v4547_v5, %v4546_v2  ;;  %v4548_v9 = vld [vmem:[%s8863_s1 + $0x290] sm:$0xff]  ;;  %v4549_v10 = vld [vmem:[%s8863_s1 + $0x298] sm:$0xff]  ;;  %v5191_v11 = vpack.c.bf16 %v4517_v7, %v4516_v6  ;;  %v4550_v13 = vld [vmem:[%s8863_s1 + $0x2a0] sm:$0xff]  ;;  %v5635_v22 = vshrl.u32 %v8872_v15, 7  ;;  %vm3185_vm7 = vcmask 261120   ;;  %s5517_s17 = smov 32  }
  0x18   : > { %5189 = vmatpush1.bf16.msra.mxu0 %v5188_v4  ;;  %v5239_v12 = vpack.c.bf16 %v4549_v10, %v4548_v9  ;;  %v4551_v14 = vld [vmem:[%s8863_s1 + $0x2a8] sm:$0xff]  ;;  %v4518_v16 = vld [vmem:[%s8863_s1 + $0x1a0] sm:$0xff]  ;;  %v4552_v20 = vld [vmem:[%s8863_s1 + $0x2b0] sm:$0xff]  ;;  %vm522_vm8 = vcmask 1041408   ;;  %vm523_vm9 = vcmask 781314   ;;  %vm3346_vm11 = vcmask 523520  }
  0x19   : > { %5236 = vmatprep.subr.bf16.mxu1 %v5235_v8  ;;  %5190 = vmatprep.subr.bf16.mxu0 %v8873_v3  ;;  %v4519_v17 = vld [vmem:[%s8863_s1 + $0x1a8] sm:$0xff]  ;;  %v5243_v18 = vpack.c.bf16 %v4551_v14, %v4550_v13  ;;  %v4553_v21 = vld [vmem:[%s8863_s1 + $0x2b8] sm:$0xff]  ;;  %8929 = vst [vmem:[#allocation5_spill] sm:$0xff] %v5635_v22  ;;  %v4520_v23 = vld [vmem:[%s8863_s1 + $0x1b0] sm:$0xff]  ;;  %vm707_vm0 = vcmp.lt.s32.totalorder %v5635_v22, 7  ;;  %v5735_v60 = vadd.s32 8, %v5635_v22 }
  0x1a   : > { %5238 = vmatpush3.bf16.msra.mxu1 %v5235_v8  ;;  %v5194_v19 = vpack.c.bf16 %v4519_v17, %v4518_v16  ;;  %v4521_v24 = vld [vmem:[%s8863_s1 + $0x1b8] sm:$0xff]  ;;  %v5247_v25 = vpack.c.bf16 %v4553_v21, %v4552_v20  ;;  %v5647_v26 = vld [vmem:[%s8862_s0] sm:$0xff]  ;;  %v4555_v29 = vld [vmem:[%s8863_s1 + $0x2c8] sm:$0xff]  ;;  %vm608_vm2 = vcmp.lt.s32.totalorder %v5635_v22, 1  ;;  %vm574_vm3 = vcmp.ge.s32.totalorder %v5635_v22, 1 }
  0x1b   : > { %5240 = vmatprep.subr.bf16.mxu1 %v5239_v12  ;;  %v5197_v27 = vpack.c.bf16 %v4521_v24, %v4520_v23  ;;  %v4554_v28 = vld [vmem:[%s8863_s1 + $0x2c0] sm:$0xff]  ;;  %v5658_v30 = vld [vmem:[%s8862_s0 + $0x8] sm:$0xff]  ;;  %v675_v31 = vrot.slane %v5647_v26, 1  ;;  %1230 = vmatprep.mubr.f32.mxu0 %v5647_v26  ;;  %v4556_v38 = vld [vmem:[%s8863_s1 + $0x2d0] sm:$0xff]  ;;  %vm674_vm1 = vcmp.le.s32.totalorder %v5735_v60, 14  ;;  %vm3673_vm12 = vcmask 785408  }
  0x1c   : > { %5192 = vmatpush1.bf16.msra.mxu0 %v5191_v11  ;;  %v4522_v32 = vld [vmem:[%s8863_s1 + $0x1c0] sm:$0xff]  ;;  %v4523_v33 = vld [vmem:[%s8863_s1 + $0x1c8] sm:$0xff]  ;;  %v691_v34 = vrot.slane %v5658_v30, 1  ;;  %v5251_v35 = vpack.c.bf16 %v4555_v29, %v4554_v28  ;;  %v4557_v39 = vld [vmem:[%s8863_s1 + $0x2d8] sm:$0xff] }
  0x1d   : > { %5193 = vmatprep.subr.bf16.mxu0 %v8873_v3  ;;  %v5200_v37 = vpack.c.bf16 %v4523_v33, %v4522_v32  ;;  %v4524_v40 = vld [vmem:[%s8863_s1 + $0x1d0] sm:$0xff]  ;;  %v4525_v41 = vld [vmem:[%s8863_s1 + $0x1d8] sm:$0xff]  ;;  %v5255_v42 = vpack.c.bf16 %v4557_v39, %v4556_v38  ;;  %v4558_v44 = vld [vmem:[%s8863_s1 + $0x2e0] sm:$0xff] }
  0x1e   : > { %5242 = vmatpush3.bf16.msra.mxu1 %v5239_v12  ;;  %v5675_v36 = vsel %vm707_vm0, %v675_v31, %v691_v34  ;;  %v5203_v43 = vpack.c.bf16 %v4525_v41, %v4524_v40  ;;  %v4559_v45 = vld [vmem:[%s8863_s1 + $0x2e8] sm:$0xff]  ;;  %v4526_v46 = vld [vmem:[%s8863_s1 + $0x1e0] sm:$0xff]  ;;  %v4560_v50 = vld [vmem:[%s8863_s1 + $0x2f0] sm:$0xff]  ;;  %v5767_v7 = vsel %vm707_vm0, %v691_v34, %v675_v31 }
  0x1f   : > { %5244 = vmatprep.subr.bf16.mxu1 %v5243_v18  ;;  %4979 = vmatprep.mubr.f32.mxu1 %v5675_v36  ;;  %v4527_v47 = vld [vmem:[%s8863_s1 + $0x1e8] sm:$0xff]  ;;  %v5259_v48 = vpack.c.bf16 %v4559_v45, %v4558_v44  ;;  %v4561_v51 = vld [vmem:[%s8863_s1 + $0x2f8] sm:$0xff]  ;;  %v4528_v52 = vld [vmem:[%s8863_s1 + $0x1f0] sm:$0xff] }
  0x20   : > { %5195 = vmatpush1.bf16.msra.mxu0 %v5194_v19  ;;  %v5206_v49 = vpack.c.bf16 %v4527_v47, %v4526_v46  ;;  %v4529_v53 = vld [vmem:[%s8863_s1 + $0x1f8] sm:$0xff]  ;;  %v5263_v54 = vpack.c.bf16 %v4561_v51, %v4560_v50  ;;  %v5720_v56 = vld [vmem:[%s8862_s0 + $0x10] sm:$0xff]  ;;  %v4530_v58 = vld [vmem:[%s8863_s1 + $0x200] sm:$0xff] }
  0x21   : > { %5196 = vmatprep.subr.bf16.mxu0 %v8873_v3  ;;  %v5209_v55 = vpack.c.bf16 %v4529_v53, %v4528_v52  ;;  %v5725_v57 = vld [vmem:[%s8862_s0 + $0x18] sm:$0xff]  ;;  %v4531_v59 = vld [vmem:[%s8863_s1 + $0x208] sm:$0xff]  ;;  %v969_v61 = vld [vmem:[%s8863_s1] sm:$0xff]  ;;  %v676_v63 = vrot.slane %v5720_v56, 1 }
  0x22   : > { %5246 = vmatpush3.bf16.msra.mxu1 %v5243_v18  ;;  %v970_v62 = vld [vmem:[%s8863_s1 + $0x8] sm:$0xff]  ;;  %v692_v0 = vrot.slane %v5725_v57, 1  ;;  %v5212_v1 = vpack.c.bf16 %v4531_v59, %v4530_v58  ;;  %v5748_v2 = vld [vmem:[%s8862_s0 + $0x20] sm:$0xff]  ;;  %v4532_v5 = vld [vmem:[%s8863_s1 + $0x210] sm:$0xff] }
  0x23   : > { %5248 = vmatprep.subr.bf16.mxu1 %v5247_v25  ;;  %v5753_v4 = vld [vmem:[%s8862_s0 + $0x28] sm:$0xff]  ;;  %v4533_v6 = vld [vmem:[%s8863_s1 + $0x218] sm:$0xff]  ;;  %v5268_v8 = vpack.c.bf16 %v970_v62, %v969_v61  ;;  %v971_v10 = vld [vmem:[%s8863_s1 + $0x10] sm:$0xff]  ;;  %v677_v12 = vrot.slane %v5748_v2, 1 }
  0x24   : > { %5198 = vmatpush1.bf16.msra.mxu0 %v5197_v27  ;;  %v5772_v9 = vsel %vm707_vm0, %v676_v63, %v692_v0  ;;  %v972_v11 = vld [vmem:[%s8863_s1 + $0x18] sm:$0xff]  ;;  %v693_v13 = vrot.slane %v5753_v4, 1  ;;  %v5215_v14 = vpack.c.bf16 %v4533_v6, %v4532_v5  ;;  %v5785_v16 = vld [vmem:[%s8862_s0 + $0x30] sm:$0xff]  ;;  %v4534_v18 = vld [vmem:[%s8863_s1 + $0x220] sm:$0xff]  ;;  %v5805_v20 = vsel %vm707_vm0, %v692_v0, %v676_v63 }
  0x25   : > { %5199 = vmatprep.subr.bf16.mxu0 %v8873_v3  ;;  %v5790_v17 = vld [vmem:[%s8862_s0 + $0x38] sm:$0xff]  ;;  %v4535_v19 = vld [vmem:[%s8863_s1 + $0x228] sm:$0xff]  ;;  %8930 = vst [vmem:[#allocation6_spill] sm:$0xff] %v5805_v20  ;;  %v5271_v21 = vpack.c.bf16 %v972_v11, %v971_v10  ;;  %v973_v24 = vld [vmem:[%s8863_s1 + $0x20] sm:$0xff]  ;;  %v678_v27 = vrot.slane %v5785_v16, 1 }
  0x26   : > { %5250 = vmatpush3.bf16.msra.mxu1 %v5247_v25  ;;  %v5810_v23 = vsel %vm707_vm0, %v677_v12, %v693_v13  ;;  %v974_v25 = vld [vmem:[%s8863_s1 + $0x28] sm:$0xff]  ;;  %v694_v28 = vrot.slane %v5790_v17, 1  ;;  %v5218_v29 = vpack.c.bf16 %v4535_v19, %v4534_v18  ;;  %v5823_v31 = vld [vmem:[%s8862_s0 + $0x40] sm:$0xff]  ;;  %v4536_v33 = vld [vmem:[%s8863_s1 + $0x230] sm:$0xff] }
  0x27   : > { %5252 = vmatprep.subr.bf16.mxu1 %v5251_v35  ;;  %8931 = vst [vmem:[#allocation7_spill] sm:$0xff] %v5810_v23  ;;  %v5828_v32 = vld [vmem:[%s8862_s0 + $0x48] sm:$0xff]  ;;  %v4537_v34 = vld [vmem:[%s8863_s1 + $0x238] sm:$0xff]  ;;  %v975_v39 = vld [vmem:[%s8863_s1 + $0x30] sm:$0xff]  ;;  %v679_v41 = vrot.slane %v5823_v31, 1 }
  0x28   : > { %5201 = vmatpush1.bf16.msra.mxu0 %v5200_v37  ;;  %v5274_v37 = vpack.c.bf16 %v974_v25, %v973_v24  ;;  %v5848_v38 = vsel %vm707_vm0, %v678_v27, %v694_v28  ;;  %v976_v40 = vld [vmem:[%s8863_s1 + $0x38] sm:$0xff]  ;;  %v5861_v44 = vld [vmem:[%s8862_s0 + $0x50] sm:$0xff]  ;;  %v4538_v46 = vld [vmem:[%s8863_s1 + $0x240] sm:$0xff] }
  0x29   : > { %5202 = vmatprep.subr.bf16.mxu0 %v8873_v3  ;;  %8933 = vst [vmem:[#allocation9_spill] sm:$0xff] %v5848_v38  ;;  %v5866_v45 = vld [vmem:[%s8862_s0 + $0x58] sm:$0xff]  ;;  %v4539_v47 = vld [vmem:[%s8863_s1 + $0x248] sm:$0xff]  ;;  %v977_v51 = vld [vmem:[%s8863_s1 + $0x40] sm:$0xff]  ;;  %v680_v53 = vrot.slane %v5861_v44, 1 }
  0x2a   : > { %5254 = vmatpush3.bf16.msra.mxu1 %v5251_v35  ;;  %v5843_v35 = vsel %vm707_vm0, %v693_v13, %v677_v12  ;;  %v978_v52 = vld [vmem:[%s8863_s1 + $0x48] sm:$0xff]  ;;  %v5899_v58 = vld [vmem:[%s8862_s0 + $0x60] sm:$0xff]  ;;  %v4540_v61 = vld [vmem:[%s8863_s1 + $0x250] sm:$0xff] }
  0x2b   : > { %5256 = vmatprep.subr.bf16.mxu1 %v5255_v42  ;;  %8932 = vst [vmem:[#allocation8_spill] sm:$0xff] %v5843_v35  ;;  %v5904_v59 = vld [vmem:[%s8862_s0 + $0x68] sm:$0xff]  ;;  %v4541_v62 = vld [vmem:[%s8863_s1 + $0x258] sm:$0xff]  ;;  %v5280_v0 = vpack.c.bf16 %v978_v52, %v977_v51  ;;  %v979_v5 = vld [vmem:[%s8863_s1 + $0x50] sm:$0xff] }
  0x2c   : > { %5204 = vmatpush1.bf16.msra.mxu0 %v5203_v43  ;;  %v5221_v43 = vpack.c.bf16 %v4537_v34, %v4536_v33  ;;  %v980_v6 = vld [vmem:[%s8863_s1 + $0x58] sm:$0xff]  ;;  %v697_v10 = vrot.slane %v5904_v59, 1  ;;  %v5227_v11 = vpack.c.bf16 %v4541_v62, %v4540_v61  ;;  %v5937_v12 = vld [vmem:[%s8862_s0 + $0x70] sm:$0xff]  ;;  %v4543_v18 = vld [vmem:[%s8863_s1 + $0x268] sm:$0xff]  ;;  %v592_v61 = vrot.slane %v5658_v30, 7 }
  0x2d   : > { %5205 = vmatprep.subr.bf16.mxu0 %v8873_v3  ;;  %v5942_v13 = vld [vmem:[%s8862_s0 + $0x78] sm:$0xff]  ;;  %v981_v25 = vld [vmem:[%s8863_s1 + $0x60] sm:$0xff]  ;;  %v6021_v62 = vld [vmem:[%s8862_s0 + $0x90] sm:$0xff] }
  0x2e   : > { %5258 = vmatpush3.bf16.msra.mxu1 %v5255_v42  ;;  %v695_v42 = vrot.slane %v5828_v32, 1  ;;  %v5975_v34 = vld [vmem:[%s8862_s0 + $0x80] sm:$0xff]  ;;  %v984_v51 = vld [vmem:[%s8863_s1 + $0x78] sm:$0xff]  ;;  %v1007_v15 = vld [vmem:[%s8863_s1 + $0x130] sm:$0xff] }
  0x2f   : > { %5260 = vmatprep.subr.bf16.mxu1 %v5259_v48  ;;  %v683_v52 = vrot.slane %v5975_v34, 1  ;;  %vm524_vm10 = vmor %vm523_vm9, %vm522_vm8 }
  0x30   : > { %5207 = vmatpush1.bf16.msra.mxu0 %v5206_v49  ;;  %v5277_v49 = vpack.c.bf16 %v976_v40, %v975_v39  ;;  %v5886_v50 = vsel %vm707_vm0, %v679_v41, %v695_v42  ;;  %v5919_v63 = vsel %vm707_vm0, %v695_v42, %v679_v41  ;;  %v4544_v39 = vld [vmem:[%s8863_s1 + $0x270] sm:$0xff]  ;;  %v4545_v40 = vld [vmem:[%s8863_s1 + $0x278] sm:$0xff] }
  0x31   : > { %5208 = vmatprep.subr.bf16.mxu0 %v8873_v3  ;;  %8935 = vst [vmem:[#allocation11_spill] sm:$0xff] %v5886_v50  ;;  %8936 = vst [vmem:[#allocation12_spill] sm:$0xff] %v5919_v63 }
  0x32   : > { %5262 = vmatpush3.bf16.msra.mxu1 %v5259_v48  ;;  %v5881_v48 = vsel %vm707_vm0, %v694_v28, %v678_v27  ;;  %v982_v27 = vld [vmem:[%s8863_s1 + $0x68] sm:$0xff]  ;;  %v682_v28 = vrot.slane %v5937_v12, 1 }
  0x33   : > { %5264 = vmatprep.subr.bf16.mxu1 %v5263_v54  ;;  %8934 = vst [vmem:[#allocation10_spill] sm:$0xff] %v5881_v48  ;;  %v5286_v42 = vpack.c.bf16 %v982_v27, %v981_v25  ;;  %v684_v25 = vrot.slane %v6021_v62, 1 }
  0x34   : > { %5210 = vmatpush1.bf16.msra.mxu0 %v5209_v55  ;;  %v5224_v55 = vpack.c.bf16 %v4539_v47, %v4538_v46  ;;  %v1002_v46 = vld [vmem:[%s8863_s1 + $0x108] sm:$0xff] }
  0x35   : > { %5211 = vmatprep.subr.bf16.mxu0 %v8873_v3 }
  0x36   : > { %5266 = vmatpush3.bf16.msra.mxu1 %v5263_v54  ;;  %v696_v54 = vrot.slane %v5866_v45, 1 }
  0x37   : > { %5267 = vmatprep.subr.bf16.mxu1 %v8873_v3 }
  0x38   : > { %5213 = vmatpush1.bf16.msra.mxu0 %v5212_v1  ;;  %v5924_v1 = vsel %vm707_vm0, %v680_v53, %v696_v54  ;;  %v5957_v19 = vsel %vm707_vm0, %v696_v54, %v680_v53  ;;  %v5233_v54 = vpack.c.bf16 %v4545_v40, %v4544_v39 }
  0x39   : > { %4980 = vmatmul.mubr.msk.f32.vlgmr.msra.gmra.mrb[0].mxu1 %vm674_vm1, %v5767_v7  ;;  %5214 = vmatprep.subr.bf16.mxu0 %v8873_v3  ;;  %8937 = vst [vmem:[#allocation13_spill] sm:$0xff] %v5924_v1  ;;  %8938 = vst [vmem:[#allocation14_spill] sm:$0xff] %v5957_v19 }
  0x3a   : > { %5269 = vmatpush1.bf16.msra.mxu1 %v5268_v8  ;;  %4982 = vmatprep.mubr.f32.mxu1 %v5772_v9  ;;  %v681_v8 = vrot.slane %v5899_v58, 1 }
  0x3b   : > { %5270 = vmatprep.subr.bf16.mxu1 %v8873_v3 }
  0x3c   : > { %5216 = vmatpush1.bf16.msra.mxu0 %v5215_v14  ;;  %v4542_v14 = vld [vmem:[%s8863_s1 + $0x260] sm:$0xff]  ;;  %v5962_v24 = vsel %vm707_vm0, %v681_v8, %v697_v10  ;;  %v5995_v41 = vsel %vm707_vm0, %v697_v10, %v681_v8  ;;  %v1003_v10 = vld [vmem:[%s8863_s1 + $0x110] sm:$0xff] }
  0x3d   : > { %4983 = vmatmul.mubr.msk.f32.gmra.mrb[2].mxu1 %vm674_vm1, %v5805_v20  ;;  %5217 = vmatprep.subr.bf16.mxu0 %v8873_v3  ;;  %8939 = vst [vmem:[#allocation15_spill] sm:$0xff] %v5962_v24  ;;  %v5230_v33 = vpack.c.bf16 %v4543_v18, %v4542_v14  ;;  %8940 = vst [vmem:[#allocation16_spill] sm:$0xff] %v5995_v41  ;;  %v985_v18 = vld [vmem:[%s8863_s1 + $0x80] sm:$0xff] }
  0x3e   : > { %5272 = vmatpush1.bf16.msra.mxu1 %v5271_v21  ;;  %4985 = vmatprep.mubr.f32.mxu1 %v5810_v23  ;;  %v5283_v21 = vpack.c.bf16 %v980_v6, %v979_v5  ;;  %v1015_v23 = vld [vmem:[%s8863_s1 + $0x170] sm:$0xff]  ;;  %v4690_v20 = vld [vmem:[%s8863_s1 + $0x400] sm:$0xff] }
  0x3f   : > { %5273 = vmatprep.subr.bf16.mxu1 %v8873_v3 }
  0x40   : > { %5219 = vmatpush1.bf16.msra.mxu0 %v5218_v29  ;;  %v698_v29 = vrot.slane %v5942_v13, 1 }
  0x41   : > { %4986 = vmatmul.mubr.msk.f32.gmra.mrb[4].mxu1 %vm674_vm1, %v5843_v35  ;;  %5220 = vmatprep.subr.bf16.mxu0 %v8873_v3 }
  0x42   : > { %5275 = vmatpush1.bf16.msra.mxu1 %v5274_v37  ;;  %4988 = vmatprep.mubr.f32.mxu1 %v5848_v38  ;;  %v5980_v37 = vld [vmem:[%s8862_s0 + $0x88] sm:$0xff]  ;;  %v6006_v47 = vsel %vm707_vm0, %v682_v28, %v698_v29  ;;  %v6036_v6 = vsel %vm707_vm0, %v698_v29, %v682_v28  ;;  %v6065_v29 = vld [vmem:[%s8862_s0 + $0xa0] sm:$0xff]  ;;  %v6297_v38 = vld [vmem:[%s8862_s0 + $0xf8] sm:$0xff] }
  0x43   : > { %5276 = vmatprep.subr.bf16.mxu1 %v8873_v3  ;;  %8941 = vst [vmem:[#allocation17_spill] sm:$0xff] %v6006_v47  ;;  %v699_v53 = vrot.slane %v5980_v37, 1  ;;  %8942 = vst [vmem:[#allocation18_spill] sm:$0xff] %v6036_v6 }
  0x44   : > { %5222 = vmatpush1.bf16.msra.mxu0 %v5221_v43  ;;  %v1001_v43 = vld [vmem:[%s8863_s1 + $0x100] sm:$0xff] }
  0x45   : > { %4989 = vmatmul.mubr.msk.f32.gmra.mrb[6].mxu1 %vm674_vm1, %v5881_v48  ;;  %5223 = vmatprep.subr.bf16.mxu0 %v8873_v3  ;;  %v5315_v5 = vpack.c.bf16 %v1002_v46, %v1001_v43  ;;  %v6047_v14 = vsel %vm707_vm0, %v683_v52, %v699_v53  ;;  %v6078_v40 = vsel %vm707_vm0, %v699_v53, %v683_v52  ;;  %v1005_v43 = vld [vmem:[%s8863_s1 + $0x120] sm:$0xff]  ;;  %v1006_v46 = vld [vmem:[%s8863_s1 + $0x128] sm:$0xff]  ;;  %v988_v52 = vld [vmem:[%s8863_s1 + $0x98] sm:$0xff]  ;;  %v685_v53 = vrot.slane %v6065_v29, 1 }
  0x46   : > { %5278 = vmatpush1.bf16.msra.mxu1 %v5277_v49  ;;  %4991 = vmatprep.mubr.f32.mxu1 %v5886_v50  ;;  %v983_v49 = vld [vmem:[%s8863_s1 + $0x70] sm:$0xff]  ;;  %8943 = vst [vmem:[#allocation19_spill] sm:$0xff] %v6047_v14  ;;  %8944 = vst [vmem:[#allocation20_spill] sm:$0xff] %v6078_v40  ;;  %v1013_v48 = vld [vmem:[%s8863_s1 + $0x160] sm:$0xff] }
  0x47   : > { %5279 = vmatprep.subr.bf16.mxu1 %v8873_v3  ;;  %v5289_v8 = vpack.c.bf16 %v984_v51, %v983_v49  ;;  %v987_v51 = vld [vmem:[%s8863_s1 + $0x90] sm:$0xff] }
  0x48   : > { %5225 = vmatpush1.bf16.msra.mxu0 %v5224_v55  ;;  %v576_v55 = vrot.slane %v5647_v26, 7 }
  0x49   : > { %4992 = vmatmul.mubr.msk.f32.gmra.mrb[8].mxu1 %vm674_vm1, %v5919_v63  ;;  %5226 = vmatprep.subr.bf16.mxu0 %v8873_v3 }
  0x4a   : > { %5281 = vmatpush1.bf16.msra.mxu1 %v5280_v0  ;;  %4994 = vmatprep.mubr.f32.mxu1 %v5924_v1  ;;  %v6026_v0 = vld [vmem:[%s8862_s0 + $0x98] sm:$0xff]  ;;  %v6060_v28 = vsel %vm608_vm2, %v592_v61, %v576_v55  ;;  %v1011_v1 = vld [vmem:[%s8863_s1 + $0x150] sm:$0xff] }
  0x4b   : > { %5282 = vmatprep.subr.bf16.mxu1 %v8873_v3  ;;  %v700_v27 = vrot.slane %v6026_v0, 1 }
  0x4c   : > { %5228 = vmatpush1.bf16.msra.mxu0 %v5227_v11  ;;  %v1004_v11 = vld [vmem:[%s8863_s1 + $0x118] sm:$0xff] }
  0x4d   : > { %4995 = vmatmul.mubr.msk.f32.gmra.mrb[10].mxu1 %vm674_vm1, %v5957_v19  ;;  %5229 = vmatprep.subr.bf16.mxu0 %v8873_v3  ;;  %v5319_v39 = vpack.c.bf16 %v1004_v11, %v1003_v10  ;;  %v6092_v49 = vsel %vm707_vm0, %v684_v25, %v700_v27  ;;  %v577_v10 = vrot.slane %v5720_v56, 7  ;;  %v593_v11 = vrot.slane %v5725_v57, 7 }
  0x4e   : > { %5284 = vmatpush1.bf16.msra.mxu1 %v5283_v21  ;;  %4997 = vmatprep.mubr.f32.mxu1 %v5962_v24  ;;  %v986_v21 = vld [vmem:[%s8863_s1 + $0x88] sm:$0xff]  ;;  %8945 = vst [vmem:[#allocation21_spill] sm:$0xff] %v6092_v49  ;;  %v6207_v24 = vld [vmem:[%s8862_s0 + $0xd8] sm:$0xff] }
  0x4f   : > { %5285 = vmatprep.subr.bf16.mxu1 %v8873_v3 }
  0x50   : > { %5231 = vmatpush1.bf16.msra.mxu0 %v5230_v33  ;;  %v6070_v33 = vld [vmem:[%s8862_s0 + $0xa8] sm:$0xff] }
  0x51   : > { %4998 = vmatmul.mubr.msk.f32.gmra.mrb[12].mxu1 %vm674_vm1, %v5995_v41  ;;  %5232 = vmatprep.subr.bf16.mxu0 %v8873_v3  ;;  %v1009_v41 = vld [vmem:[%s8863_s1 + $0x140] sm:$0xff] }
  0x52   : > { %5287 = vmatpush1.bf16.msra.mxu1 %v5286_v42  ;;  %5000 = vmatprep.mubr.f32.mxu1 %v6006_v47  ;;  %v5292_v42 = vpack.c.bf16 %v986_v21, %v985_v18  ;;  %v6112_v18 = vld [vmem:[%s8862_s0 + $0xb0] sm:$0xff]  ;;  %v6117_v21 = vld [vmem:[%s8862_s0 + $0xb8] sm:$0xff] }
  0x53   : > { %5288 = vmatprep.subr.bf16.mxu1 %v8873_v3 }
  0x54   : > { %5234 = vmatpush1.bf16.msra.mxu0 %v5233_v54  ;;  %v701_v54 = vrot.slane %v6070_v33, 1 }
  0x55   : > { %5001 = vmatmul.mubr.msk.f32.gmra.mrb[14].mxu1 %vm674_vm1, %v6036_v6  ;;  %5316 = vmatprep.subr.bf16.mxu0 %v5315_v5 }
  0x56   : > { %5290 = vmatpush1.bf16.msra.mxu1 %v5289_v8  ;;  %5003 = vmatprep.mubr.f32.mxu1 %v6047_v14  ;;  %v6105_v8 = vsel %vm608_vm2, %v576_v55, %v592_v61  ;;  %v5323_v55 = vpack.c.bf16 %v1006_v46, %v1005_v43  ;;  %v6125_v61 = vsel %vm707_vm0, %v700_v27, %v684_v25  ;;  %v989_v25 = vld [vmem:[%s8863_s1 + $0xa0] sm:$0xff]  ;;  %v990_v27 = vld [vmem:[%s8863_s1 + $0xa8] sm:$0xff]  ;;  %v686_v43 = vrot.slane %v6112_v18, 1 }
  0x57   : > { %4711 = vmatmul.mubr.msk.f32.vlgmr.msra.gmra.mrb[0].mxu0 %vm574_vm3, %v6060_v28  ;;  %5291 = vmatprep.subr.bf16.mxu1 %v8873_v3  ;;  %8946 = vst [vmem:[#allocation22_spill] sm:$0xff] %v6125_v61  ;;  %v1008_v3 = vld [vmem:[%s8863_s1 + $0x138] sm:$0xff]  ;;  %v702_v46 = vrot.slane %v6117_v21, 1  ;;  %v6168_v6 = vsel %vm707_vm0, %v701_v54, %v685_v53  ;;  %v5298_v47 = vpack.c.bf16 %v990_v27, %v989_v25  ;;  %v578_v27 = vrot.slane %v5748_v2, 7 }
  0x58   : > { %5318 = vmatpush3.bf16.msra.mxu0 %v5315_v5  ;;  %1235 = vmatprep.mubr.f32.mxu0 %v5658_v30  ;;  %v5295_v5 = vpack.c.bf16 %v988_v52, %v987_v51  ;;  %v6150_v51 = vsel %vm608_vm2, %v593_v11, %v577_v10  ;;  %v6155_v52 = vld [vmem:[%s8862_s0 + $0xc0] sm:$0xff]  ;;  %v5327_v14 = vpack.c.bf16 %v1008_v3, %v1007_v15  ;;  %v991_v15 = vld [vmem:[%s8863_s1 + $0xb0] sm:$0xff] }
  0x59   : > { %5004 = vmatmul.mubr.msk.f32.gmra.mrb[16].mxu1 %vm674_vm1, %v6078_v40  ;;  %5320 = vmatprep.subr.bf16.mxu0 %v5319_v39  ;;  %v8947_v40 = vmov 0.0|0.0   ;;  %8949 = vst [vmem:[#allocation24_spill] sm:$0xff] %v6168_v6  ;;  %v6182_v3 = vsel %vm707_vm0, %v686_v43, %v702_v46  ;;  %v6195_v25 = vsel %vm608_vm2, %v577_v10, %v593_v11 }
  0x5a   : > { %5293 = vmatpush1.bf16.msra.mxu1 %v5292_v42  ;;  %5006 = vmatprep.mubr.f32.mxu1 %v6092_v49  ;;  %v6137_v42 = vsel %vm707_vm0, %v685_v53, %v701_v54  ;;  %v6160_v49 = vld [vmem:[%s8862_s0 + $0xc8] sm:$0xff]  ;;  %8950 = vst [vmem:[#allocation25_spill] sm:$0xff] %v6182_v3  ;;  %v992_v53 = vld [vmem:[%s8863_s1 + $0xb8] sm:$0xff]  ;;  %v687_v54 = vrot.slane %v6155_v52, 1  ;;  %v6215_v11 = vsel %vm707_vm0, %v702_v46, %v686_v43 }
  0x5b   : > { %1236 = vmatmul.mubr.f32.gmra.mrb[2].mxu0 %v6105_v8  ;;  %5294 = vmatprep.subr.bf16.mxu1 %v8947_v40  ;;  %8948 = vst [vmem:[#allocation23_spill] sm:$0xff] %v6137_v42  ;;  %8951 = vst [vmem:[#allocation26_spill] sm:$0xff] %v6215_v11  ;;  %v5301_v19 = vpack.c.bf16 %v992_v53, %v991_v15  ;;  %v994_v43 = vld [vmem:[%s8863_s1 + $0xc8] sm:$0xff]  ;;  %v6245_v53 = vld [vmem:[%s8862_s0 + $0xe0] sm:$0xff] }
  0x5c   : > { %1240 = vmatprep.mubr.f32.mxu0 %v5720_v56  ;;  %5322 = vmatpush3.bf16.msra.mxu0 %v5319_v39  ;;  %v1010_v39 = vld [vmem:[%s8863_s1 + $0x148] sm:$0xff] }
  0x5d   : > { %5007 = vmatmul.mubr.msk.f32.gmra.mrb[18].mxu1 %vm674_vm1, %v6125_v61  ;;  %5324 = vmatprep.subr.bf16.mxu0 %v5323_v55  ;;  %v6202_v61 = vld [vmem:[%s8862_s0 + $0xd0] sm:$0xff]  ;;  %v5331_v10 = vpack.c.bf16 %v1010_v39, %v1009_v41  ;;  %v704_v39 = vrot.slane %v6207_v24, 1 }
  0x5e   : > { %5296 = vmatpush1.bf16.msra.mxu1 %v5295_v5  ;;  %5009 = vmatprep.mubr.f32.mxu1 %v6137_v42  ;;  %v703_v5 = vrot.slane %v6160_v49, 1  ;;  %v594_v42 = vrot.slane %v5753_v4, 7  ;;  %v688_v46 = vrot.slane %v6202_v61, 1 }
  0x5f   : > { %4712 = vmatmul.mubr.msk.f32.gmra.mrb[4].mxu0 %vm574_vm3, %v6150_v51  ;;  %5297 = vmatprep.subr.bf16.mxu1 %v8947_v40 }
  0x60   : > { %1245 = vmatprep.mubr.f32.mxu0 %v5725_v57  ;;  %5326 = vmatpush3.bf16.msra.mxu0 %v5323_v55  ;;  %v1012_v55 = vld [vmem:[%s8863_s1 + $0x158] sm:$0xff]  ;;  %v6227_v41 = vsel %vm707_vm0, %v687_v54, %v703_v5  ;;  %v6240_v15 = vsel %vm608_vm2, %v594_v42, %v578_v27  ;;  %v6258_v63 = vsel %vm707_vm0, %v703_v5, %v687_v54  ;;  %v689_v5 = vrot.slane %v6245_v53, 1 }
  0x61   : > { %5010 = vmatmul.mubr.msk.f32.gmra.mrb[20].mxu1 %vm674_vm1, %v6168_v6  ;;  %5328 = vmatprep.subr.bf16.mxu0 %v5327_v14  ;;  %8952 = vst [vmem:[#allocation27_spill] sm:$0xff] %v6227_v41  ;;  %v5335_v6 = vpack.c.bf16 %v1012_v55, %v1011_v1  ;;  %8953 = vst [vmem:[#allocation28_spill] sm:$0xff] %v6258_v63  ;;  %v6272_v1 = vsel %vm707_vm0, %v688_v46, %v704_v39  ;;  %v996_v54 = vld [vmem:[%s8863_s1 + $0xd8] sm:$0xff] }
  0x62   : > { %5299 = vmatpush1.bf16.msra.mxu1 %v5298_v47  ;;  %5012 = vmatprep.mubr.f32.mxu1 %v6182_v3  ;;  %v993_v47 = vld [vmem:[%s8863_s1 + $0xc0] sm:$0xff]  ;;  %v6250_v3 = vld [vmem:[%s8862_s0 + $0xe8] sm:$0xff]  ;;  %8954 = vst [vmem:[#allocation29_spill] sm:$0xff] %v6272_v1 }
  0x63   : > { %1246 = vmatmul.mubr.f32.gmra.mrb[6].mxu0 %v6195_v25  ;;  %5300 = vmatprep.subr.bf16.mxu1 %v8947_v40  ;;  %v5304_v50 = vpack.c.bf16 %v994_v43, %v993_v47  ;;  %v705_v55 = vrot.slane %v6250_v3, 1  ;;  %v6285_v47 = vsel %vm608_vm2, %v578_v27, %v594_v42  ;;  %v579_v43 = vrot.slane %v5785_v16, 7 }
  0x64   : > { %1250 = vmatprep.mubr.f32.mxu0 %v5748_v2  ;;  %5330 = vmatpush3.bf16.msra.mxu0 %v5327_v14  ;;  %v1014_v14 = vld [vmem:[%s8863_s1 + $0x168] sm:$0xff]  ;;  %v6305_v27 = vsel %vm707_vm0, %v704_v39, %v688_v46 }
  0x65   : > { %5013 = vmatmul.mubr.msk.f32.gmra.mrb[22].mxu1 %vm674_vm1, %v6215_v11  ;;  %5332 = vmatprep.subr.bf16.mxu0 %v5331_v10  ;;  %v6292_v11 = vld [vmem:[%s8862_s0 + $0xf0] sm:$0xff]  ;;  %v5339_v42 = vpack.c.bf16 %v1014_v14, %v1013_v48  ;;  %v6317_v48 = vsel %vm707_vm0, %v689_v5, %v705_v55  ;;  %v998_v46 = vld [vmem:[%s8863_s1 + $0xe8] sm:$0xff]  ;;  %v706_v14 = vrot.slane %v6297_v38, 1 }
  0x66   : > { %5302 = vmatpush1.bf16.msra.mxu1 %v5301_v19  ;;  %5015 = vmatprep.mubr.f32.mxu1 %v6227_v41  ;;  %v995_v19 = vld [vmem:[%s8863_s1 + $0xd0] sm:$0xff]  ;;  %v595_v41 = vrot.slane %v5790_v17, 7  ;;  %8955 = vst [vmem:[#allocation30_spill] sm:$0xff] %v6317_v48  ;;  %v690_v39 = vrot.slane %v6292_v11, 1 }
  0x67   : > { %4713 = vmatmul.mubr.msk.f32.gmra.mrb[8].mxu0 %vm574_vm3, %v6240_v15  ;;  %5303 = vmatprep.subr.bf16.mxu1 %v8947_v40  ;;  %v5307_v35 = vpack.c.bf16 %v996_v54, %v995_v19 }
  0x68   : > { %1255 = vmatprep.mubr.f32.mxu0 %v5753_v4  ;;  %5334 = vmatpush3.bf16.msra.mxu0 %v5331_v10  ;;  %v1016_v10 = vld [vmem:[%s8863_s1 + $0x178] sm:$0xff]  ;;  %v6330_v19 = vsel %vm608_vm2, %v595_v41, %v579_v43 }
  0x69   : > { %5016 = vmatmul.mubr.msk.f32.gmra.mrb[24].mxu1 %vm674_vm1, %v6258_v63  ;;  %5336 = vmatprep.subr.bf16.mxu0 %v5335_v6  ;;  %v5343_v54 = vpack.c.bf16 %v1016_v10, %v1015_v23  ;;  %v6352_v23 = vsel %vm707_vm0, %v690_v39, %v706_v14  ;;  %v580_v10 = vrot.slane %v5823_v31, 7 }
  0x6a   : > { %5305 = vmatpush1.bf16.msra.mxu1 %v5304_v50  ;;  %5018 = vmatprep.mubr.f32.mxu1 %v6272_v1  ;;  %v997_v50 = vld [vmem:[%s8863_s1 + $0xe0] sm:$0xff]  ;;  %v6338_v1 = vsel %vm707_vm0, %v705_v55, %v689_v5  ;;  %v1000_v5 = vld [vmem:[%s8863_s1 + $0xf8] sm:$0xff]  ;;  %v6363_v55 = vsel %vm608_vm2, %v579_v43, %v595_v41 }
  0x6b   : > { %1256 = vmatmul.mubr.f32.gmra.mrb[10].mxu0 %v6285_v47  ;;  %5306 = vmatprep.subr.bf16.mxu1 %v8947_v40  ;;  %v5310_v63 = vpack.c.bf16 %v998_v46, %v997_v50  ;;  %v596_v50 = vrot.slane %v5828_v32, 7  ;;  %v4658_v43 = vld [vmem:[%s8863_s1 + $0x300] sm:$0xff] }
  0x6c   : > { %1260 = vmatprep.mubr.f32.mxu0 %v5785_v16  ;;  %5338 = vmatpush3.bf16.msra.mxu0 %v5335_v6  ;;  %v4691_v6 = vld [vmem:[%s8863_s1 + $0x408] sm:$0xff] }
  0x6d   : > { %5019 = vmatmul.mubr.msk.f32.gmra.mrb[26].mxu1 %vm674_vm1, %v6305_v27  ;;  %5340 = vmatprep.subr.bf16.mxu0 %v5339_v42  ;;  %v6370_v46 = vpack.c.bf16 %v4691_v6, %v4690_v20  ;;  %v4659_v20 = vld [vmem:[%s8863_s1 + $0x308] sm:$0xff]  ;;  %v6408_v6 = vsel %vm608_vm2, %v580_v10, %v596_v50 }
  0x6e   : > { %5308 = vmatpush1.bf16.msra.mxu1 %v5307_v35  ;;  %5021 = vmatprep.mubr.f32.mxu1 %v6317_v48  ;;  %v999_v35 = vld [vmem:[%s8863_s1 + $0xf0] sm:$0xff]  ;;  %v6375_v48 = vsel %vm707_vm0, %v706_v14, %v690_v39  ;;  %v5348_v39 = vpack.c.bf16 %v4659_v20, %v4658_v43  ;;  %v4662_v43 = vld [vmem:[%s8863_s1 + $0x320] sm:$0xff] }
  0x6f   : > { %4714 = vmatmul.mubr.msk.f32.gmra.mrb[12].mxu0 %vm574_vm3, %v6330_v19  ;;  %5309 = vmatprep.subr.bf16.mxu1 %v8947_v40  ;;  %v5313_v41 = vpack.c.bf16 %v1000_v5, %v999_v35  ;;  %v4660_v14 = vld [vmem:[%s8863_s1 + $0x310] sm:$0xff]  ;;  %v581_v35 = vrot.slane %v5861_v44, 7  ;;  %v597_v5 = vrot.slane %v5866_v45, 7 }
  0x70   : > { %1265 = vmatprep.mubr.f32.mxu0 %v5790_v17  ;;  %5342 = vmatpush3.bf16.msra.mxu0 %v5339_v42  ;;  %v8925_v42 = vmov 0.0  }
  0x71   : > { %5022 = vmatmul.mubr.msk.f32.gmra.mrb[28].mxu1 %vm674_vm1, %v6338_v1  ;;  %5344 = vmatprep.subr.bf16.mxu0 %v5343_v54 }
  0x72   : > { %5311 = vmatpush1.bf16.msra.mxu1 %v5310_v63  ;;  %5024 = vmatprep.mubr.f32.mxu1 %v6352_v23  ;;  %v6388_v63 = vsel %vm608_vm2, %v596_v50, %v580_v10  ;;  %v4663_v10 = vld [vmem:[%s8863_s1 + $0x328] sm:$0xff]  ;;  %v6425_v50 = vsel %vm608_vm2, %v597_v5, %v581_v35 }
  0x73   : > { %1266 = vmatmul.mubr.f32.gmra.mrb[14].mxu0 %v6363_v55  ;;  %5312 = vmatprep.subr.bf16.mxu1 %v8947_v40  ;;  %v5354_v20 = vpack.c.bf16 %v4663_v10, %v4662_v43  ;;  %v4668_v10 = vld [vmem:[%s8863_s1 + $0x350] sm:$0xff] }
  0x74   : > { %1270 = vmatprep.mubr.f32.mxu0 %v5823_v31  ;;  %5346 = vmatpush3.bf16.msra.mxu0 %v5343_v54  ;;  %v4661_v54 = vld [vmem:[%s8863_s1 + $0x318] sm:$0xff] }
  0x75   : > { %5025 = vmatmul.mubr.msk.f32.gmra.mrb[30].mxu1 %vm674_vm1, %v6375_v48  ;;  %5396 = vmatprep.subr.bf16.mxu0 %v6370_v46 }
  0x76   : > { %5314 = vmatpush1.bf16.msra.mxu1 %v5313_v41  ;;  %1680 = vmatprep.mubr.f32.mxu1 %v8925_v42  ;;  %v5351_v41 = vpack.c.bf16 %v4661_v54, %v4660_v14  ;;  %v4665_v14 = vld [vmem:[%s8863_s1 + $0x338] sm:$0xff]  ;;  %v582_v54 = vrot.slane %v5899_v58, 7 }
  0x77   : > { %4715 = vmatmul.mubr.msk.f32.gmra.mrb[16].mxu0 %vm574_vm3, %v6388_v63  ;;  %5347 = vmatprep.subr.bf16.mxu1 %v8947_v40 }
  0x78   : > { %1275 = vmatprep.mubr.f32.mxu0 %v5828_v32 }
  0x79   : > { %1681 = vmatmul.mubr.f32.vlgmr.msra.gmra.mrb[32].mxu1 %v8925_v42 }
  0x7a   : > { %1685 = vmatprep.mubr.f32.mxu1 %v8925_v42  ;;  %5349 = vmatpush1.bf16.msra.mxu1 %v5348_v39  ;;  %v4664_v39 = vld [vmem:[%s8863_s1 + $0x330] sm:$0xff] }
  0x7b   : > { %1276 = vmatmul.mubr.f32.gmra.mrb[18].mxu0 %v6408_v6  ;;  %5350 = vmatprep.subr.bf16.mxu1 %v8947_v40  ;;  %v5357_v43 = vpack.c.bf16 %v4665_v14, %v4664_v39  ;;  %v599_v39 = vrot.slane %v5942_v13, 7  ;;  %v2769_v14 = vld [vmem:[%s8865_s3 + $0x10] sm:$0xff] }
  0x7c   : > { %1280 = vmatprep.mubr.f32.mxu0 %v5861_v44  ;;  %2835 = vrot.lane.b32.xlu1 %v2769_v14, %s5515_s27  ;;  %v600_v14 = vrot.slane %v5980_v37, 7 }
  0x7d   : > { %1686 = vmatmul.mubr.f32.gmra.mrb[34].mxu1 %v8925_v42 }
  0x7e   : > { %1690 = vmatprep.mubr.f32.mxu1 %v5647_v26  ;;  %5352 = vmatpush1.bf16.msra.mxu1 %v5351_v41  ;;  %v6442_v26 = vsel %vm608_vm2, %v581_v35, %v597_v5  ;;  %v598_v41 = vrot.slane %v5904_v59, 7  ;;  %v4666_v35 = vld [vmem:[%s8863_s1 + $0x340] sm:$0xff]  ;;  %v4667_v5 = vld [vmem:[%s8863_s1 + $0x348] sm:$0xff] }
  0x7f   : > { %4716 = vmatmul.mubr.msk.f32.gmra.mrb[20].mxu0 %vm574_vm3, %v6425_v50  ;;  %5353 = vmatprep.subr.bf16.mxu1 %v8947_v40 }
  0x80   : > { %1285 = vmatprep.mubr.f32.mxu0 %v5866_v45 }
  0x81   : > { %4743 = vmatmul.mubr.msk.f32.gmra.mrb[36].mxu1 %vm574_vm3, %v6060_v28  ;;  %v6461_v28 = vsel %vm608_vm2, %v598_v41, %v582_v54 }
  0x82   : > { %1695 = vmatprep.mubr.f32.mxu1 %v5658_v30  ;;  %5355 = vmatpush1.bf16.msra.mxu1 %v5354_v20  ;;  %v5360_v30 = vpack.c.bf16 %v4667_v5, %v4666_v35  ;;  %v4669_v20 = vld [vmem:[%s8863_s1 + $0x358] sm:$0xff] }
  0x83   : > { %1286 = vmatmul.mubr.f32.gmra.mrb[22].mxu0 %v6442_v26  ;;  %5356 = vmatprep.subr.bf16.mxu1 %v8947_v40 }
  0x84   : > { %1290 = vmatprep.mubr.f32.mxu0 %v5899_v58 }
  0x85   : > { %1696 = vmatmul.mubr.f32.gmra.mrb[38].mxu1 %v6105_v8  ;;  %v583_v8 = vrot.slane %v5937_v12, 7 }
  0x86   : > { %1700 = vmatprep.mubr.f32.mxu1 %v5720_v56  ;;  %5358 = vmatpush1.bf16.msra.mxu1 %v5357_v43  ;;  %v6478_v56 = vsel %vm608_vm2, %v582_v54, %v598_v41  ;;  %v5363_v54 = vpack.c.bf16 %v4669_v20, %v4668_v10  ;;  %v4670_v41 = vld [vmem:[%s8863_s1 + $0x360] sm:$0xff]  ;;  %v4671_v43 = vld [vmem:[%s8863_s1 + $0x368] sm:$0xff]  ;;  %v4673_v10 = vld [vmem:[%s8863_s1 + $0x378] sm:$0xff]  ;;  %v584_v20 = vrot.slane %v5975_v34, 7 }
  0x87   : > { %4717 = vmatmul.mubr.msk.f32.gmra.mrb[24].mxu0 %vm574_vm3, %v6461_v28  ;;  %5359 = vmatprep.subr.bf16.mxu1 %v8947_v40  ;;  %v6501_v35 = vsel %vm608_vm2, %v599_v39, %v583_v8  ;;  %v5366_v5 = vpack.c.bf16 %v4671_v43, %v4670_v41 }
  0x88   : > { %1295 = vmatprep.mubr.f32.mxu0 %v5904_v59  ;;  %v6545_v43 = vsel %vm608_vm2, %v600_v14, %v584_v20 }
  0x89   : > { %4744 = vmatmul.mubr.msk.f32.gmra.mrb[40].mxu1 %vm574_vm3, %v6150_v51 }
  0x8a   : > { %1705 = vmatprep.mubr.f32.mxu1 %v5725_v57  ;;  %5361 = vmatpush1.bf16.msra.mxu1 %v5360_v30  ;;  %v2770_v57 = vld [vmem:[%s8865_s3 + $0x18] sm:$0xff]  ;;  %v4672_v30 = vld [vmem:[%s8863_s1 + $0x370] sm:$0xff] }
  0x8b   : > { %1296 = vmatmul.mubr.f32.gmra.mrb[26].mxu0 %v6478_v56  ;;  %5362 = vmatprep.subr.bf16.mxu1 %v8947_v40  ;;  %v5369_v41 = vpack.c.bf16 %v4673_v10, %v4672_v30  ;;  %v4677_v30 = vld [vmem:[%s8863_s1 + $0x398] sm:$0xff]  ;;  %v585_v10 = vrot.slane %v6021_v62, 7 }
  0x8c   : > { %1300 = vmatprep.mubr.f32.mxu0 %v5937_v12  ;;  %2837 = vrot.lane.b32.xlu1 %v2770_v57, %s5515_s27 }
  0x8d   : > { %1706 = vmatmul.mubr.f32.gmra.mrb[42].mxu1 %v6195_v25 }
  0x8e   : > { %1710 = vmatprep.mubr.f32.mxu1 %v5748_v2  ;;  %5364 = vmatpush1.bf16.msra.mxu1 %v5363_v54  ;;  %v6522_v2 = vsel %vm608_vm2, %v583_v8, %v599_v39  ;;  %v2772_v54 = vld [vmem:[%s8865_s3 + $0x28] sm:$0xff]  ;;  %v4674_v8 = vld [vmem:[%s8863_s1 + $0x380] sm:$0xff] }
  0x8f   : > { %4718 = vmatmul.mubr.msk.f32.gmra.mrb[28].mxu0 %vm574_vm3, %v6501_v35  ;;  %5365 = vmatprep.subr.bf16.mxu1 %v8947_v40  ;;  %v4675_v39 = vld [vmem:[%s8863_s1 + $0x388] sm:$0xff] }
  0x90   : > { %1305 = vmatprep.mubr.f32.mxu0 %v5942_v13  ;;  %2841 = vrot.lane.b32.xlu1 %v2772_v54, %s5515_s27  ;;  %v5372_v57 = vpack.c.bf16 %v4675_v39, %v4674_v8  ;;  %v601_v54 = vrot.slane %v6026_v0, 7 }
  0x91   : > { %4745 = vmatmul.mubr.msk.f32.gmra.mrb[44].mxu1 %vm574_vm3, %v6240_v15 }
  0x92   : > { %1715 = vmatprep.mubr.f32.mxu1 %v5753_v4  ;;  %5367 = vmatpush1.bf16.msra.mxu1 %v5366_v5  ;;  %v2774_v4 = vld [vmem:[%s8865_s3 + $0x38] sm:$0xff]  ;;  %v4676_v5 = vld [vmem:[%s8863_s1 + $0x390] sm:$0xff]  ;;  %v6589_v39 = vsel %vm608_vm2, %v601_v54, %v585_v10 }
  0x93   : > { %1306 = vmatmul.mubr.f32.gmra.mrb[30].mxu0 %v6522_v2  ;;  %5368 = vmatprep.subr.bf16.mxu1 %v8947_v40  ;;  %v5375_v8 = vpack.c.bf16 %v4677_v30, %v4676_v5  ;;  %v4681_v5 = vld [vmem:[%s8863_s1 + $0x3b8] sm:$0xff]  ;;  %v586_v30 = vrot.slane %v6065_v29, 7 }
  0x94   : > { %1310 = vmatprep.mubr.f32.mxu0 %v5975_v34  ;;  %2845 = vrot.lane.b32.xlu1 %v2774_v4, %s5515_s27 }
  0x95   : > { %1716 = vmatmul.mubr.f32.gmra.mrb[46].mxu1 %v6285_v47 }
  0x96   : > { %1720 = vmatprep.mubr.f32.mxu1 %v5785_v16  ;;  %5370 = vmatpush1.bf16.msra.mxu1 %v5369_v41  ;;  %v6566_v16 = vsel %vm608_vm2, %v584_v20, %v600_v14  ;;  %v2776_v41 = vld [vmem:[%s8865_s3 + $0x48] sm:$0xff]  ;;  %v4678_v20 = vld [vmem:[%s8863_s1 + $0x3a0] sm:$0xff] }
  0x97   : > { %4719 = vmatmul.mubr.msk.f32.gmra.mrb[32].mxu0 %vm574_vm3, %v6545_v43  ;;  %5371 = vmatprep.subr.bf16.mxu1 %v8947_v40  ;;  %v4679_v14 = vld [vmem:[%s8863_s1 + $0x3a8] sm:$0xff] }
  0x98   : > { %1315 = vmatprep.mubr.f32.mxu0 %v5980_v37  ;;  %2849 = vrot.lane.b32.xlu1 %v2776_v41, %s5515_s27  ;;  %v5378_v4 = vpack.c.bf16 %v4679_v14, %v4678_v20  ;;  %v602_v41 = vrot.slane %v6070_v33, 7 }
  0x99   : > { %4746 = vmatmul.mubr.msk.f32.gmra.mrb[48].mxu1 %vm574_vm3, %v6330_v19 }
  0x9a   : > { %1725 = vmatprep.mubr.f32.mxu1 %v5790_v17  ;;  %5373 = vmatpush1.bf16.msra.mxu1 %v5372_v57  ;;  %v2778_v17 = vld [vmem:[%s8865_s3 + $0x58] sm:$0xff]  ;;  %v4680_v57 = vld [vmem:[%s8863_s1 + $0x3b0] sm:$0xff]  ;;  %v6633_v14 = vsel %vm608_vm2, %v602_v41, %v586_v30 }
  0x9b   : > { %1316 = vmatmul.mubr.f32.gmra.mrb[34].mxu0 %v6566_v16  ;;  %5374 = vmatprep.subr.bf16.mxu1 %v8947_v40  ;;  %v5381_v20 = vpack.c.bf16 %v4681_v5, %v4680_v57  ;;  %v4685_v57 = vld [vmem:[%s8863_s1 + $0x3d8] sm:$0xff]  ;;  %v587_v5 = vrot.slane %v6112_v18, 7 }
  0x9c   : > { %1320 = vmatprep.mubr.f32.mxu0 %v6021_v62  ;;  %2853 = vrot.lane.b32.xlu1 %v2778_v17, %s5515_s27 }
  0x9d   : > { %1726 = vmatmul.mubr.f32.gmra.mrb[50].mxu1 %v6363_v55 }
  0x9e   : > { %1730 = vmatprep.mubr.f32.mxu1 %v5823_v31  ;;  %5376 = vmatpush1.bf16.msra.mxu1 %v5375_v8  ;;  %v6610_v31 = vsel %vm608_vm2, %v585_v10, %v601_v54  ;;  %v2780_v8 = vld [vmem:[%s8865_s3 + $0x68] sm:$0xff]  ;;  %v4682_v10 = vld [vmem:[%s8863_s1 + $0x3c0] sm:$0xff] }
  0x9f   : > { %4720 = vmatmul.mubr.msk.f32.gmra.mrb[36].mxu0 %vm574_vm3, %v6589_v39  ;;  %5377 = vmatprep.subr.bf16.mxu1 %v8947_v40  ;;  %v4683_v54 = vld [vmem:[%s8863_s1 + $0x3c8] sm:$0xff] }
  0xa0   : > { %1325 = vmatprep.mubr.f32.mxu0 %v6026_v0  ;;  %2857 = vrot.lane.b32.xlu1 %v2780_v8, %s5515_s27  ;;  %v5384_v17 = vpack.c.bf16 %v4683_v54, %v4682_v10  ;;  %v603_v8 = vrot.slane %v6117_v21, 7 }
  0xa1   : > { %4747 = vmatmul.mubr.msk.f32.gmra.mrb[52].mxu1 %vm574_vm3, %v6388_v63 }
  0xa2   : > { %1735 = vmatprep.mubr.f32.mxu1 %v5828_v32  ;;  %5379 = vmatpush1.bf16.msra.mxu1 %v5378_v4  ;;  %v2782_v32 = vld [vmem:[%s8865_s3 + $0x78] sm:$0xff]  ;;  %v4684_v4 = vld [vmem:[%s8863_s1 + $0x3d0] sm:$0xff]  ;;  %v6677_v54 = vsel %vm608_vm2, %v603_v8, %v587_v5 }
  0xa3   : > { %1326 = vmatmul.mubr.f32.gmra.mrb[38].mxu0 %v6610_v31  ;;  %5380 = vmatprep.subr.bf16.mxu1 %v8947_v40  ;;  %v5387_v10 = vpack.c.bf16 %v4685_v57, %v4684_v4  ;;  %v4689_v4 = vld [vmem:[%s8863_s1 + $0x3f8] sm:$0xff]  ;;  %v588_v57 = vrot.slane %v6155_v52, 7 }
  0xa4   : > { %1330 = vmatprep.mubr.f32.mxu0 %v6065_v29  ;;  %2861 = vrot.lane.b32.xlu1 %v2782_v32, %s5515_s27 }
  0xa5   : > { %1736 = vmatmul.mubr.f32.gmra.mrb[54].mxu1 %v6408_v6 }
  0xa6   : > { %1740 = vmatprep.mubr.f32.mxu1 %v5861_v44  ;;  %5382 = vmatpush1.bf16.msra.mxu1 %v5381_v20  ;;  %v6654_v44 = vsel %vm608_vm2, %v586_v30, %v602_v41  ;;  %v2784_v20 = vld [vmem:[%s8865_s3 + $0x88] sm:$0xff]  ;;  %v4686_v30 = vld [vmem:[%s8863_s1 + $0x3e0] sm:$0xff] }
  0xa7   : > { %4721 = vmatmul.mubr.msk.f32.gmra.mrb[40].mxu0 %vm574_vm3, %v6633_v14  ;;  %5383 = vmatprep.subr.bf16.mxu1 %v8947_v40  ;;  %v4687_v41 = vld [vmem:[%s8863_s1 + $0x3e8] sm:$0xff] }
  0xa8   : > { %1335 = vmatprep.mubr.f32.mxu0 %v6070_v33  ;;  %2865 = vrot.lane.b32.xlu1 %v2784_v20, %s5515_s27  ;;  %v5390_v32 = vpack.c.bf16 %v4687_v41, %v4686_v30  ;;  %v604_v20 = vrot.slane %v6160_v49, 7  ;;  %v605_v41 = vrot.slane %v6207_v24, 7 }
  0xa9   : > { %4748 = vmatmul.mubr.msk.f32.gmra.mrb[56].mxu1 %vm574_vm3, %v6425_v50 }
  0xaa   : > { %1745 = vmatprep.mubr.f32.mxu1 %v5866_v45  ;;  %5385 = vmatpush1.bf16.msra.mxu1 %v5384_v17  ;;  %v2786_v45 = vld [vmem:[%s8865_s3 + $0x98] sm:$0xff]  ;;  %v4688_v17 = vld [vmem:[%s8863_s1 + $0x3f0] sm:$0xff] }
  0xab   : > { %1336 = vmatmul.mubr.f32.gmra.mrb[42].mxu0 %v6654_v44  ;;  %5386 = vmatprep.subr.bf16.mxu1 %v8947_v40  ;;  %v5393_v30 = vpack.c.bf16 %v4689_v4, %v4688_v17  ;;  %v590_v17 = vrot.slane %v6245_v53, 7  ;;  %v606_v4 = vrot.slane %v6250_v3, 7 }
  0xac   : > { %1340 = vmatprep.mubr.f32.mxu0 %v6112_v18  ;;  %2869 = vrot.lane.b32.xlu1 %v2786_v45, %s5515_s27  ;;  %v2792_v45 = vld [vmem:[%s8865_s3 + $0xc8] sm:$0xff] }
  0xad   : > { %1746 = vmatmul.mubr.f32.gmra.mrb[58].mxu1 %v6442_v26 }
  0xae   : > { %1750 = vmatprep.mubr.f32.mxu1 %v5899_v58  ;;  %5388 = vmatpush1.bf16.msra.mxu1 %v5387_v10  ;;  %v6698_v58 = vsel %vm608_vm2, %v587_v5, %v603_v8  ;;  %v2788_v10 = vld [vmem:[%s8865_s3 + $0xa8] sm:$0xff]  ;;  %v6715_v5 = vsel %vm608_vm2, %v604_v20, %v588_v57  ;;  %v2790_v8 = vld [vmem:[%s8865_s3 + $0xb8] sm:$0xff] }
  0xaf   : > { %4722 = vmatmul.mubr.msk.f32.gmra.mrb[44].mxu0 %vm574_vm3, %v6677_v54  ;;  %5389 = vmatprep.subr.bf16.mxu1 %v8947_v40 }
  0xb0   : > { %1345 = vmatprep.mubr.f32.mxu0 %v6117_v21  ;;  %2873 = vrot.lane.b32.xlu1 %v2788_v10, %s5515_s27  ;;  %v591_v10 = vrot.slane %v6292_v11, 7 }
  0xb1   : > { %4749 = vmatmul.mubr.msk.f32.gmra.mrb[60].mxu1 %vm574_vm3, %v6461_v28 }
  0xb2   : > { %1755 = vmatprep.mubr.f32.mxu1 %v5904_v59  ;;  %5391 = vmatpush1.bf16.msra.mxu1 %v5390_v32  ;;  %v6729_v59 = vsel %vm608_vm2, %v588_v57, %v604_v20  ;;  %v2794_v32 = vld [vmem:[%s8865_s3 + $0xd8] sm:$0xff]  ;;  %v2796_v57 = vld [vmem:[%s8865_s3 + $0xe8] sm:$0xff] }
  0xb3   : > { %1346 = vmatmul.mubr.f32.gmra.mrb[46].mxu0 %v6698_v58  ;;  %5392 = vmatprep.subr.bf16.mxu1 %v8947_v40  ;;  %v589_v40 = vrot.slane %v6202_v61, 7  ;;  %v2798_v20 = vld [vmem:[%s8865_s3 + $0xf8] sm:$0xff] }
  0xb4   : > { %1350 = vmatprep.mubr.f32.mxu0 %v6155_v52  ;;  %2877 = vrot.lane.b32.xlu1 %v2790_v8, %s5515_s27  ;;  %v2961_v8 = vld [vmem:[%s8866_s4 + $0x8] sm:$0xff] }
  0xb5   : > { %1756 = vmatmul.mubr.f32.gmra.mrb[62].mxu1 %v6478_v56 }
  0xb6   : > { %1760 = vmatprep.mubr.f32.mxu1 %v5937_v12  ;;  %5394 = vmatpush1.bf16.msra.mxu1 %v5393_v30  ;;  %v6745_v12 = vsel %vm608_vm2, %v605_v41, %v589_v40  ;;  %v607_v30 = vrot.slane %v6297_v38, 7 }
  0xb7   : > { %4723 = vmatmul.mubr.msk.f32.gmra.mrb[48].mxu0 %vm574_vm3, %v6715_v5 }
  0xb8   : > { %1355 = vmatprep.mubr.f32.mxu0 %v6160_v49  ;;  %2881 = vrot.lane.b32.xlu1 %v2792_v45, %s5515_s27  ;;  %v2768_v45 = vld [vmem:[%s8865_s3 + $0x8] sm:$0xff] }
  0xb9   : > { %4750 = vmatmul.mubr.msk.f32.gmra.mrb[64].mxu1 %vm574_vm3, %v6501_v35 }
  0xba   : > { %1765 = vmatprep.mubr.f32.mxu1 %v5942_v13  ;;  %v6759_v13 = vsel %vm608_vm2, %v589_v40, %v605_v41  ;;  %v2963_v40 = vld [vmem:[%s8866_s4 + $0x18] sm:$0xff] }
  0xbb   : > { %1356 = vmatmul.mubr.f32.gmra.mrb[50].mxu0 %v6729_v59  ;;  %v4693_v41 = vld [vmem:[%s8863_s1 + $0x418] sm:$0xff] }
  0xbc   : > { %1360 = vmatprep.mubr.f32.mxu0 %v6202_v61  ;;  %2885 = vrot.lane.b32.xlu1 %v2794_v32, %s5515_s27 }
  0xbd   : > { %1766 = vmatmul.mubr.f32.gmra.mrb[66].mxu1 %v6522_v2 }
  0xbe   : > { %1770 = vmatprep.mubr.f32.mxu1 %v5975_v34  ;;  %v6775_v34 = vsel %vm608_vm2, %v606_v4, %v590_v17 }
  0xbf   : > { %4724 = vmatmul.mubr.msk.f32.gmra.mrb[52].mxu0 %vm574_vm3, %v6745_v12 }
  0xc0   : > { %1365 = vmatprep.mubr.f32.mxu0 %v6207_v24  ;;  %2889 = vrot.lane.b32.xlu1 %v2796_v57, %s5515_s27  ;;  %v2771_v57 = vld [vmem:[%s8865_s3 + $0x20] sm:$0xff] }
  0xc1   : > { %4751 = vmatmul.mubr.msk.f32.gmra.mrb[68].mxu1 %vm574_vm3, %v6545_v43 }
  0xc2   : > { %1775 = vmatprep.mubr.f32.mxu1 %v5980_v37  ;;  %v6789_v37 = vsel %vm608_vm2, %v590_v17, %v606_v4  ;;  %v4694_v17 = vld [vmem:[%s8863_s1 + $0x420] sm:$0xff]  ;;  %v4695_v4 = vld [vmem:[%s8863_s1 + $0x428] sm:$0xff] }
  0xc3   : > { %1366 = vmatmul.mubr.f32.gmra.mrb[54].mxu0 %v6759_v13 }
  0xc4   : > { %1370 = vmatprep.mubr.f32.mxu0 %v6245_v53  ;;  %2893 = vrot.lane.b32.xlu1 %v2798_v20, %s5515_s27  ;;  %v5403_v20 = vpack.c.bf16 %v4695_v4, %v4694_v17  ;;  %v2975_v17 = vld [vmem:[%s8866_s4 + $0x78] sm:$0xff] }
  0xc5   : > { %1776 = vmatmul.mubr.f32.gmra.mrb[70].mxu1 %v6566_v16 }
  0xc6   : > { %1780 = vmatprep.mubr.f32.mxu1 %v6021_v62  ;;  %v6805_v62 = vsel %vm608_vm2, %v607_v30, %v591_v10 }
  0xc7   : > { %4725 = vmatmul.mubr.msk.f32.gmra.mrb[56].mxu0 %vm574_vm3, %v6775_v34 }
  0xc8   : > { %1375 = vmatprep.mubr.f32.mxu0 %v6250_v3  ;;  %3026 = vrot.lane.b32.xlu1 %v2961_v8, %s5516_s19  ;;  %v4698_v8 = vld [vmem:[%s8863_s1 + $0x440] sm:$0xff] }
  0xc9   : > { %4752 = vmatmul.mubr.msk.f32.gmra.mrb[72].mxu1 %vm574_vm3, %v6589_v39 }
  0xca   : > { %1785 = vmatprep.mubr.f32.mxu1 %v6026_v0  ;;  %v2767_v0 = vld [vmem:[%s8865_s3] sm:$0xff] }
  0xcb   : > { %1376 = vmatmul.mubr.f32.gmra.mrb[58].mxu0 %v6789_v37  ;;  %2831 = vrot.lane.b32.xlu0 %v2767_v0, %s5515_s27  ;;  %v8957_v0 = vld [vmem:[#allocation6_spill] sm:$0xff] }
  0xcc   : > { %1380 = vmatprep.mubr.f32.mxu0 %v6292_v11  ;;  %3030 = vrot.lane.b32.xlu1 %v2963_v40, %s5516_s19  ;;  %v6823_v11 = vsel %vm608_vm2, %v591_v10, %v607_v30  ;;  %v4696_v10 = vld [vmem:[%s8863_s1 + $0x430] sm:$0xff]  ;;  %v2775_v40 = vld [vmem:[%s8865_s3 + $0x40] sm:$0xff] }
  0xcd   : > { %1786 = vmatmul.mubr.f32.gmra.mrb[74].mxu1 %v6610_v31  ;;  %8956 = vst [vmem:[#allocation31_spill] sm:$0xff] %v6823_v11 }
  0xce   : > { %1790 = vmatprep.mubr.f32.mxu1 %v6065_v29  ;;  %v2965_v29 = vld [vmem:[%s8866_s4 + $0x28] sm:$0xff] }
  0xcf   : > { %4726 = vmatmul.mubr.msk.f32.gmra.mrb[60].mxu0 %vm574_vm3, %v6805_v62  ;;  %2833 = vrot.lane.b32.xlu0 %v2768_v45, %s5515_s27  ;;  %v4701_v45 = vld [vmem:[%s8863_s1 + $0x458] sm:$0xff] }
  0xd0   : > { %1385 = vmatprep.mubr.f32.mxu0 %v6297_v38  ;;  %3034 = vrot.lane.b32.xlu1 %v2965_v29, %s5516_s19  ;;  %v4692_v38 = vld [vmem:[%s8863_s1 + $0x410] sm:$0xff]  ;;  %v2973_v29 = vld [vmem:[%s8866_s4 + $0x68] sm:$0xff] }
  0xd1   : > { %4753 = vmatmul.mubr.msk.f32.gmra.mrb[76].mxu1 %vm574_vm3, %v6633_v14  ;;  %v5399_v32 = vpack.c.bf16 %v4693_v41, %v4692_v38  ;;  %v4700_v41 = vld [vmem:[%s8863_s1 + $0x450] sm:$0xff] }
  0xd2   : > { %1795 = vmatprep.mubr.f32.mxu1 %v6070_v33  ;;  %v2967_v33 = vld [vmem:[%s8866_s4 + $0x38] sm:$0xff]  ;;  %v5415_v4 = vpack.c.bf16 %v4701_v45, %v4700_v41  ;;  %v8965_v41 = vld [vmem:[#allocation14_spill] sm:$0xff] }
  0xd3   : > { %1386 = vmatmul.mubr.f32.gmra.mrb[62].mxu0 %v6823_v11  ;;  %2839 = vrot.lane.b32.xlu0 %v2771_v57, %s5515_s27  ;;  %v4702_v57 = vld [vmem:[%s8863_s1 + $0x460] sm:$0xff]  ;;  %v8966_v45 = vld [vmem:[#allocation15_spill] sm:$0xff] }
  0xd4   : > { %5059 = vmatprep.mubr.f32.mxu0 %v8925_v42  ;;  %3038 = vrot.lane.b32.xlu1 %v2967_v33, %s5516_s19  ;;  %v2777_v33 = vld [vmem:[%s8865_s3 + $0x50] sm:$0xff] }
  0xd5   : > { %1796 = vmatmul.mubr.f32.gmra.mrb[78].mxu1 %v6654_v44 }
  0xd6   : > { %1800 = vmatprep.mubr.f32.mxu1 %v6112_v18  ;;  %v2969_v18 = vld [vmem:[%s8866_s4 + $0x48] sm:$0xff] }
  0xd7   : > { %5060 = vmatmul.mubr.f32.vlgmr.msra.gmra.mrb[64].mxu0 %v8925_v42 }
  0xd8   : > { %5398 = vmatpush3.bf16.msra.mxu0 %v6370_v46  ;;  %5062 = vmatprep.mubr.f32.mxu0 %v5675_v36  ;;  %v4697_v36 = vld [vmem:[%s8863_s1 + $0x438] sm:$0xff]  ;;  %v2773_v46 = vld [vmem:[%s8865_s3 + $0x30] sm:$0xff] }
  0xd9   : > { %4754 = vmatmul.mubr.msk.f32.gmra.mrb[80].mxu1 %vm574_vm3, %v6677_v54  ;;  %5400 = vmatprep.subr.bf16.mxu0 %v5399_v32  ;;  %v5407_v30 = vpack.c.bf16 %v4697_v36, %v4696_v10  ;;  %v8961_v10 = vld [vmem:[#allocation10_spill] sm:$0xff] }
  0xda   : > { %1805 = vmatprep.mubr.f32.mxu1 %v6117_v21  ;;  %3042 = vrot.lane.b32.xlu1 %v2969_v18, %s5516_s19  ;;  %v2971_v21 = vld [vmem:[%s8866_s4 + $0x58] sm:$0xff]  ;;  %v4703_v18 = vld [vmem:[%s8863_s1 + $0x468] sm:$0xff] }
  0xdb   : > { %5063 = vmatmul.mubr.msk.f32.gmra.mrb[66].mxu0 %vm674_vm1, %v5767_v7  ;;  %2843 = vrot.lane.b32.xlu0 %v2773_v46, %s5515_s27  ;;  %v4699_v7 = vld [vmem:[%s8863_s1 + $0x448] sm:$0xff]  ;;  %v5419_v46 = vpack.c.bf16 %v4703_v18, %v4702_v57  ;;  %v3381_v57 = vld [vmem:[%s8868_s6 + $0x10] sm:$0xff]  ;;  %v2787_v18 = vld [vmem:[%s8865_s3 + $0xa0] sm:$0xff] }
  0xdc   : > { %5065 = vmatprep.mubr.f32.mxu0 %v5772_v9  ;;  %5402 = vmatpush3.bf16.msra.mxu0 %v5399_v32  ;;  %v5411_v38 = vpack.c.bf16 %v4699_v7, %v4698_v8  ;;  %v8959_v32 = vld [vmem:[#allocation8_spill] sm:$0xff]  ;;  %v2977_v36 = vld [vmem:[%s8866_s4 + $0x88] sm:$0xff]  ;;  %v2781_v8 = vld [vmem:[%s8865_s3 + $0x70] sm:$0xff] }
  0xdd   : > { %1806 = vmatmul.mubr.f32.gmra.mrb[82].mxu1 %v6698_v58  ;;  %5404 = vmatprep.subr.bf16.mxu0 %v5403_v20  ;;  %v8963_v7 = vld [vmem:[#allocation12_spill] sm:$0xff] }
  0xde   : > { %1810 = vmatprep.mubr.f32.mxu1 %v6155_v52  ;;  %3046 = vrot.lane.b32.xlu1 %v2971_v21, %s5516_s19  ;;  %v8958_v52 = vld [vmem:[#allocation7_spill] sm:$0xff] }
  0xdf   : > { %5066 = vmatmul.mubr.msk.f32.gmra.mrb[68].mxu0 %vm674_vm1, %v8957_v0  ;;  %2847 = vrot.lane.b32.xlu0 %v2775_v40, %s5515_s27  ;;  %v4704_v21 = vld [vmem:[%s8863_s1 + $0x470] sm:$0xff]  ;;  %v2979_v40 = vld [vmem:[%s8866_s4 + $0x98] sm:$0xff] }
  0xe0   : > { %5068 = vmatprep.mubr.f32.mxu0 %v8958_v52  ;;  %5406 = vmatpush3.bf16.msra.mxu0 %v5403_v20  ;;  %v2779_v20 = vld [vmem:[%s8865_s3 + $0x60] sm:$0xff] }
  0xe1   : > { %4755 = vmatmul.mubr.msk.f32.gmra.mrb[84].mxu1 %vm574_vm3, %v6715_v5  ;;  %5408 = vmatprep.subr.bf16.mxu0 %v5407_v30 }
  0xe2   : > { %1815 = vmatprep.mubr.f32.mxu1 %v6160_v49  ;;  %3050 = vrot.lane.b32.xlu1 %v2973_v29, %s5516_s19  ;;  %v8960_v49 = vld [vmem:[#allocation9_spill] sm:$0xff] }
  0xe3   : > { %5069 = vmatmul.mubr.msk.f32.gmra.mrb[70].mxu0 %vm674_vm1, %v8959_v32  ;;  %2851 = vrot.lane.b32.xlu0 %v2777_v33, %s5515_s27  ;;  %v3380_v33 = vld [vmem:[%s8868_s6 + $0x8] sm:$0xff] }
  0xe4   : > { %5071 = vmatprep.mubr.f32.mxu0 %v8960_v49  ;;  %5410 = vmatpush3.bf16.msra.mxu0 %v5407_v30  ;;  %v4705_v30 = vld [vmem:[%s8863_s1 + $0x478] sm:$0xff] }
  0xe5   : > { %1816 = vmatmul.mubr.f32.gmra.mrb[86].mxu1 %v6729_v59  ;;  %5412 = vmatprep.subr.bf16.mxu0 %v5411_v38  ;;  %v5423_v29 = vpack.c.bf16 %v4705_v30, %v4704_v21  ;;  %v5458_v21 = vld [vmem:[%s8862_s0 + $0x18] sm:$0xff]  ;;  %v2789_v30 = vld [vmem:[%s8865_s3 + $0xb0] sm:$0xff] }
  0xe6   : > { %1820 = vmatprep.mubr.f32.mxu1 %v6202_v61  ;;  %3054 = vrot.lane.b32.xlu1 %v2975_v17, %s5516_s19  ;;  %v8962_v61 = vld [vmem:[#allocation11_spill] sm:$0xff]  ;;  %v8967_v17 = vld [vmem:[#allocation16_spill] sm:$0xff] }
  0xe7   : > { %5072 = vmatmul.mubr.msk.f32.gmra.mrb[72].mxu0 %vm674_vm1, %v8961_v10  ;;  %2855 = vrot.lane.b32.xlu0 %v2779_v20, %s5515_s27  ;;  %v8969_v20 = vld [vmem:[#allocation18_spill] sm:$0xff] }
  0xe8   : > { %5074 = vmatprep.mubr.f32.mxu0 %v8962_v61  ;;  %5414 = vmatpush3.bf16.msra.mxu0 %v5411_v38  ;;  %v2783_v38 = vld [vmem:[%s8865_s3 + $0x80] sm:$0xff] }
  0xe9   : > { %4756 = vmatmul.mubr.msk.f32.gmra.mrb[88].mxu1 %vm574_vm3, %v6745_v12  ;;  %5416 = vmatprep.subr.bf16.mxu0 %v5415_v4 }
  0xea   : > { %1825 = vmatprep.mubr.f32.mxu1 %v6207_v24  ;;  %3058 = vrot.lane.b32.xlu1 %v2977_v36, %s5516_s19  ;;  %v8964_v24 = vld [vmem:[#allocation13_spill] sm:$0xff]  ;;  %v8970_v36 = vld [vmem:[#allocation19_spill] sm:$0xff] }
  0xeb   : > { %5075 = vmatmul.mubr.msk.f32.gmra.mrb[74].mxu0 %vm674_vm1, %v8963_v7  ;;  %2859 = vrot.lane.b32.xlu0 %v2781_v8, %s5515_s27  ;;  %v8971_v8 = vld [vmem:[#allocation20_spill] sm:$0xff] }
  0xec   : > { %5077 = vmatprep.mubr.f32.mxu0 %v8964_v24  ;;  %5418 = vmatpush3.bf16.msra.mxu0 %v5415_v4  ;;  %v8968_v4 = vld [vmem:[#allocation17_spill] sm:$0xff] }
  0xed   : > { %1826 = vmatmul.mubr.f32.gmra.mrb[90].mxu1 %v6759_v13  ;;  %5420 = vmatprep.subr.bf16.mxu0 %v5419_v46 }
  0xee   : > { %1830 = vmatprep.mubr.f32.mxu1 %v6245_v53  ;;  %3062 = vrot.lane.b32.xlu1 %v2979_v40, %s5516_s19  ;;  %v2785_v53 = vld [vmem:[%s8865_s3 + $0x90] sm:$0xff]  ;;  %v2836_v40 = vpop.permute.xlu1 %2835 }
  0xef   : > { %5078 = vmatmul.mubr.msk.f32.gmra.mrb[76].mxu0 %vm674_vm1, %v8965_v41  ;;  %2863 = vrot.lane.b32.xlu0 %v2783_v38, %s5515_s27  ;;  %v3383_v38 = vld [vmem:[%s8868_s6 + $0x20] sm:$0xff] }
  0xf0   : > { %5080 = vmatprep.mubr.f32.mxu0 %v8966_v45  ;;  %5422 = vmatpush3.bf16.msra.mxu0 %v5419_v46  ;;  %v3382_v46 = vld [vmem:[%s8868_s6 + $0x18] sm:$0xff] }
  0xf1   : > { %4757 = vmatmul.mubr.msk.f32.gmra.mrb[92].mxu1 %vm574_vm3, %v6775_v34  ;;  %5424 = vmatprep.subr.bf16.mxu0 %v5423_v29 }
  0xf2   : > { %1835 = vmatprep.mubr.f32.mxu1 %v6250_v3  ;;  %3445 = vrot.lane.b32.xlu1 %v3380_v33, %s5515_s27  ;;  %v5457_v3 = vld [vmem:[%s8862_s0 + $0x10] sm:$0xff]  ;;  %v5459_v33 = vld [vmem:[%s8862_s0 + $0x20] sm:$0xff] }
  0xf3   : > { %5081 = vmatmul.mubr.msk.f32.gmra.mrb[78].mxu0 %vm674_vm1, %v8967_v17  ;;  %2867 = vrot.lane.b32.xlu0 %v2785_v53, %s5515_s27  ;;  %v2791_v53 = vld [vmem:[%s8865_s3 + $0xc0] sm:$0xff] }
  0xf4   : > { %5083 = vmatprep.mubr.f32.mxu0 %v8968_v4  ;;  %5426 = vmatpush3.bf16.msra.mxu0 %v5423_v29  ;;  %v8972_v29 = vld [vmem:[#allocation21_spill] sm:$0xff] }
  0xf5   : > { %1836 = vmatmul.mubr.f32.gmra.mrb[94].mxu1 %v6789_v37 }
  0xf6   : > { %2279 = vmatprep.mubr.f32.mxu1 %v5457_v3  ;;  %3447 = vrot.lane.b32.xlu1 %v3381_v57, %s5515_s27  ;;  %v8973_v57 = vld [vmem:[#allocation22_spill] sm:$0xff] }
  0xf7   : > { %5084 = vmatmul.mubr.msk.f32.gmra.mrb[80].mxu0 %vm674_vm1, %v8969_v20  ;;  %2871 = vrot.lane.b32.xlu0 %v2787_v18, %s5515_s27  ;;  %v8974_v18 = vld [vmem:[#allocation23_spill] sm:$0xff] }
  0xf8   : > { %5086 = vmatprep.mubr.f32.mxu0 %v8970_v36 }
  0xf9   : > { %4773 = vmatmul.mubr.msk.f32.vlgmr.msra.gmra.mrb[96].mxu1 %vm574_vm3, %v6150_v51  ;;  %v2699_v51 = vld [vmem:[%s8864_s2 + $0x10] sm:$0xff] }
  0xfa   : > { %2284 = vmatprep.mubr.f32.mxu1 %v5458_v21  ;;  %3449 = vrot.lane.b32.xlu1 %v3382_v46, %s5515_s27  ;;  %2737 = vst.msk [vmem:[#allocation3 + $0x20] sm:$0xff] %vm2734_vm5, %v2699_v51  ;;  %v3384_v46 = vld [vmem:[%s8868_s6 + $0x28] sm:$0xff] }
  0xfb   : > { %5087 = vmatmul.mubr.msk.f32.gmra.mrb[82].mxu0 %vm674_vm1, %v8971_v8  ;;  %2875 = vrot.lane.b32.xlu0 %v2789_v30, %s5515_s27  ;;  %2930 = vst.msk [vmem:[#allocation3 + $0x20] sm:$0xff] %vm2927_vm4, %v2836_v40  ;;  %v5460_v21 = vld [vmem:[%s8862_s0 + $0x28] sm:$0xff]  ;;  %v2793_v30 = vld [vmem:[%s8865_s3 + $0xd0] sm:$0xff]  ;;  %v8975_v40 = vld [vmem:[#allocation24_spill] sm:$0xff] }
  0xfc   : > { %5089 = vmatprep.mubr.f32.mxu0 %v8972_v29 }
  0xfd   : > { %2285 = vmatmul.mubr.f32.gmra.mrb[98].mxu1 %v6195_v25  ;;  %v2700_v25 = vld [vmem:[%s8864_s2 + $0x18] sm:$0xff] }
  0xfe   : > { %2289 = vmatprep.mubr.f32.mxu1 %v5459_v33  ;;  %3451 = vrot.lane.b32.xlu1 %v3383_v38, %s5515_s27  ;;  %v2838_v3 = vpop.permute.xlu1 %2837  ;;  %2738 = vst.msk [vmem:[#allocation3 + $0x30] sm:$0xff] %vm2734_vm5, %v2700_v25  ;;  %v8976_v38 = vld [vmem:[#allocation25_spill] sm:$0xff]  ;;  %v3385_v33 = vld [vmem:[%s8868_s6 + $0x30] sm:$0xff] }
  0xff   : > { %5090 = vmatmul.mubr.msk.f32.gmra.mrb[84].mxu0 %vm674_vm1, %v8973_v57  ;;  %2879 = vrot.lane.b32.xlu0 %v2791_v53, %s5515_s27  ;;  %2931 = vst.msk [vmem:[#allocation3 + $0x30] sm:$0xff] %vm2927_vm4, %v2838_v3  ;;  %v5461_v53 = vld [vmem:[%s8862_s0 + $0x30] sm:$0xff]  ;;  %v2795_v3 = vld [vmem:[%s8865_s3 + $0xe0] sm:$0xff] }
 0x100   : > { %5092 = vmatprep.mubr.f32.mxu0 %v8974_v18  ;;  %v8977_v25 = vld [vmem:[#allocation26_spill] sm:$0xff] }
 0x101   : > { %4774 = vmatmul.mubr.msk.f32.gmra.mrb[100].mxu1 %vm574_vm3, %v6240_v15  ;;  %v2702_v15 = vld [vmem:[%s8864_s2 + $0x28] sm:$0xff] }
 0x102   : > { %2294 = vmatprep.mubr.f32.mxu1 %v5460_v21  ;;  %3453 = vrot.lane.b32.xlu1 %v3384_v46, %s5515_s27  ;;  %v2842_v51 = vpop.permute.xlu1 %2841  ;;  %2740 = vst.msk [vmem:[#allocation3 + $0x50] sm:$0xff] %vm2734_vm5, %v2702_v15  ;;  %v8978_v21 = vld [vmem:[#allocation27_spill] sm:$0xff] }
 0x103   : > { %5093 = vmatmul.mubr.msk.f32.gmra.mrb[86].mxu0 %vm674_vm1, %v8975_v40  ;;  %2883 = vrot.lane.b32.xlu0 %v2793_v30, %s5515_s27  ;;  %2933 = vst.msk [vmem:[#allocation3 + $0x50] sm:$0xff] %vm2927_vm4, %v2842_v51  ;;  %v3386_v30 = vld [vmem:[%s8868_s6 + $0x38] sm:$0xff]  ;;  %v2797_v15 = vld [vmem:[%s8865_s3 + $0xf0] sm:$0xff] }
 0x104   : > { %5095 = vmatprep.mubr.f32.mxu0 %v8976_v38  ;;  %v5462_v51 = vld [vmem:[%s8862_s0 + $0x38] sm:$0xff] }
 0x105   : > { %2295 = vmatmul.mubr.f32.gmra.mrb[102].mxu1 %v6285_v47  ;;  %v2704_v47 = vld [vmem:[%s8864_s2 + $0x38] sm:$0xff] }
 0x106   : > { %2299 = vmatprep.mubr.f32.mxu1 %v5461_v53  ;;  %3455 = vrot.lane.b32.xlu1 %v3385_v33, %s5515_s27  ;;  %v2846_v46 = vpop.permute.xlu1 %2845  ;;  %2742 = vst.msk [vmem:[#allocation3 + $0x70] sm:$0xff] %vm2734_vm5, %v2704_v47  ;;  %v8979_v33 = vld [vmem:[#allocation28_spill] sm:$0xff] }
 0x107   : > { %5096 = vmatmul.mubr.msk.f32.gmra.mrb[88].mxu0 %vm674_vm1, %v8977_v25  ;;  %2887 = vrot.lane.b32.xlu0 %v2795_v3, %s5515_s27  ;;  %2935 = vst.msk [vmem:[#allocation3 + $0x70] sm:$0xff] %vm2927_vm4, %v2846_v46  ;;  %v8980_v3 = vld [vmem:[#allocation29_spill] sm:$0xff] }
 0x108   : > { %5098 = vmatprep.mubr.f32.mxu0 %v8978_v21  ;;  %v3387_v47 = vld [vmem:[%s8868_s6 + $0x40] sm:$0xff] }
 0x109   : > { %4775 = vmatmul.mubr.msk.f32.gmra.mrb[104].mxu1 %vm574_vm3, %v6330_v19  ;;  %v2706_v19 = vld [vmem:[%s8864_s2 + $0x48] sm:$0xff] }
 0x10a   : > { %2304 = vmatprep.mubr.f32.mxu1 %v5462_v51  ;;  %3457 = vrot.lane.b32.xlu1 %v3386_v30, %s5515_s27  ;;  %v2850_v53 = vpop.permute.xlu1 %2849  ;;  %2744 = vst.msk [vmem:[#allocation3 + $0x90] sm:$0xff] %vm2734_vm5, %v2706_v19  ;;  %v5463_v51 = vld [vmem:[%s8862_s0 + $0x40] sm:$0xff]  ;;  %v8981_v19 = vld [vmem:[#allocation30_spill] sm:$0xff] }
 0x10b   : > { %5099 = vmatmul.mubr.msk.f32.gmra.mrb[90].mxu0 %vm674_vm1, %v8979_v33  ;;  %2891 = vrot.lane.b32.xlu0 %v2797_v15, %s5515_s27  ;;  %2937 = vst.msk [vmem:[#allocation3 + $0x90] sm:$0xff] %vm2927_vm4, %v2850_v53  ;;  %v2960_v15 = vld [vmem:[%s8866_s4] sm:$0xff]  ;;  %v2708_v53 = vld [vmem:[%s8864_s2 + $0x58] sm:$0xff] }
 0x10c   : > { %5101 = vmatprep.mubr.f32.mxu0 %v8980_v3  ;;  %v7125_v46 = vpop.f32.mrb[0].mxu1  ;;  %2746 = vst.msk [vmem:[#allocation3 + $0xb0] sm:$0xff] %vm2734_vm5, %v2708_v53  ;;  %v2962_v53 = vld [vmem:[%s8866_s4 + $0x10] sm:$0xff] }
 0x10d   : > { %2305 = vmatmul.mubr.f32.gmra.mrb[106].mxu1 %v6363_v55  ;;  %v7132_v30 = vpop.f32.mrb[1].mxu1 }
 0x10e   : > { %2309 = vmatprep.mubr.f32.mxu1 %v5463_v51  ;;  %3459 = vrot.lane.b32.xlu1 %v3387_v47, %s5515_s27  ;;  %v2854_v55 = vpop.permute.xlu1 %2853  ;;  %v3388_v47 = vld [vmem:[%s8868_s6 + $0x48] sm:$0xff] }
 0x10f   : > { %5102 = vmatmul.mubr.msk.f32.gmra.mrb[92].mxu0 %vm674_vm1, %v6305_v27  ;;  %3024 = vrot.lane.b32.xlu0 %v2960_v15, %s5516_s19  ;;  %2939 = vst.msk [vmem:[#allocation3 + $0xb0] sm:$0xff] %vm2927_vm4, %v2854_v55  ;;  %v5464_v15 = vld [vmem:[%s8862_s0 + $0x48] sm:$0xff] }
 0x110   : > { %5104 = vmatprep.mubr.f32.mxu0 %v8981_v19  ;;  %v7150_v51 = vpop.f32.mrb[2].mxu1  ;;  %v2710_v55 = vld [vmem:[%s8864_s2 + $0x68] sm:$0xff] }
 0x111   : > { %4776 = vmatmul.mubr.msk.f32.gmra.mrb[108].mxu1 %vm574_vm3, %v6388_v63  ;;  %v7159_v42 = vpop.f32.mrb[3].mxu1  ;;  %2748 = vst.msk [vmem:[#allocation3 + $0xd0] sm:$0xff] %vm2734_vm5, %v2710_v55 }
 0x112   : > { %2314 = vmatprep.mubr.f32.mxu1 %v5464_v15  ;;  %3461 = vrot.lane.b32.xlu1 %v3388_v47, %s5515_s27  ;;  %v2858_v63 = vpop.permute.xlu1 %2857  ;;  %v3389_v47 = vld [vmem:[%s8868_s6 + $0x50] sm:$0xff] }
 0x113   : > { %5105 = vmatmul.mubr.msk.f32.gmra.mrb[94].mxu0 %vm674_vm1, %v6338_v1  ;;  %3028 = vrot.lane.b32.xlu0 %v2962_v53, %s5516_s19  ;;  %2941 = vst.msk [vmem:[#allocation3 + $0xd0] sm:$0xff] %vm2927_vm4, %v2858_v63  ;;  %v5465_v53 = vld [vmem:[%s8862_s0 + $0x50] sm:$0xff]  ;;  %v2712_v63 = vld [vmem:[%s8864_s2 + $0x78] sm:$0xff] }
 0x114   : > { %5139 = vmatprep.mubr.f32.mxu0 %v5772_v9  ;;  %v7177_v15 = vpop.f32.mrb[4].mxu1  ;;  %v2964_v9 = vld [vmem:[%s8866_s4 + $0x20] sm:$0xff]  ;;  %2750 = vst.msk [vmem:[#allocation3 + $0xf0] sm:$0xff] %vm2734_vm5, %v2712_v63 }
 0x115   : > { %2315 = vmatmul.mubr.f32.gmra.mrb[110].mxu1 %v6408_v6  ;;  %v7184_v11 = vpop.f32.mrb[5].mxu1  ;;  %v3391_v63 = vld [vmem:[%s8868_s6 + $0x60] sm:$0xff] }
 0x116   : > { %2319 = vmatprep.mubr.f32.mxu1 %v5465_v53  ;;  %3463 = vrot.lane.b32.xlu1 %v3389_v47, %s5515_s27  ;;  %v2862_v6 = vpop.permute.xlu1 %2861  ;;  %v3390_v47 = vld [vmem:[%s8868_s6 + $0x58] sm:$0xff]  ;;  %v2966_v53 = vld [vmem:[%s8866_s4 + $0x30] sm:$0xff] }
 0x117   : > { %5140 = vmatmul.mubr.msk.f32.vlgmr.msra.gmra.mrb[96].mxu0 %vm674_vm1, %v8957_v0  ;;  %3032 = vrot.lane.b32.xlu0 %v2964_v9, %s5516_s19  ;;  %2943 = vst.msk [vmem:[#allocation3 + $0xf0] sm:$0xff] %vm2927_vm4, %v2862_v6  ;;  %v2714_v9 = vld [vmem:[%s8864_s2 + $0x88] sm:$0xff] }
 0x118   : > { %5142 = vmatprep.mubr.f32.mxu0 %v8958_v52  ;;  %v7202_v55 = vpop.f32.mrb[6].mxu1  ;;  %v5466_v52 = vld [vmem:[%s8862_s0 + $0x58] sm:$0xff]  ;;  %2752 = vst.msk [vmem:[#allocation3 + $0x110] sm:$0xff] %vm2734_vm5, %v2714_v9  ;;  %v2970_v9 = vld [vmem:[%s8866_s4 + $0x50] sm:$0xff] }
 0x119   : > { %4777 = vmatmul.mubr.msk.f32.gmra.mrb[112].mxu1 %vm574_vm3, %v6425_v50  ;;  %v7211_v0 = vpop.f32.mrb[7].mxu1 }
 0x11a   : > { %2324 = vmatprep.mubr.f32.mxu1 %v5466_v52  ;;  %3465 = vrot.lane.b32.xlu1 %v3390_v47, %s5515_s27  ;;  %v2866_v50 = vpop.permute.xlu1 %2865  ;;  %v5467_v47 = vld [vmem:[%s8862_s0 + $0x60] sm:$0xff]  ;;  %v2716_v52 = vld [vmem:[%s8864_s2 + $0x98] sm:$0xff] }
 0x11b   : > { %5143 = vmatmul.mubr.msk.f32.gmra.mrb[98].mxu0 %vm674_vm1, %v8959_v32  ;;  %3036 = vrot.lane.b32.xlu0 %v2966_v53, %s5516_s19  ;;  %2945 = vst.msk [vmem:[#allocation3 + $0x110] sm:$0xff] %vm2927_vm4, %v2866_v50  ;;  %v3392_v50 = vld [vmem:[%s8868_s6 + $0x68] sm:$0xff] }
 0x11c   : > { %5145 = vmatprep.mubr.f32.mxu0 %v8960_v49  ;;  %v7229_v6 = vpop.f32.mrb[8].mxu1  ;;  %v2968_v49 = vld [vmem:[%s8866_s4 + $0x40] sm:$0xff]  ;;  %2754 = vst.msk [vmem:[#allocation3 + $0x130] sm:$0xff] %vm2734_vm5, %v2716_v52  ;;  %v2720_v52 = vld [vmem:[%s8864_s2 + $0xb8] sm:$0xff] }
 0x11d   : > { %2325 = vmatmul.mubr.f32.gmra.mrb[114].mxu1 %v6442_v26  ;;  %v7236_v32 = vpop.f32.mrb[9].mxu1  ;;  %2758 = vst.msk [vmem:[#allocation3 + $0x170] sm:$0xff] %vm2734_vm5, %v2720_v52  ;;  %v5471_v52 = vld [vmem:[%s8862_s0 + $0x80] sm:$0xff] }
 0x11e   : > { %2329 = vmatprep.mubr.f32.mxu1 %v5467_v47  ;;  %3467 = vrot.lane.b32.xlu1 %v3391_v63, %s5515_s27  ;;  %v2870_v26 = vpop.permute.xlu1 %2869  ;;  %v2718_v63 = vld [vmem:[%s8864_s2 + $0xa8] sm:$0xff] }
 0x11f   : > { %5146 = vmatmul.mubr.msk.f32.gmra.mrb[100].mxu0 %vm674_vm1, %v8961_v10  ;;  %3040 = vrot.lane.b32.xlu0 %v2968_v49, %s5516_s19  ;;  %2947 = vst.msk [vmem:[#allocation3 + $0x130] sm:$0xff] %vm2927_vm4, %v2870_v26  ;;  %v3393_v49 = vld [vmem:[%s8868_s6 + $0x70] sm:$0xff] }
 0x120   : > { %5148 = vmatprep.mubr.f32.mxu0 %v8962_v61  ;;  %v7254_v53 = vpop.f32.mrb[10].mxu1  ;;  %v5468_v61 = vld [vmem:[%s8862_s0 + $0x68] sm:$0xff]  ;;  %2756 = vst.msk [vmem:[#allocation3 + $0x150] sm:$0xff] %vm2734_vm5, %v2718_v63  ;;  %v5469_v26 = vld [vmem:[%s8862_s0 + $0x70] sm:$0xff] }
 0x121   : > { %4778 = vmatmul.mubr.msk.f32.gmra.mrb[116].mxu1 %vm574_vm3, %v6461_v28  ;;  %v7263_v10 = vpop.f32.mrb[11].mxu1 }
 0x122   : > { %2334 = vmatprep.mubr.f32.mxu1 %v5468_v61  ;;  %3469 = vrot.lane.b32.xlu1 %v3392_v50, %s5515_s27  ;;  %v2874_v28 = vpop.permute.xlu1 %2873  ;;  %v3394_v61 = vld [vmem:[%s8868_s6 + $0x78] sm:$0xff] }
 0x123   : > { %5149 = vmatmul.mubr.msk.f32.gmra.mrb[102].mxu0 %vm674_vm1, %v8963_v7  ;;  %3044 = vrot.lane.b32.xlu0 %v2970_v9, %s5516_s19  ;;  %2949 = vst.msk [vmem:[#allocation3 + $0x150] sm:$0xff] %vm2927_vm4, %v2874_v28  ;;  %v2974_v28 = vld [vmem:[%s8866_s4 + $0x70] sm:$0xff] }
 0x124   : > { %5151 = vmatprep.mubr.f32.mxu0 %v8964_v24  ;;  %v7281_v47 = vpop.f32.mrb[12].mxu1  ;;  %v2972_v24 = vld [vmem:[%s8866_s4 + $0x60] sm:$0xff] }
 0x125   : > { %2335 = vmatmul.mubr.f32.gmra.mrb[118].mxu1 %v6478_v56  ;;  %v7288_v7 = vpop.f32.mrb[13].mxu1 }
 0x126   : > { %2339 = vmatprep.mubr.f32.mxu1 %v5469_v26  ;;  %3471 = vrot.lane.b32.xlu1 %v3393_v49, %s5515_s27  ;;  %v2878_v56 = vpop.permute.xlu1 %2877  ;;  %v2722_v26 = vld [vmem:[%s8864_s2 + $0xc8] sm:$0xff] }
 0x127   : > { %5152 = vmatmul.mubr.msk.f32.gmra.mrb[104].mxu0 %vm674_vm1, %v8965_v41  ;;  %3048 = vrot.lane.b32.xlu0 %v2972_v24, %s5516_s19  ;;  %2951 = vst.msk [vmem:[#allocation3 + $0x170] sm:$0xff] %vm2927_vm4, %v2878_v56 }
 0x128   : > { %5154 = vmatprep.mubr.f32.mxu0 %v8966_v45  ;;  %v7306_v50 = vpop.f32.mrb[14].mxu1  ;;  %v5470_v45 = vld [vmem:[%s8862_s0 + $0x78] sm:$0xff]  ;;  %2760 = vst.msk [vmem:[#allocation3 + $0x190] sm:$0xff] %vm2734_vm5, %v2722_v26 }
 0x129   : > { %4779 = vmatmul.mubr.msk.f32.gmra.mrb[120].mxu1 %vm574_vm3, %v6501_v35  ;;  %v7315_v41 = vpop.f32.mrb[15].mxu1 }
 0x12a   : > { %v1232_v9 = vpop.f32.mrb[0].mxu0  ;;  %2344 = vmatprep.mubr.f32.mxu1 %v5470_v45  ;;  %3473 = vrot.lane.b32.xlu1 %v3394_v61, %s5515_s27  ;;  %v2882_v49 = vpop.permute.xlu1 %2881  ;;  %v2724_v45 = vld [vmem:[%s8864_s2 + $0xd8] sm:$0xff] }
 0x12b   : > { %v7326_v63 = vadd.f32 %v7132_v30, %v1232_v9  ;;  %v1234_v35 = vpop.f32.mrb[1].mxu0  ;;  %5155 = vmatmul.mubr.msk.f32.gmra.mrb[106].mxu0 %vm674_vm1, %v8967_v17  ;;  %3052 = vrot.lane.b32.xlu0 %v2974_v28, %s5516_s19  ;;  %v3395_v30 = vld [vmem:[%s8868_s6 + $0x80] sm:$0xff]  ;;  %2953 = vst.msk [vmem:[#allocation3 + $0x190] sm:$0xff] %vm2927_vm4, %v2882_v49  ;;  %v2978_v49 = vld [vmem:[%s8866_s4 + $0x90] sm:$0xff] }
 0x12c   : > { %5157 = vmatprep.mubr.f32.mxu0 %v8968_v4  ;;  %v7336_v24 = vpop.f32.mrb[16].mxu1  ;;  %v2976_v4 = vld [vmem:[%s8866_s4 + $0x80] sm:$0xff]  ;;  %2762 = vst.msk [vmem:[#allocation3 + $0x1b0] sm:$0xff] %vm2734_vm5, %v2724_v45 }
 0x12d   : > { %2345 = vmatmul.mubr.f32.gmra.mrb[122].mxu1 %v6522_v2  ;;  %v7343_v17 = vpop.f32.mrb[17].mxu1 }
 0x12e   : > { %v1237_v56 = vpop.f32.mrb[2].mxu0  ;;  %2349 = vmatprep.mubr.f32.mxu1 %v5471_v52  ;;  %3475 = vrot.lane.b32.xlu1 %v3395_v30, %s5515_s27  ;;  %v2886_v9 = vpop.permute.xlu1 %2885 }
 0x12f   : > { %v7354_v61 = vadd.f32 %v7125_v46, %v1237_v56  ;;  %v1239_v2 = vpop.f32.mrb[3].mxu0  ;;  %5158 = vmatmul.mubr.msk.f32.gmra.mrb[108].mxu0 %vm674_vm1, %v8969_v20  ;;  %3056 = vrot.lane.b32.xlu0 %v2976_v4, %s5516_s19  ;;  %v3396_v46 = vld [vmem:[%s8868_s6 + $0x88] sm:$0xff]  ;;  %2955 = vst.msk [vmem:[#allocation3 + $0x1b0] sm:$0xff] %vm2927_vm4, %v2886_v9 }
 0x130   : > { %5160 = vmatprep.mubr.f32.mxu0 %v8970_v36  ;;  %v7364_v28 = vpop.f32.mrb[18].mxu1  ;;  %v5472_v36 = vld [vmem:[%s8862_s0 + $0x88] sm:$0xff]  ;;  %v5473_v2 = vld [vmem:[%s8862_s0 + $0x90] sm:$0xff] }
 0x131   : > { %4780 = vmatmul.mubr.msk.f32.gmra.mrb[124].mxu1 %vm574_vm3, %v6545_v43  ;;  %v7373_v20 = vpop.f32.mrb[19].mxu1  ;;  %v2726_v56 = vld [vmem:[%s8864_s2 + $0xe8] sm:$0xff] }
 0x132   : > { %v1242_v35 = vpop.f32.mrb[4].mxu0  ;;  %2354 = vmatprep.mubr.f32.mxu1 %v5472_v36  ;;  %3477 = vrot.lane.b32.xlu1 %v3396_v46, %s5515_s27  ;;  %v2890_v30 = vpop.permute.xlu1 %2889  ;;  %2764 = vst.msk [vmem:[#allocation3 + $0x1d0] sm:$0xff] %vm2734_vm5, %v2726_v56  ;;  %v2728_v46 = vld [vmem:[%s8864_s2 + $0xf8] sm:$0xff] }
 0x133   : > { %v7384_v26 = vadd.f32 %v7159_v42, %v1242_v35  ;;  %v1244_v43 = vpop.f32.mrb[5].mxu0  ;;  %5161 = vmatmul.mubr.msk.f32.gmra.mrb[110].mxu0 %vm674_vm1, %v8971_v8  ;;  %3060 = vrot.lane.b32.xlu0 %v2978_v49, %s5516_s19  ;;  %v3397_v42 = vld [vmem:[%s8868_s6 + $0x90] sm:$0xff]  ;;  %2957 = vst.msk [vmem:[#allocation3 + $0x1d0] sm:$0xff] %vm2927_vm4, %v2890_v30  ;;  %v5474_v49 = vld [vmem:[%s8862_s0 + $0x98] sm:$0xff] }
 0x134   : > { %5163 = vmatprep.mubr.f32.mxu0 %v8972_v29  ;;  %v7394_v52 = vpop.f32.mrb[20].mxu1  ;;  %v3379_v29 = vld [vmem:[%s8868_s6] sm:$0xff]  ;;  %2766 = vst.msk [vmem:[#allocation3 + $0x1f0] sm:$0xff] %vm2734_vm5, %v2728_v46 }
 0x135   : > { %2355 = vmatmul.mubr.f32.gmra.mrb[126].mxu1 %v6566_v16  ;;  %v7401_v8 = vpop.f32.mrb[21].mxu1  ;;  %v2697_v46 = vld [vmem:[%s8864_s2] sm:$0xff] }
 0x136   : > { %v1247_v4 = vpop.f32.mrb[6].mxu0  ;;  %2359 = vmatprep.mubr.f32.mxu1 %v5473_v2  ;;  %3479 = vrot.lane.b32.xlu1 %v3397_v42, %s5515_s27  ;;  %v2894_v45 = vpop.permute.xlu1 %2893  ;;  %v3399_v42 = vld [vmem:[%s8868_s6 + $0xa0] sm:$0xff]  ;;  %2735 = vst.msk [vmem:[#allocation3] sm:$0xff] %vm2734_vm5, %v2697_v46 }
 0x137   : > { %v7412_v9 = vadd.f32 %v7150_v51, %v1247_v4  ;;  %v1249_v16 = vpop.f32.mrb[7].mxu0  ;;  %5164 = vmatmul.mubr.msk.f32.gmra.mrb[112].mxu0 %vm674_vm1, %v8973_v57  ;;  %3443 = vrot.lane.b32.xlu0 %v3379_v29, %s5515_s27  ;;  %v3398_v51 = vld [vmem:[%s8868_s6 + $0x98] sm:$0xff]  ;;  %2959 = vst.msk [vmem:[#allocation3 + $0x1f0] sm:$0xff] %vm2927_vm4, %v2894_v45 }
 0x138   : > { %v7421_v35 = vpop.f32.mrb[22].mxu1  ;;  %5166 = vmatprep.mubr.f32.mxu0 %v8974_v18  ;;  %v2980_v18 = vld [vmem:[%s8866_s4 + $0xa0] sm:$0xff] }
 0x139   : > { %4781 = vmatmul.mubr.msk.f32.gmra.mrb[128].mxu1 %vm574_vm3, %v6589_v39  ;;  %v7431_v57 = vpop.f32.mrb[23].mxu1 }
 0x13a   : > { %v1252_v36 = vpop.f32.mrb[8].mxu0  ;;  %2364 = vmatprep.mubr.f32.mxu1 %v5474_v49  ;;  %3481 = vrot.lane.b32.xlu1 %v3398_v51, %s5515_s27  ;;  %v3027_v30 = vpop.permute.xlu1 %3026 }
 0x13b   : > { %v7442_v43 = vadd.f32 %v7184_v11, %v1252_v36  ;;  %v1254_v39 = vpop.f32.mrb[9].mxu0  ;;  %5167 = vmatmul.mubr.msk.f32.gmra.mrb[114].mxu0 %vm674_vm1, %v8975_v40  ;;  %3064 = vrot.lane.b32.xlu0 %v2980_v18, %s5516_s19  ;;  %v5475_v40 = vld [vmem:[%s8862_s0 + $0xa0] sm:$0xff] }
 0x13c   : > { %v7448_v56 = vpop.f32.mrb[24].mxu1  ;;  %5169 = vmatprep.mubr.f32.mxu0 %v8976_v38  ;;  %v3400_v38 = vld [vmem:[%s8868_s6 + $0xa8] sm:$0xff] }
 0x13d   : > { %2365 = vmatmul.mubr.f32.gmra.mrb[130].mxu1 %v6610_v31  ;;  %v7455_v11 = vpop.f32.mrb[25].mxu1 }
 0x13e   : > { %v1257_v4 = vpop.f32.mrb[10].mxu0  ;;  %2369 = vmatprep.mubr.f32.mxu1 %v5475_v40  ;;  %3483 = vrot.lane.b32.xlu1 %v3399_v42, %s5515_s27  ;;  %v3031_v31 = vpop.permute.xlu1 %3030  ;;  %v5477_v40 = vld [vmem:[%s8862_s0 + $0xb0] sm:$0xff] }
 0x13f   : > { %v7465_v2 = vadd.f32 %v7177_v15, %v1257_v4  ;;  %v1259_v29 = vpop.f32.mrb[11].mxu0  ;;  %5170 = vmatmul.mubr.msk.f32.gmra.mrb[116].mxu0 %vm674_vm1, %v8977_v25  ;;  %3485 = vrot.lane.b32.xlu0 %v3400_v38, %s5515_s27  ;;  %3124 = vst.msk [vmem:[#allocation3 + $0x30] sm:$0xff] %vm3120_vm6, %v3031_v31  ;;  %v2981_v15 = vld [vmem:[%s8866_s4 + $0xa8] sm:$0xff]  ;;  %v2832_v25 = vpop.permute.xlu0 %2831 }
 0x140   : > { %v7471_v16 = vpop.f32.mrb[26].mxu1  ;;  %5172 = vmatprep.mubr.f32.mxu0 %v8978_v21  ;;  %v5476_v21 = vld [vmem:[%s8862_s0 + $0xa8] sm:$0xff]  ;;  %2928 = vst.msk [vmem:[#allocation3] sm:$0xff] %vm2927_vm4, %v2832_v25 }
 0x141   : > { %4782 = vmatmul.mubr.msk.f32.gmra.mrb[132].mxu1 %vm574_vm3, %v6633_v14  ;;  %v7481_v45 = vpop.f32.mrb[27].mxu1  ;;  %v2982_v14 = vld [vmem:[%s8866_s4 + $0xb0] sm:$0xff] }
 0x142   : > { %v1262_v51 = vpop.f32.mrb[12].mxu0  ;;  %2374 = vmatprep.mubr.f32.mxu1 %v5476_v21  ;;  %3066 = vrot.lane.b32.xlu1 %v2981_v15, %s5516_s19  ;;  %v3035_v18 = vpop.permute.xlu1 %3034 }
 0x143   : > { %v7495_v36 = vadd.f32 %v7211_v0, %v1262_v51  ;;  %v1264_v49 = vpop.f32.mrb[13].mxu0  ;;  %5173 = vmatmul.mubr.msk.f32.gmra.mrb[118].mxu0 %vm674_vm1, %v8979_v33  ;;  %3068 = vrot.lane.b32.xlu0 %v2982_v14, %s5516_s19  ;;  %3126 = vst.msk [vmem:[#allocation3 + $0x50] sm:$0xff] %vm3120_vm6, %v3035_v18  ;;  %v2834_v42 = vpop.permute.xlu0 %2833  ;;  %v2698_v33 = vld [vmem:[%s8864_s2 + $0x8] sm:$0xff]  ;;  %v2703_v51 = vld [vmem:[%s8864_s2 + $0x30] sm:$0xff]  ;;  %v8982_v18 = vmov 0.0  }
 0x144   : > { %v7502_v39 = vpop.f32.mrb[28].mxu1  ;;  %5175 = vmatprep.mubr.f32.mxu0 %v8980_v3  ;;  %2736 = vst.msk [vmem:[#allocation3 + $0x10] sm:$0xff] %vm2734_vm5, %v2698_v33  ;;  %2741 = vst.msk [vmem:[#allocation3 + $0x60] sm:$0xff] %vm2734_vm5, %v2703_v51  ;;  %v3402_v33 = vld [vmem:[%s8868_s6 + $0xb8] sm:$0xff] }
 0x145   : > { %2375 = vmatmul.mubr.f32.gmra.mrb[134].mxu1 %v6654_v44  ;;  %v7507_v0 = vpop.f32.mrb[29].mxu1  ;;  %2929 = vst.msk [vmem:[#allocation3 + $0x10] sm:$0xff] %vm2927_vm4, %v2834_v42 }
 0x146   : > { %v1267_v4 = vpop.f32.mrb[14].mxu0  ;;  %2379 = vmatprep.mubr.f32.mxu1 %v5477_v40  ;;  %v3039_v44 = vpop.permute.xlu1 %3038  ;;  %3122 = vst.msk [vmem:[#allocation3 + $0x10] sm:$0xff] %vm3120_vm6, %v3027_v30 }
 0x147   : > { %v7517_v3 = vadd.f32 %v7202_v55, %v1267_v4  ;;  %v1269_v38 = vpop.f32.mrb[15].mxu0  ;;  %5176 = vmatmul.mubr.msk.f32.gmra.mrb[120].mxu0 %vm674_vm1, %v6305_v27  ;;  %3128 = vst.msk [vmem:[#allocation3 + $0x70] sm:$0xff] %vm3120_vm6, %v3039_v44  ;;  %v2840_v31 = vpop.permute.xlu0 %2839  ;;  %v2701_v27 = vld [vmem:[%s8864_s2 + $0x20] sm:$0xff]  ;;  %3489 = vrot.lane.b32.xlu0 %v3402_v33, %s5515_s27 }
 0x148   : > { %v7523_v29 = vpop.f32.mrb[30].mxu1  ;;  %5178 = vmatprep.mubr.f32.mxu0 %v8981_v19  ;;  %v5478_v19 = vld [vmem:[%s8862_s0 + $0xb8] sm:$0xff]  ;;  %2739 = vst.msk [vmem:[#allocation3 + $0x40] sm:$0xff] %vm2734_vm5, %v2701_v27  ;;  %v2705_v4 = vld [vmem:[%s8864_s2 + $0x40] sm:$0xff]  ;;  %v5480_v38 = vld [vmem:[%s8862_s0 + $0xc8] sm:$0xff] }
 0x149   : > { %4783 = vmatmul.mubr.msk.f32.gmra.mrb[136].mxu1 %vm574_vm3, %v6677_v54  ;;  %v7531_v55 = vpop.f32.mrb[31].mxu1  ;;  %2932 = vst.msk [vmem:[#allocation3 + $0x40] sm:$0xff] %vm2927_vm4, %v2840_v31  ;;  %v2984_v27 = vld [vmem:[%s8866_s4 + $0xc0] sm:$0xff] }
 0x14a   : > { %v1272_v15 = vpop.f32.mrb[16].mxu0  ;;  %2384 = vmatprep.mubr.f32.mxu1 %v5478_v19  ;;  %2743 = vst.msk [vmem:[#allocation3 + $0x80] sm:$0xff] %vm2734_vm5, %v2705_v4 }
 0x14b   : > { %v7541_v30 = vadd.f32 %v7236_v32, %v1272_v15  ;;  %v1274_v25 = vpop.f32.mrb[17].mxu0  ;;  %5179 = vmatmul.mubr.msk.f32.gmra.mrb[122].mxu0 %vm674_vm1, %v6338_v1  ;;  %v2707_v15 = vld [vmem:[%s8864_s2 + $0x50] sm:$0xff]  ;;  %3072 = vrot.lane.b32.xlu0 %v2984_v27, %s5516_s19  ;;  %525 = vst.msk [vmem:[#allocation4] sm:$0xf] %vm524_vm10, %v8982_v18 }
 0x14c   : > { %v1682_v54 = vpop.f32.mrb[32].mxu1  ;;  %5181 = vmatprep.mubr.f32.mxu0 %v6352_v23  ;;  %v3043_v46 = vpop.permute.xlu1 %3042  ;;  %v5479_v23 = vld [vmem:[%s8862_s0 + $0xc0] sm:$0xff]  ;;  %2745 = vst.msk [vmem:[#allocation3 + $0xa0] sm:$0xff] %vm2734_vm5, %v2707_v15  ;;  %v3406_v15 = vld [vmem:[%s8868_s6 + $0xd8] sm:$0xff] }
 0x14d   : > { %v7552_v21 = vadd.f32 %v1682_v54, %v7326_v63  ;;  %2385 = vmatmul.mubr.f32.gmra.mrb[138].mxu1 %v6698_v58  ;;  %v1684_v32 = vpop.f32.mrb[33].mxu1  ;;  %3130 = vst.msk [vmem:[#allocation3 + $0x90] sm:$0xff] %vm3120_vm6, %v3043_v46  ;;  %v2844_v14 = vpop.permute.xlu0 %2843  ;;  %v5481_v46 = vld [vmem:[%s8862_s0 + $0xd0] sm:$0xff] }
 0x14e   : > { %v1277_v1 = vpop.f32.mrb[18].mxu0  ;;  %2389 = vmatprep.mubr.f32.mxu1 %v5479_v23  ;;  %2934 = vst.msk [vmem:[#allocation3 + $0x60] sm:$0xff] %vm2927_vm4, %v2844_v14  ;;  %v3404_v14 = vld [vmem:[%s8868_s6 + $0xc8] sm:$0xff] }
 0x14f   : > { %v7562_v49 = vadd.f32 %v7229_v6, %v1277_v1  ;;  %v1279_v63 = vpop.f32.mrb[19].mxu0  ;;  %5182 = vmatmul.mubr.msk.f32.gmra.mrb[124].mxu0 %vm674_vm1, %v6375_v48  ;;  %v2709_v1 = vld [vmem:[%s8864_s2 + $0x60] sm:$0xff]  ;;  %3493 = vrot.lane.b32.xlu0 %v3404_v14, %s5515_s27 }
 0x150   : > { %v1687_v58 = vpop.f32.mrb[34].mxu1  ;;  %5184 = vmatprep.mubr.f32.mxu0 %v8982_v18  ;;  %v3047_v42 = vpop.permute.xlu1 %3046  ;;  %2747 = vst.msk [vmem:[#allocation3 + $0xc0] sm:$0xff] %vm2734_vm5, %v2709_v1  ;;  %v2988_v14 = vld [vmem:[%s8866_s4 + $0xe0] sm:$0xff]  ;;  %v2715_v1 = vld [vmem:[%s8864_s2 + $0x90] sm:$0xff] }
 0x151   : > { %v7575_v6 = vadd.f32 %v1687_v58, %v7354_v61  ;;  %4784 = vmatmul.mubr.msk.f32.gmra.mrb[140].mxu1 %vm574_vm3, %v6715_v5  ;;  %v1689_v60 = vpop.f32.mrb[35].mxu1  ;;  %3132 = vst.msk [vmem:[#allocation3 + $0xb0] sm:$0xff] %vm3120_vm6, %v3047_v42  ;;  %v2848_v48 = vpop.permute.xlu0 %2847  ;;  %v5482_v42 = vld [vmem:[%s8862_s0 + $0xd8] sm:$0xff] }
 0x152   : > { %v1282_v40 = vpop.f32.mrb[20].mxu0  ;;  %2394 = vmatprep.mubr.f32.mxu1 %v5480_v38  ;;  %2936 = vst.msk [vmem:[#allocation3 + $0x80] sm:$0xff] %vm2927_vm4, %v2848_v48  ;;  %v2986_v60 = vld [vmem:[%s8866_s4 + $0xd0] sm:$0xff] }
 0x153   : > { %v7588_v61 = vadd.f32 %v7263_v10, %v1282_v40  ;;  %v1284_v5 = vpop.f32.mrb[21].mxu0  ;;  %5185 = vmatmul.mubr.f32.gmra.mrb[126].mxu0 %v8982_v18  ;;  %v2711_v48 = vld [vmem:[%s8864_s2 + $0x70] sm:$0xff]  ;;  %3076 = vrot.lane.b32.xlu0 %v2986_v60, %s5516_s19  ;;  %2753 = vst.msk [vmem:[#allocation3 + $0x120] sm:$0xff] %vm2734_vm5, %v2715_v1  ;;  %v2717_v60 = vld [vmem:[%s8864_s2 + $0xa0] sm:$0xff] }
 0x154   : > { %v1692_v44 = vpop.f32.mrb[36].mxu1  ;;  %v3051_v31 = vpop.permute.xlu1 %3050  ;;  %2749 = vst.msk [vmem:[#allocation3 + $0xe0] sm:$0xff] %vm2734_vm5, %v2711_v48  ;;  %2755 = vst.msk [vmem:[#allocation3 + $0x140] sm:$0xff] %vm2734_vm5, %v2717_v60 }
 0x155   : > { %v7598_v19 = vadd.f32 %v1692_v44, %v7384_v26  ;;  %2395 = vmatmul.mubr.f32.gmra.mrb[142].mxu1 %v6729_v59  ;;  %v1694_v10 = vpop.f32.mrb[37].mxu1  ;;  %3134 = vst.msk [vmem:[#allocation3 + $0xd0] sm:$0xff] %vm3120_vm6, %v3051_v31  ;;  %v2852_v25 = vpop.permute.xlu0 %2851  ;;  %v5483_v44 = vld [vmem:[%s8862_s0 + $0xe0] sm:$0xff] }
 0x156   : > { %v1287_v54 = vpop.f32.mrb[22].mxu0  ;;  %2399 = vmatprep.mubr.f32.mxu1 %v5481_v46  ;;  %2938 = vst.msk [vmem:[#allocation3 + $0xa0] sm:$0xff] %vm2927_vm4, %v2852_v25  ;;  %v2713_v10 = vld [vmem:[%s8864_s2 + $0x80] sm:$0xff] }
 0x157   : > { %v7609_v26 = vadd.f32 %v7254_v53, %v1287_v54  ;;  %v1289_v59 = vpop.f32.mrb[23].mxu0  ;;  %3497 = vrot.lane.b32.xlu0 %v3406_v15, %s5515_s27  ;;  %2751 = vst.msk [vmem:[#allocation3 + $0x100] sm:$0xff] %vm2734_vm5, %v2713_v10  ;;  %v8983_v15 = vld [vmem:[#allocation31_spill] sm:$0xff] }
 0x158   : > { %v1697_v51 = vpop.f32.mrb[38].mxu1  ;;  %v3055_v32 = vpop.permute.xlu1 %3054  ;;  %v5484_v59 = vld [vmem:[%s8862_s0 + $0xe8] sm:$0xff] }
 0x159   : > { %v7618_v23 = vadd.f32 %v1697_v51, %v7412_v9  ;;  %4785 = vmatmul.mubr.msk.f32.gmra.mrb[144].mxu1 %vm574_vm3, %v6745_v12  ;;  %v1699_v53 = vpop.f32.mrb[39].mxu1  ;;  %3136 = vst.msk [vmem:[#allocation3 + $0xf0] sm:$0xff] %vm3120_vm6, %v3055_v32  ;;  %v2856_v63 = vpop.permute.xlu0 %2855 }
 0x15a   : > { %v1292_v58 = vpop.f32.mrb[24].mxu0  ;;  %2404 = vmatprep.mubr.f32.mxu1 %v5482_v42  ;;  %2940 = vst.msk [vmem:[#allocation3 + $0xc0] sm:$0xff] %vm2927_vm4, %v2856_v63  ;;  %v5485_v42 = vld [vmem:[%s8862_s0 + $0xf0] sm:$0xff] }
 0x15b   : > { %v7631_v9 = vadd.f32 %v7288_v7, %v1292_v58  ;;  %v1294_v12 = vpop.f32.mrb[25].mxu0  ;;  %3080 = vrot.lane.b32.xlu0 %v2988_v14, %s5516_s19 }
 0x15c   : > { %v1702_v33 = vpop.f32.mrb[40].mxu1  ;;  %v3059_v4 = vpop.permute.xlu1 %3058 }
 0x15d   : > { %v7640_v40 = vadd.f32 %v1702_v33, %v7442_v43  ;;  %2405 = vmatmul.mubr.f32.gmra.mrb[146].mxu1 %v6759_v13  ;;  %v1704_v38 = vpop.f32.mrb[41].mxu1  ;;  %3138 = vst.msk [vmem:[#allocation3 + $0x110] sm:$0xff] %vm3120_vm6, %v3059_v4  ;;  %v2860_v7 = vpop.permute.xlu0 %2859  ;;  %v3408_v4 = vld [vmem:[%s8868_s6 + $0xe8] sm:$0xff] }
 0x15e   : > { %v1297_v5 = vpop.f32.mrb[26].mxu0  ;;  %2409 = vmatprep.mubr.f32.mxu1 %v5483_v44  ;;  %2942 = vst.msk [vmem:[#allocation3 + $0xe0] sm:$0xff] %vm2927_vm4, %v2860_v7 }
 0x15f   : > { %v7651_v43 = vadd.f32 %v7281_v47, %v1297_v5  ;;  %v1299_v13 = vpop.f32.mrb[27].mxu0  ;;  %3501 = vrot.lane.b32.xlu0 %v3408_v4, %s5515_s27  ;;  %v5486_v5 = vld [vmem:[%s8862_s0 + $0xf8] sm:$0xff] }
 0x160   : > { %v1707_v31 = vpop.f32.mrb[42].mxu1  ;;  %v3063_v27 = vpop.permute.xlu1 %3062 }
 0x161   : > { %v7660_v25 = vadd.f32 %v1707_v31, %v7465_v2  ;;  %4786 = vmatmul.mubr.msk.f32.gmra.mrb[148].mxu1 %vm574_vm3, %v6775_v34  ;;  %v1709_v47 = vpop.f32.mrb[43].mxu1  ;;  %3140 = vst.msk [vmem:[#allocation3 + $0x130] sm:$0xff] %vm3120_vm6, %v3063_v27  ;;  %v2864_v54 = vpop.permute.xlu0 %2863  ;;  %v2990_v31 = vld [vmem:[%s8866_s4 + $0xf0] sm:$0xff] }
 0x162   : > { %v1302_v46 = vpop.f32.mrb[28].mxu0  ;;  %2414 = vmatprep.mubr.f32.mxu1 %v5484_v59  ;;  %2944 = vst.msk [vmem:[#allocation3 + $0x100] sm:$0xff] %vm2927_vm4, %v2864_v54 }
 0x163   : > { %v7673_v2 = vadd.f32 %v7315_v41, %v1302_v46  ;;  %v1304_v34 = vpop.f32.mrb[29].mxu0  ;;  %3084 = vrot.lane.b32.xlu0 %v2990_v31, %s5516_s19 }
 0x164   : > { %v1712_v51 = vpop.f32.mrb[44].mxu1  ;;  %v7675_v32 = vpop.permute.xlu1 %3445 }
 0x165   : > { %v7684_v53 = vadd.f32 %v1712_v51, %v7495_v36  ;;  %2415 = vmatmul.mubr.f32.gmra.mrb[150].mxu1 %v6789_v37  ;;  %v1714_v63 = vpop.f32.mrb[45].mxu1  ;;  %v2868_v41 = vpop.permute.xlu0 %2867 }
 0x166   : > { %v1307_v58 = vpop.f32.mrb[30].mxu0  ;;  %2419 = vmatprep.mubr.f32.mxu1 %v5485_v42  ;;  %2946 = vst.msk [vmem:[#allocation3 + $0x120] sm:$0xff] %vm2927_vm4, %v2868_v41 }
 0x167   : > { %v7694_v12 = vadd.f32 %v7306_v50, %v1307_v58  ;;  %v1309_v36 = vpop.f32.mrb[31].mxu0 }
 0x168   : > { %v1717_v33 = vpop.f32.mrb[46].mxu1  ;;  %v7696_v37 = vpop.permute.xlu1 %3447 }
 0x169   : > { %v7705_v48 = vadd.f32 %v1717_v33, %v7517_v3  ;;  %4787 = vmatmul.mubr.msk.f32.gmra.mrb[152].mxu1 %vm574_vm3, %v6805_v62  ;;  %v1719_v50 = vpop.f32.mrb[47].mxu1  ;;  %v2872_v38 = vpop.permute.xlu0 %2871 }
 0x16a   : > { %v1312_v7 = vpop.f32.mrb[32].mxu0  ;;  %2424 = vmatprep.mubr.f32.mxu1 %v5486_v5  ;;  %2948 = vst.msk [vmem:[#allocation3 + $0x140] sm:$0xff] %vm2927_vm4, %v2872_v38 }
 0x16b   : > { %v7717_v3 = vadd.f32 %v7343_v17, %v1312_v7  ;;  %v1314_v44 = vpop.f32.mrb[33].mxu0  ;;  %v2719_v17 = vld [vmem:[%s8864_s2 + $0xb0] sm:$0xff] }
 0x16c   : > { %v1722_v13 = vpop.f32.mrb[48].mxu1  ;;  %v7719_v62 = vpop.permute.xlu1 %3449  ;;  %2757 = vst.msk [vmem:[#allocation3 + $0x160] sm:$0xff] %vm2734_vm5, %v2719_v17 }
 0x16d   : > { %v7725_v27 = vadd.f32 %v1722_v13, %v7541_v30  ;;  %2425 = vmatmul.mubr.f32.gmra.mrb[154].mxu1 %v8983_v15  ;;  %v1724_v10 = vpop.f32.mrb[49].mxu1  ;;  %v2876_v47 = vpop.permute.xlu0 %2875  ;;  %v2725_v15 = vld [vmem:[%s8864_s2 + $0xe0] sm:$0xff] }
 0x16e   : > { %v1317_v54 = vpop.f32.mrb[34].mxu0  ;;  %2429 = vmatprep.mubr.f32.mxu1 %v8982_v18  ;;  %2950 = vst.msk [vmem:[#allocation3 + $0x160] sm:$0xff] %vm2927_vm4, %v2876_v47 }
 0x16f   : > { %v7734_v46 = vadd.f32 %v7336_v24, %v1317_v54  ;;  %v1319_v59 = vpop.f32.mrb[35].mxu0  ;;  %v2721_v24 = vld [vmem:[%s8864_s2 + $0xc0] sm:$0xff]  ;;  %2763 = vst.msk [vmem:[#allocation3 + $0x1c0] sm:$0xff] %vm2734_vm5, %v2725_v15 }
 0x170   : > { %v1727_v30 = vpop.f32.mrb[50].mxu1  ;;  %v7738_v34 = vpop.permute.xlu1 %3451  ;;  %2759 = vst.msk [vmem:[#allocation3 + $0x180] sm:$0xff] %vm2734_vm5, %v2721_v24 }
 0x171   : > { %v7741_v51 = vadd.f32 %v1727_v30, %v7562_v49  ;;  %2430 = vmatmul.mubr.f32.gmra.mrb[156].mxu1 %v8982_v18  ;;  %v1729_v14 = vpop.f32.mrb[51].mxu1  ;;  %v2880_v1 = vpop.permute.xlu0 %2879 }
 0x172   : > { %v1322_v63 = vpop.f32.mrb[36].mxu0  ;;  %2434 = vmatprep.mubr.f32.mxu1 %v8982_v18  ;;  %2952 = vst.msk [vmem:[#allocation3 + $0x180] sm:$0xff] %vm2927_vm4, %v2880_v1  ;;  %v2727_v14 = vld [vmem:[%s8864_s2 + $0xf0] sm:$0xff] }
 0x173   : > { %v7749_v41 = vadd.f32 %v7373_v20, %v1322_v63  ;;  %v1324_v58 = vpop.f32.mrb[37].mxu0  ;;  %v2723_v20 = vld [vmem:[%s8864_s2 + $0xd0] sm:$0xff]  ;;  %2765 = vst.msk [vmem:[#allocation3 + $0x1e0] sm:$0xff] %vm2734_vm5, %v2727_v14 }
 0x174   : > { %v1732_v42 = vpop.f32.mrb[52].mxu1  ;;  %v7753_v49 = vpop.permute.xlu1 %3453  ;;  %2761 = vst.msk [vmem:[#allocation3 + $0x1a0] sm:$0xff] %vm2734_vm5, %v2723_v20 }
 0x175   : > { %v7756_v36 = vadd.f32 %v1732_v42, %v7588_v61  ;;  %2435 = vmatmul.mubr.f32.gmra.mrb[158].mxu1 %v8982_v18  ;;  %v1734_v33 = vpop.f32.mrb[53].mxu1  ;;  %v2884_v4 = vpop.permute.xlu0 %2883 }
 0x176   : > { %v1327_v60 = vpop.f32.mrb[38].mxu0  ;;  %2954 = vst.msk [vmem:[#allocation3 + $0x1a0] sm:$0xff] %vm2927_vm4, %v2884_v4 }
 0x177   : > { %v7763_v50 = vadd.f32 %v7364_v28, %v1327_v60  ;;  %v1329_v38 = vpop.f32.mrb[39].mxu0 }
 0x178   : > { %v1737_v7 = vpop.f32.mrb[54].mxu1  ;;  %v7767_v61 = vpop.permute.xlu1 %3455 }
 0x179   : > { %v7770_v5 = vadd.f32 %v1737_v7, %v7609_v26  ;;  %v1739_v44 = vpop.f32.mrb[55].mxu1  ;;  %v2888_v13 = vpop.permute.xlu0 %2887 }
 0x17a   : > { %v1332_v31 = vpop.f32.mrb[40].mxu0  ;;  %2956 = vst.msk [vmem:[#allocation3 + $0x1c0] sm:$0xff] %vm2927_vm4, %v2888_v13 }
 0x17b   : > { %v7776_v28 = vadd.f32 %v7401_v8, %v1332_v31  ;;  %v1334_v10 = vpop.f32.mrb[41].mxu0 }
 0x17c   : > { %v1742_v47 = vpop.f32.mrb[56].mxu1  ;;  %v7780_v54 = vpop.permute.xlu1 %3457 }
 0x17d   : > { %v7783_v26 = vadd.f32 %v1742_v47, %v7631_v9  ;;  %v1744_v17 = vpop.f32.mrb[57].mxu1  ;;  %v2892_v59 = vpop.permute.xlu0 %2891 }
 0x17e   : > { %v1337_v30 = vpop.f32.mrb[42].mxu0  ;;  %2958 = vst.msk [vmem:[#allocation3 + $0x1e0] sm:$0xff] %vm2927_vm4, %v2892_v59 }
 0x17f   : > { %v7789_v8 = vadd.f32 %v7394_v52, %v1337_v30  ;;  %v1339_v1 = vpop.f32.mrb[43].mxu0 }
 0x180   : > { %v1747_v63 = vpop.f32.mrb[58].mxu1  ;;  %v7793_v24 = vpop.permute.xlu1 %3459 }
 0x181   : > { %v7796_v9 = vadd.f32 %v1747_v63, %v7651_v43  ;;  %v1749_v58 = vpop.f32.mrb[59].mxu1  ;;  %v3025_v42 = vpop.permute.xlu0 %3024 }
 0x182   : > { %v1342_v33 = vpop.f32.mrb[44].mxu0  ;;  %3121 = vst.msk [vmem:[#allocation3] sm:$0xff] %vm3120_vm6, %v3025_v42 }
 0x183   : > { %v7800_v4 = vadd.f32 %v7431_v57, %v1342_v33  ;;  %v1344_v52 = vpop.f32.mrb[45].mxu0 }
 0x184   : > { %v1752_v60 = vpop.f32.mrb[60].mxu1  ;;  %v7802_v20 = vpop.permute.xlu1 %3461 }
 0x185   : > { %v7805_v38 = vadd.f32 %v1752_v60, %v7673_v2  ;;  %v1754_v7 = vpop.f32.mrb[61].mxu1  ;;  %v3029_v44 = vpop.permute.xlu0 %3028 }
 0x186   : > { %v1347_v13 = vpop.f32.mrb[46].mxu0  ;;  %3123 = vst.msk [vmem:[#allocation3 + $0x20] sm:$0xff] %vm3120_vm6, %v3029_v44 }
 0x187   : > { %v7809_v43 = vadd.f32 %v7421_v35, %v1347_v13  ;;  %v1349_v31 = vpop.f32.mrb[47].mxu0 }
 0x188   : > { %v1757_v15 = vpop.f32.mrb[62].mxu1  ;;  %v7811_v10 = vpop.permute.xlu1 %3463 }
 0x189   : > { %8984 = vst [vmem:[#allocation6_spill] sm:$0xff] %v7811_v10  ;;  %v7814_v57 = vadd.f32 %v1757_v15, %v7694_v12  ;;  %v1759_v47 = vpop.f32.mrb[63].mxu1  ;;  %v3033_v17 = vpop.permute.xlu0 %3032 }
 0x18a   : > { %v1352_v59 = vpop.f32.mrb[48].mxu0  ;;  %3125 = vst.msk [vmem:[#allocation3 + $0x40] sm:$0xff] %vm3120_vm6, %v3033_v17 }
 0x18b   : > { %v7818_v2 = vadd.f32 %v7455_v11, %v1352_v59  ;;  %v1354_v30 = vpop.f32.mrb[49].mxu0 }
 0x18c   : > { %v1762_v14 = vpop.f32.mrb[64].mxu1  ;;  %v7820_v1 = vpop.permute.xlu1 %3465 }
 0x18d   : > { %8985 = vst [vmem:[#allocation7_spill] sm:$0xff] %v7820_v1  ;;  %v7823_v35 = vadd.f32 %v1762_v14, %v7717_v3  ;;  %v1764_v63 = vpop.f32.mrb[65].mxu1  ;;  %v3037_v58 = vpop.permute.xlu0 %3036 }
 0x18e   : > { %v1357_v42 = vpop.f32.mrb[50].mxu0  ;;  %3127 = vst.msk [vmem:[#allocation3 + $0x60] sm:$0xff] %vm3120_vm6, %v3037_v58 }
 0x18f   : > { %v7827_v12 = vadd.f32 %v7448_v56, %v1357_v42  ;;  %v1359_v33 = vpop.f32.mrb[51].mxu0 }
 0x190   : > { %v1767_v52 = vpop.f32.mrb[66].mxu1  ;;  %v7829_v60 = vpop.permute.xlu1 %3467 }
 0x191   : > { %8986 = vst [vmem:[#allocation8_spill] sm:$0xff] %v7829_v60  ;;  %v7832_v11 = vadd.f32 %v1767_v52, %v7734_v46  ;;  %v1769_v7 = vpop.f32.mrb[67].mxu1  ;;  %v3041_v44 = vpop.permute.xlu0 %3040 }
 0x192   : > { %v1362_v13 = vpop.f32.mrb[52].mxu0  ;;  %3129 = vst.msk [vmem:[#allocation3 + $0x80] sm:$0xff] %vm3120_vm6, %v3041_v44 }
 0x193   : > { %v7836_v3 = vadd.f32 %v7481_v45, %v1362_v13  ;;  %v1364_v31 = vpop.f32.mrb[53].mxu0 }
 0x194   : > { %v1772_v15 = vpop.f32.mrb[68].mxu1  ;;  %v7838_v47 = vpop.permute.xlu1 %3469 }
 0x195   : > { %8987 = vst [vmem:[#allocation9_spill] sm:$0xff] %v7838_v47  ;;  %v7841_v56 = vadd.f32 %v1772_v15, %v7749_v41  ;;  %v1774_v17 = vpop.f32.mrb[69].mxu1  ;;  %v3045_v59 = vpop.permute.xlu0 %3044 }
 0x196   : > { %v1367_v30 = vpop.f32.mrb[54].mxu0  ;;  %3131 = vst.msk [vmem:[#allocation3 + $0xa0] sm:$0xff] %vm3120_vm6, %v3045_v59 }
 0x197   : > { %v7845_v46 = vadd.f32 %v7471_v16, %v1367_v30  ;;  %v1369_v14 = vpop.f32.mrb[55].mxu0 }
 0x198   : > { %v1777_v63 = vpop.f32.mrb[70].mxu1  ;;  %v7847_v58 = vpop.permute.xlu1 %3471 }
 0x199   : > { %8988 = vst [vmem:[#allocation10_spill] sm:$0xff] %v7847_v58  ;;  %v7850_v45 = vadd.f32 %v1777_v63, %v7763_v50  ;;  %v1779_v42 = vpop.f32.mrb[71].mxu1  ;;  %v3049_v33 = vpop.permute.xlu0 %3048 }
 0x19a   : > { %v1372_v52 = vpop.f32.mrb[56].mxu0  ;;  %3133 = vst.msk [vmem:[#allocation3 + $0xc0] sm:$0xff] %vm3120_vm6, %v3049_v33 }
 0x19b   : > { %v7854_v41 = vadd.f32 %v7507_v0, %v1372_v52  ;;  %v1374_v7 = vpop.f32.mrb[57].mxu0 }
 0x19c   : > { %v1782_v44 = vpop.f32.mrb[72].mxu1  ;;  %v7856_v13 = vpop.permute.xlu1 %3473 }
 0x19d   : > { %8989 = vst [vmem:[#allocation11_spill] sm:$0xff] %v7856_v13  ;;  %v7859_v16 = vadd.f32 %v1782_v44, %v7776_v28  ;;  %v1784_v31 = vpop.f32.mrb[73].mxu1  ;;  %v3053_v15 = vpop.permute.xlu0 %3052 }
 0x19e   : > { %v1377_v17 = vpop.f32.mrb[58].mxu0  ;;  %3135 = vst.msk [vmem:[#allocation3 + $0xe0] sm:$0xff] %vm3120_vm6, %v3053_v15 }
 0x19f   : > { %v7863_v50 = vadd.f32 %v7502_v39, %v1377_v17  ;;  %v1379_v59 = vpop.f32.mrb[59].mxu0 }
 0x1a0   : > { %v1787_v30 = vpop.f32.mrb[74].mxu1  ;;  %v7865_v14 = vpop.permute.xlu1 %3475 }
 0x1a1   : > { %8990 = vst [vmem:[#allocation12_spill] sm:$0xff] %v7865_v14  ;;  %v7868_v0 = vadd.f32 %v1787_v30, %v7789_v8  ;;  %v1789_v63 = vpop.f32.mrb[75].mxu1  ;;  %v3057_v42 = vpop.permute.xlu0 %3056 }
 0x1a2   : > { %v1382_v33 = vpop.f32.mrb[60].mxu0  ;;  %3137 = vst.msk [vmem:[#allocation3 + $0x100] sm:$0xff] %vm3120_vm6, %v3057_v42 }
 0x1a3   : > { %v7872_v28 = vadd.f32 %v7531_v55, %v1382_v33  ;;  %v1384_v52 = vpop.f32.mrb[61].mxu0 }
 0x1a4   : > { %v1792_v7 = vpop.f32.mrb[76].mxu1  ;;  %v7874_v44 = vpop.permute.xlu1 %3477 }
 0x1a5   : > { %8991 = vst [vmem:[#allocation13_spill] sm:$0xff] %v7874_v44  ;;  %v7877_v39 = vadd.f32 %v1792_v7, %v7800_v4  ;;  %v1794_v31 = vpop.f32.mrb[77].mxu1  ;;  %v3061_v15 = vpop.permute.xlu0 %3060 }
 0x1a6   : > { %v1387_v17 = vpop.f32.mrb[62].mxu0  ;;  %3139 = vst.msk [vmem:[#allocation3 + $0x120] sm:$0xff] %vm3120_vm6, %v3061_v15 }
 0x1a7   : > { %v7881_v8 = vadd.f32 %v7523_v29, %v1387_v17  ;;  %v1389_v59 = vpop.f32.mrb[63].mxu0 }
 0x1a8   : > { %v1797_v30 = vpop.f32.mrb[78].mxu1  ;;  %v7883_v63 = vpop.permute.xlu1 %3479 }
 0x1a9   : > { %8992 = vst [vmem:[#allocation14_spill] sm:$0xff] %v7883_v63  ;;  %v7886_v55 = vadd.f32 %v1797_v30, %v7809_v43  ;;  %v1799_v42 = vpop.f32.mrb[79].mxu1  ;;  %v7888_v33 = vpop.permute.xlu0 %3443 }
 0x1aa   : > { %v5061_v4 = vpop.f32.mrb[64].mxu0 }
 0x1ab   : > { %v7891_v52 = vadd.f32 %v5061_v4, %v7575_v6  ;;  %v1907_v7 = vpop.f32.mrb[65].mxu0 }
 0x1ac   : > { %v1802_v31 = vpop.f32.mrb[80].mxu1  ;;  %v7894_v15 = vadd.f32 %v1907_v7, %v7552_v21  ;;  %v7896_v29 = vpop.permute.xlu1 %3481 }
 0x1ad   : > { %8993 = vst [vmem:[#allocation15_spill] sm:$0xff] %v7896_v29  ;;  %v7899_v17 = vadd.f32 %v1802_v31, %v7818_v2  ;;  %v1804_v59 = vpop.f32.mrb[81].mxu1  ;;  %v3065_v43 = vpop.permute.xlu0 %3064 }
 0x1ae   : > { %v5064_v30 = vpop.f32.mrb[66].mxu0  ;;  %3141 = vst.msk [vmem:[#allocation3 + $0x140] sm:$0xff] %vm3120_vm6, %v3065_v43 }
 0x1af   : > { %v7903_v42 = vadd.f32 %v5064_v30, %v7618_v23  ;;  %v1917_v6 = vpop.f32.mrb[67].mxu0 }
 0x1b0   : > { %v1807_v4 = vpop.f32.mrb[82].mxu1  ;;  %v7906_v22 = vadd.f32 %v1917_v6, %v7598_v19  ;;  %v7908_v21 = vpop.permute.xlu1 %3483 }
 0x1b1   : > { %8994 = vst [vmem:[#allocation16_spill] sm:$0xff] %v7908_v21  ;;  %v7911_v7 = vadd.f32 %v1807_v4, %v7827_v12  ;;  %v1809_v2 = vpop.f32.mrb[83].mxu1  ;;  %v7913_v31 = vpop.permute.xlu0 %3485 }
 0x1b2   : > { %8995 = vst [vmem:[#allocation17_spill] sm:$0xff] %v7913_v31  ;;  %v5067_v59 = vpop.f32.mrb[68].mxu0 }
 0x1b3   : > { %v7916_v29 = vadd.f32 %v5067_v59, %v7660_v25  ;;  %v1927_v43 = vpop.f32.mrb[69].mxu0 }
 0x1b4   : > { %v1812_v23 = vpop.f32.mrb[84].mxu1  ;;  %v7919_v30 = vadd.f32 %v1927_v43, %v7640_v40  ;;  %v3067_v63 = vpop.permute.xlu1 %3066 }
 0x1b5   : > { %v7922_v19 = vadd.f32 %v1812_v23, %v7836_v3  ;;  %v1814_v6 = vpop.f32.mrb[85].mxu1  ;;  %3142 = vst.msk [vmem:[#allocation3 + $0x150] sm:$0xff] %vm3120_vm6, %v3067_v63  ;;  %v3069_v12 = vpop.permute.xlu0 %3068 }
 0x1b6   : > { %v5070_v4 = vpop.f32.mrb[70].mxu0  ;;  %3143 = vst.msk [vmem:[#allocation3 + $0x160] sm:$0xff] %vm3120_vm6, %v3069_v12 }
 0x1b7   : > { %v7927_v2 = vadd.f32 %v5070_v4, %v7705_v48  ;;  %v1937_v25 = vpop.f32.mrb[71].mxu0 }
 0x1b8   : > { %v1817_v59 = vpop.f32.mrb[86].mxu1  ;;  %v7930_v21 = vadd.f32 %v1937_v25, %v7684_v53 }
 0x1b9   : > { %v7933_v40 = vadd.f32 %v1817_v59, %v7845_v46  ;;  %v1819_v3 = vpop.f32.mrb[87].mxu1 }
 0x1ba   : > { %v5073_v43 = vpop.f32.mrb[72].mxu0 }
 0x1bb   : > { %v7936_v23 = vadd.f32 %v5073_v43, %v7741_v51  ;;  %v1947_v63 = vpop.f32.mrb[73].mxu0 }
 0x1bc   : > { %v1822_v6 = vpop.f32.mrb[88].mxu1  ;;  %v7939_v12 = vadd.f32 %v1947_v63, %v7725_v27  ;;  %v7956_v63 = vpop.permute.xlu0 %3489 }
 0x1bd   : > { %v7942_v48 = vadd.f32 %v1822_v6, %v7854_v41  ;;  %v1824_v4 = vpop.f32.mrb[89].mxu1  ;;  %8996 = vst [vmem:[#allocation18_spill] sm:$0xff] %v7956_v63 }
 0x1be   : > { %v5076_v44 = vpop.f32.mrb[74].mxu0 }
 0x1bf   : > { %v7945_v53 = vadd.f32 %v5076_v44, %v7770_v5  ;;  %v1957_v46 = vpop.f32.mrb[75].mxu0 }
 0x1c0   : > { %v1827_v25 = vpop.f32.mrb[90].mxu1  ;;  %v7948_v59 = vadd.f32 %v1957_v46, %v7756_v36 }
 0x1c1   : > { %v7951_v51 = vadd.f32 %v1827_v25, %v7863_v50  ;;  %v1829_v3 = vpop.f32.mrb[91].mxu1  ;;  %v3073_v25 = vpop.permute.xlu0 %3072 }
 0x1c2   : > { %v5079_v43 = vpop.f32.mrb[76].mxu0  ;;  %3145 = vst.msk [vmem:[#allocation3 + $0x180] sm:$0xff] %vm3120_vm6, %v3073_v25 }
 0x1c3   : > { %v7954_v27 = vadd.f32 %v5079_v43, %v7796_v9  ;;  %v1967_v41 = vpop.f32.mrb[77].mxu0 }
 0x1c4   : > { %v1832_v6 = vpop.f32.mrb[92].mxu1  ;;  %v7959_v5 = vadd.f32 %v1967_v41, %v7783_v26 }
 0x1c5   : > { %v7962_v44 = vadd.f32 %v1832_v6, %v7872_v28  ;;  %v1834_v36 = vpop.f32.mrb[93].mxu1 }
 0x1c6   : > { %v5082_v4 = vpop.f32.mrb[78].mxu0  ;;  %v7975_v36 = vpop.permute.xlu0 %3493 }
 0x1c7   : > { %v7965_v50 = vadd.f32 %v5082_v4, %v7814_v57  ;;  %v1977_v46 = vpop.f32.mrb[79].mxu0  ;;  %8997 = vst [vmem:[#allocation19_spill] sm:$0xff] %v7975_v36 }
 0x1c8   : > { %v1837_v3 = vpop.f32.mrb[94].mxu1  ;;  %v7968_v9 = vadd.f32 %v1977_v46, %v7805_v38 }
 0x1c9   : > { %v1838_v43 = vadd.f32 %v1837_v3, %v7881_v8  ;;  %v1839_v26 = vpop.f32.mrb[95].mxu1 }
 0x1ca   : > { %v5085_v41 = vpop.f32.mrb[80].mxu0  ;;  %v3077_v8 = vpop.permute.xlu0 %3076 }
 0x1cb   : > { %v7973_v28 = vadd.f32 %v5085_v41, %v7832_v11  ;;  %v1987_v6 = vpop.f32.mrb[81].mxu0  ;;  %3147 = vst.msk [vmem:[#allocation3 + $0x1a0] sm:$0xff] %vm3120_vm6, %v3077_v8 }
 0x1cc   : > { %v7978_v57 = vadd.f32 %v1987_v6, %v7823_v35  ;;  %v7980_v4 = vpop.f32.mrb[96].mxu1 }
 0x1cd   : > { %v2283_v63 = vpop.f32.mrb[97].mxu1 }
 0x1ce   : > { %v5088_v38 = vpop.f32.mrb[82].mxu0  ;;  %v7992_v36 = vpop.permute.xlu0 %3497 }
 0x1cf   : > { %v7983_v46 = vadd.f32 %v5088_v38, %v7850_v45  ;;  %v1997_v25 = vpop.f32.mrb[83].mxu0  ;;  %8998 = vst [vmem:[#allocation20_spill] sm:$0xff] %v7992_v36 }
 0x1d0   : > { %v7986_v3 = vadd.f32 %v1997_v25, %v7841_v56  ;;  %v2286_v11 = vpop.f32.mrb[98].mxu1  ;;  %v3154_v56 = vld [vmem:[%s8867_s5 + $0x8] sm:$0xff] }
 0x1d1   : > { %v2288_v26 = vpop.f32.mrb[99].mxu1  ;;  %3187 = vst.msk [vmem:[#allocation3 + $0x18] sm:$0xff] %vm3185_vm7, %v3154_v56 }
 0x1d2   : > { %v5091_v41 = vpop.f32.mrb[84].mxu0  ;;  %v3081_v26 = vpop.permute.xlu0 %3080 }
 0x1d3   : > { %v7990_v35 = vadd.f32 %v5091_v41, %v7868_v0  ;;  %v2007_v6 = vpop.f32.mrb[85].mxu0  ;;  %3149 = vst.msk [vmem:[#allocation3 + $0x1c0] sm:$0xff] %vm3120_vm6, %v3081_v26 }
 0x1d4   : > { %v7995_v63 = vadd.f32 %v2007_v6, %v7859_v16  ;;  %v2291_v45 = vpop.f32.mrb[100].mxu1 }
 0x1d5   : > { %v2293_v38 = vpop.f32.mrb[101].mxu1 }
 0x1d6   : > { %v5094_v25 = vpop.f32.mrb[86].mxu0  ;;  %v8011_v13 = vpop.permute.xlu0 %3501 }
 0x1d7   : > { %v8002_v8 = vadd.f32 %v5094_v25, %v7886_v55  ;;  %v2017_v0 = vpop.f32.mrb[87].mxu0  ;;  %8999 = vst [vmem:[#allocation21_spill] sm:$0xff] %v8011_v13 }
 0x1d8   : > { %v8005_v41 = vadd.f32 %v2017_v0, %v7877_v39  ;;  %v2296_v16 = vpop.f32.mrb[102].mxu1 }
 0x1d9   : > { %v2298_v6 = vpop.f32.mrb[103].mxu1 }
 0x1da   : > { %v5097_v36 = vpop.f32.mrb[88].mxu0  ;;  %v3085_v58 = vpop.permute.xlu0 %3084 }
 0x1db   : > { %v8009_v14 = vadd.f32 %v5097_v36, %v7911_v7  ;;  %v2027_v38 = vpop.f32.mrb[89].mxu0  ;;  %3151 = vst.msk [vmem:[#allocation3 + $0x1e0] sm:$0xff] %vm3120_vm6, %v3085_v58  ;;  %v3156_v58 = vld [vmem:[%s8867_s5 + $0x18] sm:$0xff] }
 0x1dc   : > { %v8014_v56 = vadd.f32 %v2027_v38, %v7899_v17  ;;  %v2301_v55 = vpop.f32.mrb[104].mxu1  ;;  %v3153_v17 = vld [vmem:[%s8867_s5] sm:$0xff]  ;;  %3189 = vst.msk [vmem:[#allocation3 + $0x38] sm:$0xff] %vm3185_vm7, %v3156_v58 }
 0x1dd   : > { %v2303_v25 = vpop.f32.mrb[105].mxu1  ;;  %3186 = vst.msk [vmem:[#allocation3 + $0x8] sm:$0xff] %vm3185_vm7, %v3153_v17 }
 0x1de   : > { %v5100_v31 = vpop.f32.mrb[90].mxu0 }
 0x1df   : > { %v8017_v39 = vadd.f32 %v5100_v31, %v7933_v40  ;;  %v2037_v0 = vpop.f32.mrb[91].mxu0 }
 0x1e0   : > { %v8020_v26 = vadd.f32 %v2037_v0, %v7922_v19  ;;  %v2306_v6 = vpop.f32.mrb[106].mxu1 }
 0x1e1   : > { %v2308_v7 = vpop.f32.mrb[107].mxu1 }
 0x1e2   : > { %v5103_v36 = vpop.f32.mrb[92].mxu0 }
 0x1e3   : > { %v8027_v38 = vadd.f32 %v5103_v36, %v7951_v51  ;;  %v2047_v25 = vpop.f32.mrb[93].mxu0 }
 0x1e4   : > { %v8031_v31 = vadd.f32 %v2047_v25, %v7942_v48  ;;  %v2311_v19 = vpop.f32.mrb[108].mxu1  ;;  %v3155_v48 = vld [vmem:[%s8867_s5 + $0x10] sm:$0xff] }
 0x1e5   : > { %v2313_v40 = vpop.f32.mrb[109].mxu1  ;;  %3188 = vst.msk [vmem:[#allocation3 + $0x28] sm:$0xff] %vm3185_vm7, %v3155_v48 }
 0x1e6   : > { %v5106_v0 = vpop.f32.mrb[94].mxu0 }
 0x1e7   : > { %v8036_v7 = vadd.f32 %v5106_v0, %v1838_v43  ;;  %v2057_v13 = vpop.f32.mrb[95].mxu0 }
 0x1e8   : > { %v8040_v51 = vadd.f32 %v2057_v13, %v7962_v44  ;;  %v2316_v36 = vpop.f32.mrb[110].mxu1 }
 0x1e9   : > { %v2318_v17 = vpop.f32.mrb[111].mxu1 }
 0x1ea   : > { %v5141_v60 = vpop.f32.mrb[96].mxu0  ;;  %v3158_v17 = vld [vmem:[%s8867_s5 + $0x28] sm:$0xff] }
 0x1eb   : > { %v2512_v25 = vadd.f32 %v5141_v60, %v2286_v11  ;;  %v2506_v40 = vpop.f32.mrb[97].mxu0  ;;  %3191 = vst.msk [vmem:[#allocation3 + $0x58] sm:$0xff] %vm3185_vm7, %v3158_v17 }
 0x1ec   : > { %v2507_v43 = vadd.f32 %v2506_v40, %v7980_v4  ;;  %v2321_v0 = vpop.f32.mrb[112].mxu1 }
 0x1ed   : > { %v2666_v47 = vadd.f32 %v2512_v25, %v7891_v52  ;;  %v2323_v58 = vpop.f32.mrb[113].mxu1  ;;  %v3401_v52 = vld [vmem:[%s8868_s6 + $0xb0] sm:$0xff] }
 0x1ee   : > { %v2665_v13 = vadd.f32 %v2507_v43, %v7894_v15  ;;  %v5144_v44 = vpop.f32.mrb[98].mxu0 }
 0x1ef   : > { %v2522_v10 = vadd.f32 %v5144_v44, %v2296_v16  ;;  %v2516_v1 = vpop.f32.mrb[99].mxu0  ;;  %3252 = vrot.lane.b32.xlu1 %v2666_v47, %s5517_s17  ;;  %v3157_v47 = vld [vmem:[%s8867_s5 + $0x20] sm:$0xff] }
 0x1f0   : > { %v2517_v60 = vadd.f32 %v2516_v1, %v2291_v45  ;;  %3250 = vrot.lane.b32.xlu0 %v2665_v13, %s5517_s17  ;;  %v2326_v15 = vpop.f32.mrb[114].mxu1  ;;  %3190 = vst.msk [vmem:[#allocation3 + $0x48] sm:$0xff] %vm3185_vm7, %v3157_v47 }
 0x1f1   : > { %v2668_v4 = vadd.f32 %v2522_v10, %v7903_v42  ;;  %v2328_v11 = vpop.f32.mrb[115].mxu1  ;;  %v2983_v10 = vld [vmem:[%s8866_s4 + $0xb8] sm:$0xff] }
 0x1f2   : > { %v2667_v48 = vadd.f32 %v2517_v60, %v7906_v22  ;;  %v5147_v16 = vpop.f32.mrb[100].mxu0 }
 0x1f3   : > { %v2532_v25 = vadd.f32 %v5147_v16, %v2306_v6  ;;  %v2526_v40 = vpop.f32.mrb[101].mxu0  ;;  %3487 = vrot.lane.b32.xlu1 %v3401_v52, %s5515_s27  ;;  %v3160_v6 = vld [vmem:[%s8867_s5 + $0x38] sm:$0xff] }
 0x1f4   : > { %v2527_v1 = vadd.f32 %v2526_v40, %v2301_v55  ;;  %3256 = vrot.lane.b32.xlu0 %v2668_v4, %s5517_s17  ;;  %v2331_v42 = vpop.f32.mrb[116].mxu1  ;;  %3193 = vst.msk [vmem:[#allocation3 + $0x78] sm:$0xff] %vm3185_vm7, %v3160_v6 }
 0x1f5   : > { %v2670_v22 = vadd.f32 %v2532_v25, %v7916_v29  ;;  %v2333_v45 = vpop.f32.mrb[117].mxu1  ;;  %v3403_v29 = vld [vmem:[%s8868_s6 + $0xc0] sm:$0xff] }
 0x1f6   : > { %v2669_v43 = vadd.f32 %v2527_v1, %v7919_v30  ;;  %v5150_v58 = vpop.f32.mrb[102].mxu0 }
 0x1f7   : > { %v2542_v13 = vadd.f32 %v5150_v58, %v2316_v36  ;;  %v2536_v44 = vpop.f32.mrb[103].mxu0  ;;  %3070 = vrot.lane.b32.xlu1 %v2983_v10, %s5516_s19  ;;  %v3159_v36 = vld [vmem:[%s8867_s5 + $0x30] sm:$0xff] }
 0x1f8   : > { %v2537_v55 = vadd.f32 %v2536_v44, %v2311_v19  ;;  %3254 = vrot.lane.b32.xlu0 %v2667_v48, %s5517_s17  ;;  %v2336_v17 = vpop.f32.mrb[118].mxu1  ;;  %3192 = vst.msk [vmem:[#allocation3 + $0x68] sm:$0xff] %vm3185_vm7, %v3159_v36 }
 0x1f9   : > { %v2672_v30 = vadd.f32 %v2542_v13, %v7927_v2  ;;  %v2338_v60 = vpop.f32.mrb[119].mxu1  ;;  %v2985_v2 = vld [vmem:[%s8866_s4 + $0xc8] sm:$0xff]  ;;  %v3161_v13 = vld [vmem:[%s8867_s5 + $0x40] sm:$0xff] }
 0x1fa   : > { %v2671_v52 = vadd.f32 %v2537_v55, %v7930_v21  ;;  %v5153_v4 = vpop.f32.mrb[104].mxu0  ;;  %3194 = vst.msk [vmem:[#allocation3 + $0x88] sm:$0xff] %vm3185_vm7, %v3161_v13 }
 0x1fb   : > { %v2552_v11 = vadd.f32 %v5153_v4, %v2326_v15  ;;  %v2546_v16 = vpop.f32.mrb[105].mxu0  ;;  %3491 = vrot.lane.b32.xlu1 %v3403_v29, %s5515_s27  ;;  %v3162_v15 = vld [vmem:[%s8867_s5 + $0x48] sm:$0xff]  ;;  %v3164_v4 = vld [vmem:[%s8867_s5 + $0x58] sm:$0xff] }
 0x1fc   : > { %v2547_v19 = vadd.f32 %v2546_v16, %v2321_v0  ;;  %3260 = vrot.lane.b32.xlu0 %v2670_v22, %s5517_s17  ;;  %v2341_v48 = vpop.f32.mrb[120].mxu1  ;;  %3195 = vst.msk [vmem:[#allocation3 + $0x98] sm:$0xff] %vm3185_vm7, %v3162_v15  ;;  %3197 = vst.msk [vmem:[#allocation3 + $0xb8] sm:$0xff] %vm3185_vm7, %v3164_v4 }
 0x1fd   : > { %v2674_v21 = vadd.f32 %v2552_v11, %v7936_v23  ;;  %v2343_v47 = vpop.f32.mrb[121].mxu1  ;;  %v3405_v23 = vld [vmem:[%s8868_s6 + $0xd0] sm:$0xff] }
 0x1fe   : > { %v2673_v25 = vadd.f32 %v2547_v19, %v7939_v12  ;;  %v5156_v40 = vpop.f32.mrb[106].mxu0 }
 0x1ff   : > { %v2562_v1 = vadd.f32 %v5156_v40, %v2336_v17  ;;  %v2556_v10 = vpop.f32.mrb[107].mxu0  ;;  %3074 = vrot.lane.b32.xlu1 %v2985_v2, %s5516_s19 }
 0x200   : > { %v2557_v0 = vadd.f32 %v2556_v10, %v2331_v42  ;;  %3258 = vrot.lane.b32.xlu0 %v2669_v43, %s5517_s17  ;;  %v2346_v22 = vpop.f32.mrb[122].mxu1 }
 0x201   : > { %v2676_v12 = vadd.f32 %v2562_v1, %v7945_v53  ;;  %v2348_v45 = vpop.f32.mrb[123].mxu1  ;;  %v2987_v53 = vld [vmem:[%s8866_s4 + $0xd8] sm:$0xff] }
 0x202   : > { %v8104_v58 = vadd.f32 %v2557_v0, %v7948_v59  ;;  %v5159_v6 = vpop.f32.mrb[108].mxu0 }
 0x203   : > { %v2572_v44 = vadd.f32 %v5159_v6, %v2346_v22  ;;  %v2566_v42 = vpop.f32.mrb[109].mxu0  ;;  %3495 = vrot.lane.b32.xlu1 %v3405_v23, %s5515_s27  ;;  %v3409_v23 = vld [vmem:[%s8868_s6 + $0xf0] sm:$0xff] }
 0x204   : > { %v2567_v43 = vadd.f32 %v2566_v42, %v2341_v48  ;;  %3264 = vrot.lane.b32.xlu0 %v2672_v30, %s5517_s17  ;;  %v2351_v55 = vpop.f32.mrb[124].mxu1  ;;  %v3163_v48 = vld [vmem:[%s8867_s5 + $0x50] sm:$0xff] }
 0x205   : > { %v8116_v59 = vadd.f32 %v2572_v44, %v7954_v27  ;;  %v2353_v29 = vpop.f32.mrb[125].mxu1  ;;  %v3407_v27 = vld [vmem:[%s8868_s6 + $0xe0] sm:$0xff]  ;;  %3196 = vst.msk [vmem:[#allocation3 + $0xa8] sm:$0xff] %vm3185_vm7, %v3163_v48 }
 0x206   : > { %v8119_v17 = vadd.f32 %v2567_v43, %v7959_v5  ;;  %v5162_v60 = vpop.f32.mrb[110].mxu0  ;;  %v3174_v29 = vld [vmem:[%s8867_s5 + $0xa8] sm:$0xff] }
 0x207   : > { %v2576_v36 = vpop.f32.mrb[111].mxu0  ;;  %3078 = vrot.lane.b32.xlu1 %v2987_v53, %s5516_s19  ;;  %3207 = vst.msk [vmem:[#allocation3 + $0x158] sm:$0xff] %vm3185_vm7, %v3174_v29 }
 0x208   : > { %v2356_v30 = vpop.f32.mrb[126].mxu1  ;;  %v2577_v11 = vadd.f32 %v2576_v36, %v2351_v55  ;;  %3262 = vrot.lane.b32.xlu0 %v2671_v52, %s5517_s17 }
 0x209   : > { %v2582_v5 = vadd.f32 %v5162_v60, %v2356_v30  ;;  %v2358_v16 = vpop.f32.mrb[127].mxu1 }
 0x20a   : > { %v8131_v19 = vadd.f32 %v2577_v11, %v7968_v9  ;;  %v5165_v2 = vpop.f32.mrb[112].mxu0  ;;  %v2989_v9 = vld [vmem:[%s8866_s4 + $0xe8] sm:$0xff] }
 0x20b   : > { %v8137_v47 = vadd.f32 %v2582_v5, %v7965_v50  ;;  %v2586_v40 = vpop.f32.mrb[113].mxu0  ;;  %3499 = vrot.lane.b32.xlu1 %v3407_v27, %s5515_s27  ;;  %v3166_v50 = vld [vmem:[%s8867_s5 + $0x68] sm:$0xff]  ;;  %v3168_v27 = vld [vmem:[%s8867_s5 + $0x78] sm:$0xff] }
 0x20c   : > { %v2361_v52 = vpop.f32.mrb[128].mxu1  ;;  %3268 = vrot.lane.b32.xlu0 %v2674_v21, %s5517_s17  ;;  %3199 = vst.msk [vmem:[#allocation3 + $0xd8] sm:$0xff] %vm3185_vm7, %v3166_v50  ;;  %3201 = vst.msk [vmem:[#allocation3 + $0xf8] sm:$0xff] %vm3185_vm7, %v3168_v27  ;;  %v3170_v50 = vld [vmem:[%s8867_s5 + $0x88] sm:$0xff] }
 0x20d   : > { %v2587_v15 = vadd.f32 %v2586_v40, %v2361_v52  ;;  %v2363_v1 = vpop.f32.mrb[129].mxu1  ;;  %v3176_v40 = vld [vmem:[%s8867_s5 + $0xb8] sm:$0xff]  ;;  %3203 = vst.msk [vmem:[#allocation3 + $0x118] sm:$0xff] %vm3185_vm7, %v3170_v50 }
 0x20e   : > { %v5168_v10 = vpop.f32.mrb[114].mxu0  ;;  %3209 = vst.msk [vmem:[#allocation3 + $0x178] sm:$0xff] %vm3185_vm7, %v3176_v40 }
 0x20f   : > { %v8149_v0 = vadd.f32 %v2587_v15, %v7978_v57  ;;  %3082 = vrot.lane.b32.xlu1 %v2989_v9, %s5516_s19  ;;  %v2596_v22 = vpop.f32.mrb[115].mxu0  ;;  %v3165_v57 = vld [vmem:[%s8867_s5 + $0x60] sm:$0xff] }
 0x210   : > { %v2366_v21 = vpop.f32.mrb[130].mxu1  ;;  %3266 = vrot.lane.b32.xlu0 %v2673_v25, %s5517_s17  ;;  %3198 = vst.msk [vmem:[#allocation3 + $0xc8] sm:$0xff] %vm3185_vm7, %v3165_v57 }
 0x211   : > { %v2592_v45 = vadd.f32 %v5165_v2, %v2366_v21  ;;  %v2368_v6 = vpop.f32.mrb[131].mxu1 }
 0x212   : > { %v5171_v13 = vpop.f32.mrb[116].mxu0  ;;  %v3178_v6 = vld [vmem:[%s8867_s5 + $0xc8] sm:$0xff] }
 0x213   : > { %v8161_v44 = vadd.f32 %v2592_v45, %v7973_v28  ;;  %v2606_v42 = vpop.f32.mrb[117].mxu0  ;;  %3503 = vrot.lane.b32.xlu1 %v3409_v23, %s5515_s27  ;;  %v3167_v28 = vld [vmem:[%s8867_s5 + $0x70] sm:$0xff]  ;;  %3211 = vst.msk [vmem:[#allocation3 + $0x198] sm:$0xff] %vm3185_vm7, %v3178_v6  ;;  %v2991_v6 = vld [vmem:[%s8866_s4 + $0xf8] sm:$0xff] }
 0x214   : > { %v2371_v25 = vpop.f32.mrb[132].mxu1  ;;  %3272 = vrot.lane.b32.xlu0 %v2676_v12, %s5517_s17  ;;  %3200 = vst.msk [vmem:[#allocation3 + $0xe8] sm:$0xff] %vm3185_vm7, %v3167_v28 }
 0x215   : > { %v2597_v43 = vadd.f32 %v2596_v22, %v2371_v25  ;;  %v2373_v55 = vpop.f32.mrb[133].mxu1 }
 0x216   : > { %v5174_v53 = vpop.f32.mrb[118].mxu0 }
 0x217   : > { %v8173_v60 = vadd.f32 %v2597_v43, %v7986_v3  ;;  %v2616_v4 = vpop.f32.mrb[119].mxu0  ;;  %v3172_v43 = vld [vmem:[%s8867_s5 + $0x98] sm:$0xff] }
 0x218   : > { %v2376_v12 = vpop.f32.mrb[134].mxu1  ;;  %3270 = vrot.lane.b32.xlu0 %v8104_v58, %s5517_s17  ;;  %3205 = vst.msk [vmem:[#allocation3 + $0x138] sm:$0xff] %vm3185_vm7, %v3172_v43  ;;  %v3577_v43 = vld [vmem:[#allocation3 + $0x30] sm:$0xff] }
 0x219   : > { %v2602_v36 = vadd.f32 %v5168_v10, %v2376_v12  ;;  %v2378_v30 = vpop.f32.mrb[135].mxu1 }
 0x21a   : > { %v5177_v11 = vpop.f32.mrb[120].mxu0 }
 0x21b   : > { %v8183_v5 = vadd.f32 %v2602_v36, %v7983_v46  ;;  %v2626_v3 = vpop.f32.mrb[121].mxu0  ;;  %v3169_v46 = vld [vmem:[%s8867_s5 + $0x80] sm:$0xff]  ;;  %v3175_v36 = vld [vmem:[%s8867_s5 + $0xb0] sm:$0xff] }
 0x21c   : > { %v2381_v16 = vpop.f32.mrb[136].mxu1  ;;  %3276 = vrot.lane.b32.xlu0 %v8116_v59, %s5517_s17  ;;  %3202 = vst.msk [vmem:[#allocation3 + $0x108] sm:$0xff] %vm3185_vm7, %v3169_v46  ;;  %3208 = vst.msk [vmem:[#allocation3 + $0x168] sm:$0xff] %vm3185_vm7, %v3175_v36  ;;  %v3581_v36 = vld [vmem:[#allocation3 + $0x50] sm:$0xff] }
 0x21d   : > { %v2607_v2 = vadd.f32 %v2606_v42, %v2381_v16  ;;  %v2383_v48 = vpop.f32.mrb[137].mxu1 }
 0x21e   : > { %v8188_v58 = vpop.f32.mrb[122].mxu0  ;;  %v3179_v48 = vld [vmem:[%s8867_s5 + $0xd0] sm:$0xff] }
 0x21f   : > { %v8197_v52 = vadd.f32 %v2607_v2, %v7995_v63  ;;  %v2636_v9 = vpop.f32.mrb[123].mxu0  ;;  %3212 = vst.msk [vmem:[#allocation3 + $0x1a8] sm:$0xff] %vm3185_vm7, %v3179_v48 }
 0x220   : > { %v2386_v59 = vpop.f32.mrb[138].mxu1  ;;  %3274 = vrot.lane.b32.xlu0 %v8119_v17, %s5517_s17 }
 0x221   : > { %v2612_v15 = vadd.f32 %v5171_v13, %v2386_v59  ;;  %v2388_v1 = vpop.f32.mrb[139].mxu1 }
 0x222   : > { %v8203_v10 = vpop.f32.mrb[124].mxu0  ;;  %v3183_v1 = vld [vmem:[%s8867_s5 + $0xf0] sm:$0xff] }
 0x223   : > { %v2686_v63 = vadd.f32 %v2612_v15, %v7990_v35  ;;  %v2646_v22 = vpop.f32.mrb[125].mxu0  ;;  %v3171_v35 = vld [vmem:[%s8867_s5 + $0x90] sm:$0xff]  ;;  %3216 = vst.msk [vmem:[#allocation3 + $0x1e8] sm:$0xff] %vm3185_vm7, %v3183_v1 }
 0x224   : > { %v2391_v21 = vpop.f32.mrb[140].mxu1  ;;  %3278 = vrot.lane.b32.xlu0 %v8131_v19, %s5517_s17  ;;  %3204 = vst.msk [vmem:[#allocation3 + $0x128] sm:$0xff] %vm3185_vm7, %v3171_v35 }
 0x225   : > { %v2617_v23 = vadd.f32 %v2616_v4, %v2391_v21  ;;  %3292 = vrot.lane.b32.xlu1 %v2686_v63, %s5517_s17  ;;  %v2393_v17 = vpop.f32.mrb[141].mxu1 }
 0x226   : > { %v8213_v45 = vpop.f32.mrb[126].mxu0 }
 0x227   : > { %v2687_v13 = vadd.f32 %v2617_v23, %v8005_v41  ;;  %v8222_v57 = vpop.f32.mrb[127].mxu0 }
 0x228   : > { %v2396_v19 = vpop.f32.mrb[142].mxu1  ;;  %3280 = vrot.lane.b32.xlu0 %v8137_v47, %s5517_s17  ;;  %v3180_v47 = vld [vmem:[%s8867_s5 + $0xd8] sm:$0xff] }
 0x229   : > { %v2622_v42 = vadd.f32 %v5174_v53, %v2396_v19  ;;  %v2398_v25 = vpop.f32.mrb[143].mxu1  ;;  %v3173_v53 = vld [vmem:[%s8867_s5 + $0xa0] sm:$0xff]  ;;  %3213 = vst.msk [vmem:[#allocation3 + $0x1b8] sm:$0xff] %vm3185_vm7, %v3180_v47 }
 0x22a   : > { %3206 = vst.msk [vmem:[#allocation3 + $0x148] sm:$0xff] %vm3185_vm7, %v3173_v53  ;;  %v3579_v53 = vld [vmem:[#allocation3 + $0x40] sm:$0xff] }
 0x22b   : > { %v2688_v55 = vadd.f32 %v2622_v42, %v8002_v8 }
 0x22c   : > { %v2401_v41 = vpop.f32.mrb[144].mxu1  ;;  %3282 = vrot.lane.b32.xlu0 %v8149_v0, %s5517_s17 }
 0x22d   : > { %v2627_v29 = vadd.f32 %v2626_v3, %v2401_v41  ;;  %3296 = vrot.lane.b32.xlu1 %v2688_v55, %s5517_s17  ;;  %v2403_v28 = vpop.f32.mrb[145].mxu1 }
 0x22e   : > { %v3775_v28 = vmul.f32 %v3577_v43, %v3577_v43 }
 0x22f   : > { %v2689_v8 = vadd.f32 %v2627_v29, %v8014_v56 }
 0x230   : > { %v2406_v4 = vpop.f32.mrb[146].mxu1  ;;  %3284 = vrot.lane.b32.xlu0 %v8161_v44, %s5517_s17  ;;  %v3182_v44 = vld [vmem:[%s8867_s5 + $0xe8] sm:$0xff] }
 0x231   : > { %v2632_v0 = vadd.f32 %v5177_v11, %v2406_v4  ;;  %v2408_v12 = vpop.f32.mrb[147].mxu1  ;;  %v3177_v11 = vld [vmem:[%s8867_s5 + $0xc0] sm:$0xff]  ;;  %3215 = vst.msk [vmem:[#allocation3 + $0x1d8] sm:$0xff] %vm3185_vm7, %v3182_v44 }
 0x232   : > { %3210 = vst.msk [vmem:[#allocation3 + $0x188] sm:$0xff] %vm3185_vm7, %v3177_v11 }
 0x233   : > { %v2690_v30 = vadd.f32 %v2632_v0, %v8009_v14  ;;  %v3777_v0 = vmul.f32 %v3579_v53, %v3579_v53 }
 0x234   : > { %v2411_v27 = vpop.f32.mrb[148].mxu1  ;;  %3286 = vrot.lane.b32.xlu0 %v8173_v60, %s5517_s17 }
 0x235   : > { %v2637_v56 = vadd.f32 %v2636_v9, %v2411_v27  ;;  %3300 = vrot.lane.b32.xlu1 %v2690_v30, %s5517_s17  ;;  %v2413_v3 = vpop.f32.mrb[149].mxu1 }
 0x237   : > { %v2691_v14 = vadd.f32 %v2637_v56, %v8020_v26  ;;  %v3779_v56 = vmul.f32 %v3581_v36, %v3581_v36 }
 0x238   : > { %v2416_v16 = vpop.f32.mrb[150].mxu1  ;;  %3288 = vrot.lane.b32.xlu0 %v8183_v5, %s5517_s17  ;;  %v3184_v5 = vld [vmem:[%s8867_s5 + $0xf8] sm:$0xff] }
 0x239   : > { %v2642_v60 = vadd.f32 %v8188_v58, %v2416_v16  ;;  %v2418_v2 = vpop.f32.mrb[151].mxu1  ;;  %v3181_v58 = vld [vmem:[%s8867_s5 + $0xe0] sm:$0xff]  ;;  %3217 = vst.msk [vmem:[#allocation3 + $0x1f8] sm:$0xff] %vm3185_vm7, %v3184_v5 }
 0x23a   : > { %3214 = vst.msk [vmem:[#allocation3 + $0x1c8] sm:$0xff] %vm3185_vm7, %v3181_v58 }
 0x23b   : > { %v2692_v40 = vadd.f32 %v2642_v60, %v8017_v39 }
 0x23c   : > { %v2421_v26 = vpop.f32.mrb[152].mxu1  ;;  %3290 = vrot.lane.b32.xlu0 %v8197_v52, %s5517_s17 }
 0x23d   : > { %v2647_v46 = vadd.f32 %v2646_v22, %v2421_v26  ;;  %3304 = vrot.lane.b32.xlu1 %v2692_v40, %s5517_s17  ;;  %v2423_v9 = vpop.f32.mrb[153].mxu1 }
 0x23f   : > { %v2693_v39 = vadd.f32 %v2647_v46, %v8031_v31 }
 0x240   : > { %v2426_v59 = vpop.f32.mrb[154].mxu1  ;;  %3294 = vrot.lane.b32.xlu0 %v2687_v13, %s5517_s17 }
 0x241   : > { %v2652_v52 = vadd.f32 %v8203_v10, %v2426_v59  ;;  %v2428_v15 = vpop.f32.mrb[155].mxu1 }
 0x243   : > { %v2694_v50 = vadd.f32 %v2652_v52, %v8027_v38 }
 0x244   : > { %v2431_v63 = vpop.f32.mrb[156].mxu1  ;;  %3298 = vrot.lane.b32.xlu0 %v2689_v8, %s5517_s17 }
 0x245   : > { %v2657_v31 = vadd.f32 %v8222_v57, %v2431_v63  ;;  %3308 = vrot.lane.b32.xlu1 %v2694_v50, %s5517_s17  ;;  %v2433_v22 = vpop.f32.mrb[157].mxu1  ;;  %v3575_v57 = vld [vmem:[#allocation3 + $0x20] sm:$0xff] }
 0x246   : > { %v3773_v25 = vmul.f32 %v3575_v57, %v3575_v57 }
 0x247   : > { %v2695_v21 = vadd.f32 %v2657_v31, %v8040_v51  ;;  %v3410_v51 = vld [vmem:[%s8868_s6 + $0xf8] sm:$0xff] }
 0x248   : > { %v2436_v10 = vpop.f32.mrb[158].mxu1  ;;  %3302 = vrot.lane.b32.xlu0 %v2691_v14, %s5517_s17 }
 0x249   : > { %v2662_v23 = vadd.f32 %v8213_v45, %v2436_v10  ;;  %v2438_v17 = vpop.f32.mrb[159].mxu1  ;;  %v3571_v45 = vld [vmem:[#allocation3] sm:$0xff] }
 0x24a   : > { %v3769_v35 = vmul.f32 %v3571_v45, %v3571_v45 }
 0x24b   : > { %v2696_v38 = vadd.f32 %v2662_v23, %v8036_v7  ;;  %v3573_v7 = vld [vmem:[#allocation3 + $0x10] sm:$0xff] }
 0x24c   : > { %3306 = vrot.lane.b32.xlu0 %v2693_v39, %s5517_s17  ;;  %v3771_v13 = vmul.f32 %v3573_v7, %v3573_v7  ;;  %v3636_v19 = vadd.f32 %v3573_v7, %v3571_v45 }
 0x24d   : > { %3312 = vrot.lane.b32.xlu1 %v2696_v38, %s5517_s17 }
 0x24e   : > { %v3833_v42 = vadd.f32 %v3771_v13, %v3769_v35  ;;  %v3637_v55 = vadd.f32 %v3636_v19, %v3575_v57 }
 0x250   : > { %3310 = vrot.lane.b32.xlu0 %v2695_v21, %s5517_s17  ;;  %v3834_v47 = vadd.f32 %v3833_v42, %v3773_v25  ;;  %v3638_v18 = vadd.f32 %v3637_v55, %v3577_v43  ;;  %v3595_v43 = vld [vmem:[#allocation3 + $0xc0] sm:$0xff] }
 0x251   : > { %3086 = vrot.lane.b32.xlu1 %v2991_v6, %s5516_s19  ;;  %v3593_v6 = vld [vmem:[#allocation3 + $0xb0] sm:$0xff] }
 0x252   : > { %v3835_v12 = vadd.f32 %v3834_v47, %v3775_v28  ;;  %v3639_v30 = vadd.f32 %v3638_v18, %v3579_v53  ;;  %v3791_v42 = vmul.f32 %v3593_v6, %v3593_v6 }
 0x254   : > { %3505 = vrot.lane.b32.xlu0 %v3410_v51, %s5515_s27  ;;  %v3836_v3 = vadd.f32 %v3835_v12, %v3777_v0  ;;  %v3640_v44 = vadd.f32 %v3639_v30, %v3581_v36  ;;  %v3793_v0 = vmul.f32 %v3595_v43, %v3595_v43 }
 0x256   : > { %v3837_v60 = vadd.f32 %v3836_v3, %v3779_v56  ;;  %v9000_v3 = vld [vmem:[#allocation7_spill] sm:$0xff] }
 0x261   : > { %v3253_v41 = vpop.permute.xlu1 %3252 }
 0x262   : > { %3348 = vst.msk [vmem:[#allocation3 + $0x18] sm:$0xff] %vm3346_vm11, %v3253_v41  ;;  %v3251_v29 = vpop.permute.xlu0 %3250 }
 0x263   : > { %3540 = vst.msk [vmem:[#allocation3 + $0x18] sm:$0xff] %vm2927_vm4, %v7675_v32 }
 0x264   : > { %3347 = vst.msk [vmem:[#allocation3 + $0x8] sm:$0xff] %vm3346_vm11, %v3251_v29 }
 0x265   : > { %3539 = vst.msk [vmem:[#allocation3 + $0x8] sm:$0xff] %vm2927_vm4, %v7888_v33  ;;  %v8316_v8 = vpop.permute.xlu1 %3487  ;;  %v3583_v33 = vld [vmem:[#allocation3 + $0x60] sm:$0xff] }
 0x266   : > { %v3257_v4 = vpop.permute.xlu0 %3256  ;;  %v3781_v16 = vmul.f32 %v3583_v33, %v3583_v33  ;;  %v3641_v2 = vadd.f32 %v3640_v44, %v3583_v33 }
 0x267   : > { %3350 = vst.msk [vmem:[#allocation3 + $0x38] sm:$0xff] %vm3346_vm11, %v3257_v4 }
 0x268   : > { %3542 = vst.msk [vmem:[#allocation3 + $0x38] sm:$0xff] %vm2927_vm4, %v7719_v62  ;;  %v3585_v62 = vld [vmem:[#allocation3 + $0x70] sm:$0xff]  ;;  %v3838_v46 = vadd.f32 %v3837_v60, %v3781_v16 }
 0x269   : > { %v3071_v32 = vpop.permute.xlu1 %3070  ;;  %v3783_v26 = vmul.f32 %v3585_v62, %v3585_v62  ;;  %v3642_v9 = vadd.f32 %v3641_v2, %v3585_v62 }
 0x26a   : > { %3144 = vst.msk [vmem:[#allocation3 + $0x170] sm:$0xff] %vm3120_vm6, %v3071_v32  ;;  %v3255_v27 = vpop.permute.xlu0 %3254  ;;  %v3574_v22 = vld [vmem:[#allocation3 + $0x18] sm:$0xff]  ;;  %v3597_v32 = vld [vmem:[#allocation3 + $0xd0] sm:$0xff] }
 0x26b   : > { %3349 = vst.msk [vmem:[#allocation3 + $0x28] sm:$0xff] %vm3346_vm11, %v3255_v27  ;;  %v3839_v59 = vadd.f32 %v3838_v46, %v3783_v26  ;;  %v3772_v51 = vmul.f32 %v3574_v22, %v3574_v22  ;;  %v3675_v35 = vsel %vm3673_vm12, %v3574_v22, 0.0  ;;  %v3795_v60 = vmul.f32 %v3597_v32, %v3597_v32  ;;  %v3599_v26 = vld [vmem:[#allocation3 + $0xe0] sm:$0xff] }
 0x26c   : > { %3541 = vst.msk [vmem:[#allocation3 + $0x28] sm:$0xff] %vm2927_vm4, %v7696_v37  ;;  %v3587_v37 = vld [vmem:[#allocation3 + $0x80] sm:$0xff]  ;;  %v3572_v21 = vld [vmem:[#allocation3 + $0x8] sm:$0xff] }
 0x26d   : > { %v8325_v11 = vpop.permute.xlu1 %3491  ;;  %v3785_v39 = vmul.f32 %v3587_v37, %v3587_v37  ;;  %v3643_v52 = vadd.f32 %v3642_v9, %v3587_v37  ;;  %v3770_v45 = vmul.f32 %v3572_v21, %v3572_v21  ;;  %v3674_v13 = vsel %vm3673_vm12, %v3572_v21, 0.0  ;;  %v9001_v9 = vld [vmem:[#allocation6_spill] sm:$0xff]  ;;  %v9002_v21 = vld [vmem:[#allocation9_spill] sm:$0xff] }
 0x26e   : > { %v3261_v14 = vpop.permute.xlu0 %3260  ;;  %v3871_v55 = vsel %vm3673_vm12, %v3772_v51, 0.0  ;;  %v3676_v28 = vadd.f32 %v3675_v35, %v3674_v13 }
 0x26f   : > { %3352 = vst.msk [vmem:[#allocation3 + $0x58] sm:$0xff] %vm3346_vm11, %v3261_v14  ;;  %v3840_v63 = vadd.f32 %v3839_v59, %v3785_v39  ;;  %v3870_v41 = vsel %vm3673_vm12, %v3770_v45, 0.0  ;;  %v3578_v47 = vld [vmem:[#allocation3 + $0x38] sm:$0xff] }
 0x270   : > { %3544 = vst.msk [vmem:[#allocation3 + $0x58] sm:$0xff] %vm2927_vm4, %v7753_v49  ;;  %v3589_v49 = vld [vmem:[#allocation3 + $0x90] sm:$0xff]  ;;  %v3872_v36 = vadd.f32 %v3871_v55, %v3870_v41  ;;  %v3776_v27 = vmul.f32 %v3578_v47, %v3578_v47  ;;  %v3679_v44 = vsel %vm3673_vm12, %v3578_v47, 0.0 }
 0x271   : > { %v3075_v48 = vpop.permute.xlu1 %3074  ;;  %v3787_v50 = vmul.f32 %v3589_v49, %v3589_v49  ;;  %v3644_v31 = vadd.f32 %v3643_v52, %v3589_v49 }
 0x272   : > { %3146 = vst.msk [vmem:[#allocation3 + $0x190] sm:$0xff] %vm3120_vm6, %v3075_v48  ;;  %v3259_v40 = vpop.permute.xlu0 %3258  ;;  %v3875_v46 = vsel %vm3673_vm12, %v3776_v27, 0.0  ;;  %v9004_v27 = vld [vmem:[#allocation10_spill] sm:$0xff] }
 0x273   : > { %3351 = vst.msk [vmem:[#allocation3 + $0x48] sm:$0xff] %vm3346_vm11, %v3259_v40  ;;  %v3841_v17 = vadd.f32 %v3840_v63, %v3787_v50  ;;  %v3576_v38 = vld [vmem:[#allocation3 + $0x28] sm:$0xff] }
 0x274   : > { %3543 = vst.msk [vmem:[#allocation3 + $0x48] sm:$0xff] %vm2927_vm4, %v7738_v34  ;;  %v3591_v34 = vld [vmem:[#allocation3 + $0xa0] sm:$0xff]  ;;  %v3774_v57 = vmul.f32 %v3576_v38, %v3576_v38 }
 0x275   : > { %v8334_v5 = vpop.permute.xlu1 %3495  ;;  %v3645_v7 = vadd.f32 %v3644_v31, %v3591_v34 }
 0x276   : > { %v3265_v58 = vpop.permute.xlu0 %3264  ;;  %v3873_v18 = vsel %vm3673_vm12, %v3774_v57, 0.0 }
 0x277   : > { %3354 = vst.msk [vmem:[#allocation3 + $0x78] sm:$0xff] %vm3346_vm11, %v3265_v58  ;;  %v3646_v29 = vadd.f32 %v3645_v7, %v3593_v6  ;;  %v3874_v33 = vadd.f32 %v3873_v18, %v3872_v36  ;;  %v3582_v2 = vld [vmem:[#allocation3 + $0x58] sm:$0xff]  ;;  %v3605_v36 = vld [vmem:[#allocation3 + $0x110] sm:$0xff] }
 0x278   : > { %3546 = vst.msk [vmem:[#allocation3 + $0x78] sm:$0xff] %vm2927_vm4, %v7780_v54  ;;  %v3789_v54 = vmul.f32 %v3591_v34, %v3591_v34  ;;  %v3780_v49 = vmul.f32 %v3582_v2, %v3582_v2  ;;  %v3601_v34 = vld [vmem:[#allocation3 + $0xf0] sm:$0xff]  ;;  %v3683_v31 = vsel %vm3673_vm12, %v3582_v2, 0.0 }
 0x279   : > { %v3079_v15 = vpop.permute.xlu1 %3078  ;;  %v3876_v39 = vadd.f32 %v3875_v46, %v3874_v33  ;;  %v9005_v33 = vld [vmem:[#allocation17_spill] sm:$0xff]  ;;  %v9006_v46 = vld [vmem:[#allocation11_spill] sm:$0xff] }
 0x27a   : > { %3148 = vst.msk [vmem:[#allocation3 + $0x1b0] sm:$0xff] %vm3120_vm6, %v3079_v15  ;;  %v3263_v1 = vpop.permute.xlu0 %3262  ;;  %v3842_v25 = vadd.f32 %v3841_v17, %v3789_v54  ;;  %v3879_v51 = vsel %vm3673_vm12, %v3780_v49, 0.0 }
 0x27b   : > { %3353 = vst.msk [vmem:[#allocation3 + $0x68] sm:$0xff] %vm3346_vm11, %v3263_v1  ;;  %v3580_v53 = vld [vmem:[#allocation3 + $0x48] sm:$0xff]  ;;  %v3797_v1 = vmul.f32 %v3599_v26, %v3599_v26 }
 0x27c   : > { %3545 = vst.msk [vmem:[#allocation3 + $0x68] sm:$0xff] %vm2927_vm4, %v7767_v61  ;;  %v3843_v12 = vadd.f32 %v3842_v25, %v3791_v42  ;;  %v3778_v56 = vmul.f32 %v3580_v53, %v3580_v53  ;;  %v3681_v14 = vsel %vm3673_vm12, %v3580_v53, 0.0 }
 0x27d   : > { %v8343_v10 = vpop.permute.xlu1 %3499 }
 0x27e   : > { %v3269_v23 = vpop.permute.xlu0 %3268  ;;  %v3844_v62 = vadd.f32 %v3843_v12, %v3793_v0  ;;  %v3877_v37 = vsel %vm3673_vm12, %v3778_v56, 0.0 }
 0x27f   : > { %3356 = vst.msk [vmem:[#allocation3 + $0x98] sm:$0xff] %vm3346_vm11, %v3269_v23  ;;  %v3878_v63 = vadd.f32 %v3877_v37, %v3876_v39  ;;  %v3586_v54 = vld [vmem:[#allocation3 + $0x78] sm:$0xff] }
 0x280   : > { %3548 = vst.msk [vmem:[#allocation3 + $0x98] sm:$0xff] %vm2927_vm4, %v7802_v20  ;;  %v3677_v20 = vsel %vm3673_vm12, %v3576_v38, 0.0  ;;  %v3845_v50 = vadd.f32 %v3844_v62, %v3795_v60  ;;  %v3784_v42 = vmul.f32 %v3586_v54, %v3586_v54  ;;  %v3803_v60 = vmul.f32 %v3605_v36, %v3605_v36 }
 0x281   : > { %v3083_v61 = vpop.permute.xlu1 %3082  ;;  %v3678_v30 = vadd.f32 %v3677_v20, %v3676_v28  ;;  %v3880_v13 = vadd.f32 %v3879_v51, %v3878_v63  ;;  %v3687_v20 = vsel %vm3673_vm12, %v3586_v54, 0.0 }
 0x282   : > { %3150 = vst.msk [vmem:[#allocation3 + $0x1d0] sm:$0xff] %vm3120_vm6, %v3083_v61  ;;  %v3267_v19 = vpop.permute.xlu0 %3266  ;;  %v3799_v61 = vmul.f32 %v3601_v34, %v3601_v34  ;;  %v3846_v35 = vadd.f32 %v3845_v50, %v3797_v1 }
 0x283   : > { %3355 = vst.msk [vmem:[#allocation3 + $0x88] sm:$0xff] %vm3346_vm11, %v3267_v19  ;;  %v3680_v48 = vadd.f32 %v3679_v44, %v3678_v30  ;;  %v3584_v40 = vld [vmem:[#allocation3 + $0x68] sm:$0xff]  ;;  %v3603_v19 = vld [vmem:[#allocation3 + $0x100] sm:$0xff]  ;;  %v3883_v30 = vsel %vm3673_vm12, %v3784_v42, 0.0 }
 0x284   : > { %3547 = vst.msk [vmem:[#allocation3 + $0x88] sm:$0xff] %vm2927_vm4, %v7793_v24  ;;  %v3647_v24 = vadd.f32 %v3646_v29, %v3595_v43  ;;  %v3782_v52 = vmul.f32 %v3584_v40, %v3584_v40  ;;  %v3685_v22 = vsel %vm3673_vm12, %v3584_v40, 0.0  ;;  %v9003_v43 = vld [vmem:[#allocation8_spill] sm:$0xff]  ;;  %v3801_v47 = vmul.f32 %v3603_v19, %v3603_v19 }
 0x285   : > { %v3682_v59 = vadd.f32 %v3681_v14, %v3680_v48  ;;  %v8373_v6 = vpop.permute.xlu1 %3503  ;;  %v3847_v53 = vadd.f32 %v3846_v35, %v3799_v61  ;;  %v3607_v48 = vld [vmem:[#allocation3 + $0x120] sm:$0xff] }
 0x286   : > { %v3273_v4 = vpop.permute.xlu0 %3272  ;;  %v3648_v58 = vadd.f32 %v3647_v24, %v3597_v32  ;;  %v3881_v45 = vsel %vm3673_vm12, %v3782_v52, 0.0 }
 0x287   : > { %3358 = vst.msk [vmem:[#allocation3 + $0xb8] sm:$0xff] %vm3346_vm11, %v3273_v4  ;;  %v3684_v17 = vadd.f32 %v3683_v31, %v3682_v59  ;;  %v3882_v41 = vadd.f32 %v3881_v45, %v3880_v13  ;;  %v3590_v18 = vld [vmem:[#allocation3 + $0x98] sm:$0xff]  ;;  %v3848_v62 = vadd.f32 %v3847_v53, %v3801_v47  ;;  %v3609_v31 = vld [vmem:[#allocation3 + $0x130] sm:$0xff] }
 0x288   : > { %3550 = vst.msk [vmem:[#allocation3 + $0xb8] sm:$0xff] %vm2927_vm4, %v9000_v3  ;;  %v3649_v23 = vadd.f32 %v3648_v58, %v3599_v26  ;;  %v3788_v44 = vmul.f32 %v3590_v18, %v3590_v18  ;;  %v3691_v40 = vsel %vm3673_vm12, %v3590_v18, 0.0  ;;  %v3807_v61 = vmul.f32 %v3609_v31, %v3609_v31 }
 0x289   : > { %v3686_v57 = vadd.f32 %v3685_v22, %v3684_v17  ;;  %v3884_v3 = vadd.f32 %v3883_v30, %v3882_v41  ;;  %v3849_v1 = vadd.f32 %v3848_v62, %v3803_v60 }
 0x28a   : > { %v3271_v16 = vpop.permute.xlu0 %3270  ;;  %v3650_v55 = vadd.f32 %v3649_v23, %v3601_v34  ;;  %v3887_v59 = vsel %vm3673_vm12, %v3788_v44, 0.0  ;;  %v9007_v23 = vld [vmem:[#allocation12_spill] sm:$0xff] }
 0x28b   : > { %3357 = vst.msk [vmem:[#allocation3 + $0xa8] sm:$0xff] %vm3346_vm11, %v3271_v16  ;;  %v3588_v38 = vld [vmem:[#allocation3 + $0x88] sm:$0xff]  ;;  %v3688_v4 = vadd.f32 %v3687_v20, %v3686_v57 }
 0x28c   : > { %3549 = vst.msk [vmem:[#allocation3 + $0xa8] sm:$0xff] %vm2927_vm4, %v9001_v9  ;;  %v3786_v25 = vmul.f32 %v3588_v38, %v3588_v38  ;;  %v3689_v29 = vsel %vm3673_vm12, %v3588_v38, 0.0  ;;  %v3651_v56 = vadd.f32 %v3650_v55, %v3603_v19  ;;  %v9008_v38 = vld [vmem:[#allocation18_spill] sm:$0xff]  ;;  %v3611_v19 = vld [vmem:[#allocation3 + $0x140] sm:$0xff] }
 0x28d   : > { %v3690_v24 = vadd.f32 %v3689_v29, %v3688_v4  ;;  %v3809_v53 = vmul.f32 %v3611_v19, %v3611_v19 }
 0x28e   : > { %v3277_v15 = vpop.permute.xlu0 %3276  ;;  %v3885_v32 = vsel %vm3673_vm12, %v3786_v25, 0.0  ;;  %v3652_v37 = vadd.f32 %v3651_v56, %v3605_v36  ;;  %v3613_v36 = vld [vmem:[#allocation3 + $0x150] sm:$0xff] }
 0x28f   : > { %3360 = vst.msk [vmem:[#allocation3 + $0xd8] sm:$0xff] %vm3346_vm11, %v3277_v15  ;;  %v3886_v2 = vadd.f32 %v3885_v32, %v3884_v3  ;;  %v3594_v9 = vld [vmem:[#allocation3 + $0xb8] sm:$0xff]  ;;  %v3692_v58 = vadd.f32 %v3691_v40, %v3690_v24  ;;  %v3805_v15 = vmul.f32 %v3607_v48, %v3607_v48 }
 0x290   : > { %3552 = vst.msk [vmem:[#allocation3 + $0xd8] sm:$0xff] %vm2927_vm4, %v9002_v21  ;;  %v3792_v22 = vmul.f32 %v3594_v9, %v3594_v9  ;;  %v3653_v54 = vadd.f32 %v3652_v37, %v3607_v48  ;;  %v3695_v51 = vsel %vm3673_vm12, %v3594_v9, 0.0 }
 0x291   : > { %v3888_v50 = vadd.f32 %v3887_v59, %v3886_v2  ;;  %v3850_v35 = vadd.f32 %v3849_v1, %v3805_v15  ;;  %v3811_v2 = vmul.f32 %v3613_v36, %v3613_v36 }
 0x292   : > { %v3275_v7 = vpop.permute.xlu0 %3274  ;;  %v3891_v42 = vsel %vm3673_vm12, %v3792_v22, 0.0  ;;  %v3654_v55 = vadd.f32 %v3653_v54, %v3609_v31 }
 0x293   : > { %3359 = vst.msk [vmem:[#allocation3 + $0xc8] sm:$0xff] %vm3346_vm11, %v3275_v7  ;;  %v3592_v0 = vld [vmem:[#allocation3 + $0xa8] sm:$0xff]  ;;  %v3851_v18 = vadd.f32 %v3850_v35, %v3807_v61 }
 0x294   : > { %3551 = vst.msk [vmem:[#allocation3 + $0xc8] sm:$0xff] %vm2927_vm4, %v9003_v43  ;;  %v3790_v14 = vmul.f32 %v3592_v0, %v3592_v0  ;;  %v3693_v26 = vsel %vm3673_vm12, %v3592_v0, 0.0  ;;  %v9009_v43 = vld [vmem:[#allocation13_spill] sm:$0xff]  ;;  %v3655_v56 = vadd.f32 %v3654_v55, %v3611_v19 }
 0x295   : > { %v3694_v63 = vadd.f32 %v3693_v26, %v3692_v58  ;;  %v3852_v62 = vadd.f32 %v3851_v18, %v3809_v53  ;;  %v3615_v26 = vld [vmem:[#allocation3 + $0x160] sm:$0xff]  ;;  %v9012_v58 = vld [vmem:[#allocation15_spill] sm:$0xff] }
 0x296   : > { %v3279_v28 = vpop.permute.xlu0 %3278  ;;  %v3889_v49 = vsel %vm3673_vm12, %v3790_v14, 0.0 }
 0x297   : > { %v3293_v12 = vpop.permute.xlu1 %3292  ;;  %3361 = vst.msk [vmem:[#allocation3 + $0xe8] sm:$0xff] %vm3346_vm11, %v3279_v28  ;;  %v3890_v17 = vadd.f32 %v3889_v49, %v3888_v50  ;;  %v3598_v13 = vld [vmem:[#allocation3 + $0xd8] sm:$0xff]  ;;  %v3696_v57 = vadd.f32 %v3695_v51, %v3694_v63  ;;  %v3617_v49 = vld [vmem:[#allocation3 + $0x170] sm:$0xff]  ;;  %v3853_v63 = vadd.f32 %v3852_v62, %v3811_v2 }
 0x298   : > { %3368 = vst.msk [vmem:[#allocation3 + $0x158] sm:$0xff] %vm3346_vm11, %v3293_v12  ;;  %v3796_v28 = vmul.f32 %v3598_v13, %v3598_v13  ;;  %v3699_v30 = vsel %vm3673_vm12, %v3598_v13, 0.0  ;;  %v9013_v51 = vld [vmem:[#allocation16_spill] sm:$0xff] }
 0x299   : > { %3553 = vst.msk [vmem:[#allocation3 + $0xe8] sm:$0xff] %vm2927_vm4, %v9004_v27  ;;  %3560 = vst.msk [vmem:[#allocation3 + $0x158] sm:$0xff] %vm2927_vm4, %v9005_v33  ;;  %v3892_v41 = vadd.f32 %v3891_v42, %v3890_v17  ;;  %v9010_v27 = vld [vmem:[#allocation14_spill] sm:$0xff]  ;;  %v9011_v33 = vld [vmem:[#allocation19_spill] sm:$0xff] }
 0x29a   : > { %v3281_v16 = vpop.permute.xlu0 %3280  ;;  %v3895_v44 = vsel %vm3673_vm12, %v3796_v28, 0.0  ;;  %v9014_v13 = vld [vmem:[#allocation20_spill] sm:$0xff]  ;;  %v3621_v28 = vld [vmem:[#allocation3 + $0x190] sm:$0xff] }
 0x29b   : > { %3362 = vst.msk [vmem:[#allocation3 + $0xf8] sm:$0xff] %vm3346_vm11, %v3281_v16  ;;  %v3596_v39 = vld [vmem:[#allocation3 + $0xc8] sm:$0xff] }
 0x29c   : > { %3554 = vst.msk [vmem:[#allocation3 + $0xf8] sm:$0xff] %vm2927_vm4, %v9006_v46  ;;  %v3794_v21 = vmul.f32 %v3596_v39, %v3596_v39  ;;  %v3697_v45 = vsel %vm3673_vm12, %v3596_v39, 0.0  ;;  %v3656_v39 = vadd.f32 %v3655_v56, %v3613_v36 }
 0x29d   : > { %v3698_v20 = vadd.f32 %v3697_v45, %v3696_v57 }
 0x29e   : > { %v3283_v52 = vpop.permute.xlu0 %3282  ;;  %v3893_v25 = vsel %vm3673_vm12, %v3794_v21, 0.0  ;;  %v3657_v45 = vadd.f32 %v3656_v39, %v3615_v26 }
 0x29f   : > { %v3297_v34 = vpop.permute.xlu1 %3296  ;;  %3363 = vst.msk [vmem:[#allocation3 + $0x108] sm:$0xff] %vm3346_vm11, %v3283_v52  ;;  %v3894_v4 = vadd.f32 %v3893_v25, %v3892_v41  ;;  %v3700_v3 = vadd.f32 %v3699_v30, %v3698_v20 }
 0x2a0   : > { %3370 = vst.msk [vmem:[#allocation3 + $0x178] sm:$0xff] %vm3346_vm11, %v3297_v34  ;;  %v3600_v29 = vld [vmem:[#allocation3 + $0xe8] sm:$0xff]  ;;  %v3813_v34 = vmul.f32 %v3615_v26, %v3615_v26  ;;  %v3658_v55 = vadd.f32 %v3657_v45, %v3617_v49 }
 0x2a1   : > { %3555 = vst.msk [vmem:[#allocation3 + $0x108] sm:$0xff] %vm2927_vm4, %v9007_v23  ;;  %3562 = vst.msk [vmem:[#allocation3 + $0x178] sm:$0xff] %vm2927_vm4, %v9008_v38  ;;  %v3798_v32 = vmul.f32 %v3600_v29, %v3600_v29  ;;  %v3701_v14 = vsel %vm3673_vm12, %v3600_v29, 0.0  ;;  %v3896_v48 = vadd.f32 %v3895_v44, %v3894_v4 }
 0x2a2   : > { %v3285_v7 = vpop.permute.xlu0 %3284  ;;  %v3702_v59 = vadd.f32 %v3701_v14, %v3700_v3  ;;  %v3854_v25 = vadd.f32 %v3853_v63, %v3813_v34  ;;  %v3819_v3 = vmul.f32 %v3621_v28, %v3621_v28 }
 0x2a3   : > { %3364 = vst.msk [vmem:[#allocation3 + $0x118] sm:$0xff] %vm3346_vm11, %v3285_v7  ;;  %v3602_v0 = vld [vmem:[#allocation3 + $0xf8] sm:$0xff]  ;;  %v3897_v46 = vsel %vm3673_vm12, %v3798_v32, 0.0  ;;  %v3815_v7 = vmul.f32 %v3617_v49, %v3617_v49 }
 0x2a4   : > { %3556 = vst.msk [vmem:[#allocation3 + $0x118] sm:$0xff] %vm2927_vm4, %v9009_v43  ;;  %v3800_v16 = vmul.f32 %v3602_v0, %v3602_v0  ;;  %v3703_v37 = vsel %vm3673_vm12, %v3602_v0, 0.0  ;;  %v3898_v31 = vadd.f32 %v3897_v46, %v3896_v48  ;;  %v3619_v43 = vld [vmem:[#allocation3 + $0x180] sm:$0xff]  ;;  %v3614_v0 = vld [vmem:[#allocation3 + $0x158] sm:$0xff] }
 0x2a5   : > { %v3704_v22 = vadd.f32 %v3703_v37, %v3702_v59  ;;  %v3855_v4 = vadd.f32 %v3854_v25, %v3815_v7  ;;  %v3817_v30 = vmul.f32 %v3619_v43, %v3619_v43  ;;  %v3659_v56 = vadd.f32 %v3658_v55, %v3619_v43  ;;  %v9015_v37 = vld [vmem:[#allocation21_spill] sm:$0xff] }
 0x2a6   : > { %v3287_v47 = vpop.permute.xlu0 %3286  ;;  %v3899_v52 = vsel %vm3673_vm12, %v3800_v16, 0.0  ;;  %v3623_v16 = vld [vmem:[#allocation3 + $0x1a0] sm:$0xff] }
 0x2a7   : > { %v3301_v12 = vpop.permute.xlu1 %3300  ;;  %3365 = vst.msk [vmem:[#allocation3 + $0x128] sm:$0xff] %vm3346_vm11, %v3287_v47  ;;  %v3900_v61 = vadd.f32 %v3899_v52, %v3898_v31  ;;  %v3856_v2 = vadd.f32 %v3855_v4, %v3817_v30  ;;  %v3660_v48 = vadd.f32 %v3659_v56, %v3621_v28  ;;  %v3821_v49 = vmul.f32 %v3623_v16, %v3623_v16  ;;  %v3627_v7 = vld [vmem:[#allocation3 + $0x1c0] sm:$0xff] }
 0x2a8   : > { %3372 = vst.msk [vmem:[#allocation3 + $0x198] sm:$0xff] %vm3346_vm11, %v3301_v12  ;;  %v3604_v24 = vld [vmem:[#allocation3 + $0x108] sm:$0xff] }
 0x2a9   : > { %3557 = vst.msk [vmem:[#allocation3 + $0x128] sm:$0xff] %vm2927_vm4, %v9010_v27  ;;  %3564 = vst.msk [vmem:[#allocation3 + $0x198] sm:$0xff] %vm2927_vm4, %v9011_v33  ;;  %v3802_v9 = vmul.f32 %v3604_v24, %v3604_v24  ;;  %v3705_v15 = vsel %vm3673_vm12, %v3604_v24, 0.0  ;;  %v3857_v52 = vadd.f32 %v3856_v2, %v3819_v3 }
 0x2aa   : > { %v3289_v60 = vpop.permute.xlu0 %3288  ;;  %v3706_v35 = vadd.f32 %v3705_v15, %v3704_v22  ;;  %v3661_v22 = vadd.f32 %v3660_v48, %v3623_v16 }
 0x2ab   : > { %v3606_v40 = vld [vmem:[#allocation3 + $0x118] sm:$0xff]  ;;  %3366 = vst.msk [vmem:[#allocation3 + $0x138] sm:$0xff] %vm3346_vm11, %v3289_v60  ;;  %v3901_v54 = vsel %vm3673_vm12, %v3802_v9, 0.0  ;;  %v3812_v60 = vmul.f32 %v3614_v0, %v3614_v0  ;;  %v3625_v9 = vld [vmem:[#allocation3 + $0x1b0] sm:$0xff] }
 0x2ac   : > { %3558 = vst.msk [vmem:[#allocation3 + $0x138] sm:$0xff] %vm2927_vm4, %v9012_v58  ;;  %v3804_v1 = vmul.f32 %v3606_v40, %v3606_v40  ;;  %v3707_v17 = vsel %vm3673_vm12, %v3606_v40, 0.0  ;;  %v3902_v41 = vadd.f32 %v3901_v54, %v3900_v61  ;;  %v3618_v40 = vld [vmem:[#allocation3 + $0x178] sm:$0xff]  ;;  %v3715_v58 = vsel %vm3673_vm12, %v3614_v0, 0.0 }
 0x2ad   : > { %v3708_v20 = vadd.f32 %v3707_v17, %v3706_v35  ;;  %v3816_v63 = vmul.f32 %v3618_v40, %v3618_v40  ;;  %v3858_v61 = vadd.f32 %v3857_v52, %v3821_v49  ;;  %v3662_v35 = vadd.f32 %v3661_v22, %v3625_v9 }
 0x2ae   : > { %v3291_v50 = vpop.permute.xlu0 %3290  ;;  %v3903_v57 = vsel %vm3673_vm12, %v3804_v1, 0.0 }
 0x2af   : > { %v3305_v23 = vpop.permute.xlu1 %3304  ;;  %3367 = vst.msk [vmem:[#allocation3 + $0x148] sm:$0xff] %vm3346_vm11, %v3291_v50  ;;  %v3904_v12 = vadd.f32 %v3903_v57, %v3902_v41  ;;  %v3915_v25 = vsel %vm3673_vm12, %v3816_v63, 0.0 }
 0x2b0   : > { %v3608_v21 = vld [vmem:[#allocation3 + $0x128] sm:$0xff]  ;;  %3374 = vst.msk [vmem:[#allocation3 + $0x1b8] sm:$0xff] %vm3346_vm11, %v3305_v23  ;;  %v3622_v23 = vld [vmem:[#allocation3 + $0x198] sm:$0xff] }
 0x2b1   : > { %v3806_v38 = vmul.f32 %v3608_v21, %v3608_v21  ;;  %3559 = vst.msk [vmem:[#allocation3 + $0x148] sm:$0xff] %vm2927_vm4, %v9013_v51  ;;  %3566 = vst.msk [vmem:[#allocation3 + $0x1b8] sm:$0xff] %vm2927_vm4, %v9014_v13  ;;  %v3709_v19 = vsel %vm3673_vm12, %v3608_v21, 0.0  ;;  %v3823_v21 = vmul.f32 %v3625_v9, %v3625_v9  ;;  %v3820_v43 = vmul.f32 %v3622_v23, %v3622_v23 }
 0x2b2   : > { %v3295_v42 = vpop.permute.xlu0 %3294  ;;  %v3710_v36 = vadd.f32 %v3709_v19, %v3708_v20 }
 0x2b3   : > { %v3610_v29 = vld [vmem:[#allocation3 + $0x138] sm:$0xff]  ;;  %3369 = vst.msk [vmem:[#allocation3 + $0x168] sm:$0xff] %vm3346_vm11, %v3295_v42  ;;  %v3905_v47 = vsel %vm3673_vm12, %v3806_v38, 0.0  ;;  %v3719_v38 = vsel %vm3673_vm12, %v3618_v40, 0.0  ;;  %v3859_v20 = vadd.f32 %v3858_v61, %v3823_v21 }
 0x2b4   : > { %v3711_v53 = vsel %vm3673_vm12, %v3610_v29, 0.0  ;;  %v3808_v18 = vmul.f32 %v3610_v29, %v3610_v29  ;;  %3561 = vst.msk [vmem:[#allocation3 + $0x168] sm:$0xff] %vm2927_vm4, %v8316_v8  ;;  %v3906_v24 = vadd.f32 %v3905_v47, %v3904_v12  ;;  %v3663_v12 = vadd.f32 %v3662_v35, %v3627_v7 }
 0x2b5   : > { %v3712_v33 = vadd.f32 %v3711_v53, %v3710_v36  ;;  %v3825_v53 = vmul.f32 %v3627_v7, %v3627_v7 }
 0x2b6   : > { %v3907_v32 = vsel %vm3673_vm12, %v3808_v18, 0.0  ;;  %v3299_v27 = vpop.permute.xlu0 %3298  ;;  %v3723_v18 = vsel %vm3673_vm12, %v3622_v23, 0.0 }
 0x2b7   : > { %v3309_v14 = vpop.permute.xlu1 %3308  ;;  %3371 = vst.msk [vmem:[#allocation3 + $0x188] sm:$0xff] %vm3346_vm11, %v3299_v27  ;;  %v3908_v26 = vadd.f32 %v3907_v32, %v3906_v24 }
 0x2b8   : > { %v3612_v44 = vld [vmem:[#allocation3 + $0x148] sm:$0xff]  ;;  %3376 = vst.msk [vmem:[#allocation3 + $0x1d8] sm:$0xff] %vm3346_vm11, %v3309_v14  ;;  %v3626_v29 = vld [vmem:[#allocation3 + $0x1b8] sm:$0xff]  ;;  %v3860_v14 = vadd.f32 %v3859_v20, %v3825_v53  ;;  %v5518_v53 = vmov 1966171168  }
 0x2b9   : > { %v3713_v8 = vsel %vm3673_vm12, %v3612_v44, 0.0  ;;  %v3810_v62 = vmul.f32 %v3612_v44, %v3612_v44  ;;  %3563 = vst.msk [vmem:[#allocation3 + $0x188] sm:$0xff] %vm2927_vm4, %v8325_v11  ;;  %3568 = vst.msk [vmem:[#allocation3 + $0x1d8] sm:$0xff] %vm2927_vm4, %v9015_v37  ;;  %v3911_v11 = vsel %vm3673_vm12, %v3812_v60, 0.0  ;;  %v3824_v3 = vmul.f32 %v3626_v29, %v3626_v29 }
 0x2ba   : > { %v3714_v46 = vadd.f32 %v3713_v8, %v3712_v33  ;;  %v3303_v59 = vpop.permute.xlu0 %3302  ;;  %v3631_v8 = vld [vmem:[#allocation3 + $0x1e0] sm:$0xff]  ;;  %v3727_v2 = vsel %vm3673_vm12, %v3626_v29, 0.0 }
 0x2bb   : > { %v3909_v39 = vsel %vm3673_vm12, %v3810_v62, 0.0  ;;  %v3616_v50 = vld [vmem:[#allocation3 + $0x168] sm:$0xff]  ;;  %3373 = vst.msk [vmem:[#allocation3 + $0x1a8] sm:$0xff] %vm3346_vm11, %v3303_v59  ;;  %v3829_v49 = vmul.f32 %v3631_v8, %v3631_v8 }
 0x2bc   : > { %v3910_v15 = vadd.f32 %v3909_v39, %v3908_v26  ;;  %v3716_v1 = vadd.f32 %v3715_v58, %v3714_v46  ;;  %v3717_v34 = vsel %vm3673_vm12, %v3616_v50, 0.0  ;;  %v3814_v31 = vmul.f32 %v3616_v50, %v3616_v50  ;;  %3565 = vst.msk [vmem:[#allocation3 + $0x1a8] sm:$0xff] %vm2927_vm4, %v8334_v5  ;;  %v3629_v5 = vld [vmem:[#allocation3 + $0x1d0] sm:$0xff] }
 0x2bd   : > { %v3827_v36 = vmul.f32 %v3629_v5, %v3629_v5  ;;  %v3664_v62 = vadd.f32 %v3663_v12, %v3629_v5  ;;  %v3923_v39 = vsel %vm3673_vm12, %v3824_v3, 0.0 }
 0x2be   : > { %v3912_v54 = vadd.f32 %v3911_v11, %v3910_v15  ;;  %v3718_v17 = vadd.f32 %v3717_v34, %v3716_v1  ;;  %v3913_v51 = vsel %vm3673_vm12, %v3814_v31, 0.0  ;;  %v3307_v45 = vpop.permute.xlu0 %3306 }
 0x2bf   : > { %v3313_v42 = vpop.permute.xlu1 %3312  ;;  %3375 = vst.msk [vmem:[#allocation3 + $0x1c8] sm:$0xff] %vm3346_vm11, %v3307_v45  ;;  %v3861_v26 = vadd.f32 %v3860_v14, %v3827_v36  ;;  %v3665_v11 = vadd.f32 %v3664_v62, %v3631_v8 }
 0x2c0   : > { %v3914_v13 = vadd.f32 %v3913_v51, %v3912_v54  ;;  %v3720_v57 = vadd.f32 %v3719_v38, %v3718_v17  ;;  %v3620_v19 = vld [vmem:[#allocation3 + $0x188] sm:$0xff]  ;;  %3378 = vst.msk [vmem:[#allocation3 + $0x1f8] sm:$0xff] %vm3346_vm11, %v3313_v42  ;;  %v3630_v24 = vld [vmem:[#allocation3 + $0x1d8] sm:$0xff] }
 0x2c1   : > { %v3721_v55 = vsel %vm3673_vm12, %v3620_v19, 0.0  ;;  %v3818_v41 = vmul.f32 %v3620_v19, %v3620_v19  ;;  %3567 = vst.msk [vmem:[#allocation3 + $0x1c8] sm:$0xff] %vm2927_vm4, %v8343_v10  ;;  %v3919_v10 = vsel %vm3673_vm12, %v3820_v43, 0.0  ;;  %v3828_v46 = vmul.f32 %v3630_v24, %v3630_v24 }
 0x2c2   : > { %v3916_v28 = vadd.f32 %v3915_v25, %v3914_v13  ;;  %v3722_v47 = vadd.f32 %v3721_v55, %v3720_v57  ;;  %v3311_v0 = vpop.permute.xlu0 %3310  ;;  %v3731_v1 = vsel %vm3673_vm12, %v3630_v24, 0.0  ;;  %v3862_v31 = vadd.f32 %v3861_v26, %v3829_v49 }
 0x2c3   : > { %v3917_v4 = vsel %vm3673_vm12, %v3818_v41, 0.0  ;;  %v3624_v27 = vld [vmem:[#allocation3 + $0x1a8] sm:$0xff]  ;;  %v3087_v56 = vpop.permute.xlu1 %3086  ;;  %3377 = vst.msk [vmem:[#allocation3 + $0x1e8] sm:$0xff] %vm3346_vm11, %v3311_v0  ;;  %v3927_v63 = vsel %vm3673_vm12, %v3828_v46, 0.0 }
 0x2c4   : > { %v3918_v30 = vadd.f32 %v3917_v4, %v3916_v28  ;;  %v3724_v32 = vadd.f32 %v3723_v18, %v3722_v47  ;;  %v3725_v33 = vsel %vm3673_vm12, %v3624_v27, 0.0  ;;  %v3822_v44 = vmul.f32 %v3624_v27, %v3624_v27  ;;  %3152 = vst.msk [vmem:[#allocation3 + $0x1f0] sm:$0xff] %vm3120_vm6, %v3087_v56 }
 0x2c5   : > { %3569 = vst.msk [vmem:[#allocation3 + $0x1e8] sm:$0xff] %vm2927_vm4, %v8373_v6  ;;  %v3747_v18 = vunpack.c.l.s4 %v5518_v53 }
 0x2c6   : > { %v3920_v16 = vadd.f32 %v3919_v10, %v3918_v30  ;;  %v3726_v60 = vadd.f32 %v3725_v33, %v3724_v32  ;;  %v3921_v48 = vsel %vm3673_vm12, %v3822_v44, 0.0  ;;  %v3506_v40 = vpop.permute.xlu0 %3505 }
 0x2c7   : > { %3570 = vst.msk [vmem:[#allocation3 + $0x1f8] sm:$0xff] %vm2927_vm4, %v3506_v40  ;;  %v3748_v10 = vunpack.c.0.s8 %v3747_v18 }
 0x2c8   : > { %v3922_v37 = vadd.f32 %v3921_v48, %v3920_v16  ;;  %v3728_v9 = vadd.f32 %v3727_v2, %v3726_v60  ;;  %v3628_v58 = vld [vmem:[#allocation3 + $0x1c8] sm:$0xff] }
 0x2c9   : > { %v3729_v6 = vsel %vm3673_vm12, %v3628_v58, 0.0  ;;  %v3826_v59 = vmul.f32 %v3628_v58, %v3628_v58  ;;  %v9016_v60 = vld [vmem:[#allocation5_spill] sm:$0xff] }
 0x2ca   : > { %v3924_v52 = vadd.f32 %v3923_v39, %v3922_v37  ;;  %v3730_v15 = vadd.f32 %v3729_v6, %v3728_v9  ;;  %v3751_v8 = vsub.s32 %v3748_v10, %v9016_v60  ;;  %v3635_v9 = vld [vmem:[#allocation4] ss:$2 sm:$0x3]  ;;  %v9017_v6 = vlaneseq }
 0x2cb   : > { %v3925_v50 = vsel %vm3673_vm12, %v3826_v59, 0.0  ;;  %v3633_v22 = vld [vmem:[#allocation3 + $0x1f0] sm:$0xff]  ;;  %v3768_v59 = vld [vmem:[#allocation4 + $0x1] ss:$2 sm:$0x3] }
 0x2cc   : > { %v3926_v34 = vadd.f32 %v3925_v50, %v3924_v52  ;;  %v3632_v21 = vld [vmem:[#allocation3 + $0x1e8] sm:$0xff]  ;;  %v3732_v23 = vadd.f32 %v3731_v1, %v3730_v15  ;;  %v3666_v54 = vadd.f32 %v3665_v11, %v3633_v22  ;;  %v3831_v17 = vmul.f32 %v3633_v22, %v3633_v22 }
 0x2cd   : > { %v3733_v38 = vsel %vm3673_vm12, %v3632_v21, 0.0  ;;  %v3830_v51 = vmul.f32 %v3632_v21, %v3632_v21  ;;  %vm3764_vm13 = vcmp.lt.s32.totalorder %v9017_v6, 224 }
 0x2ce   : > { %v3734_v45 = vadd.f32 %v3733_v38, %v3732_v23  ;;  %v3928_v7 = vadd.f32 %v3927_v63, %v3926_v34  ;;  %v3667_v61 = vrot.slane %v3666_v54, 4  ;;  %v3863_v35 = vadd.f32 %v3862_v31, %v3831_v17  ;;  %v3634_v57 = vld [vmem:[#allocation3 + $0x1f8] sm:$0xff] }
 0x2cf   : > { %v3929_v13 = vsel %vm3673_vm12, %v3830_v51, 0.0  ;;  %v3735_v42 = vsel %vm3673_vm12, %v3634_v57, 0.0  ;;  %v3832_v5 = vmul.f32 %v3634_v57, %v3634_v57 }
 0x2d0   : > { %v3930_v19 = vadd.f32 %v3929_v13, %v3928_v7  ;;  %v3668_v25 = vadd.f32 %v3667_v61, %v3666_v54  ;;  %v3864_v43 = vrot.slane %v3863_v35, 4  ;;  %v3736_v55 = vadd.f32 %v3735_v42, %v3734_v45 }
 0x2d1   : > { %v3931_v41 = vsel %vm3673_vm12, %v3832_v5, 0.0 }
 0x2d2   : > { %v3669_v20 = vrot.slane %v3668_v25, 2  ;;  %v3865_v29 = vadd.f32 %v3864_v43, %v3863_v35  ;;  %v3737_v28 = vrot.slane %v3736_v55, 4  ;;  %v3932_v47 = vadd.f32 %v3931_v41, %v3930_v19 }
 0x2d4   : > { %v3670_v4 = vadd.f32 %v3669_v20, %v3668_v25  ;;  %v3866_v0 = vrot.slane %v3865_v29, 2  ;;  %v3738_v12 = vadd.f32 %v3737_v28, %v3736_v55  ;;  %v3933_v36 = vrot.slane %v3932_v47, 4 }
 0x2d6   : > { %v3867_v30 = vadd.f32 %v3866_v0, %v3865_v29  ;;  %v3739_v32 = vrot.slane %v3738_v12, 2  ;;  %v3934_v27 = vadd.f32 %v3933_v36, %v3932_v47  ;;  %v3671_v56 = vrot.slane %v3670_v4, 1 }
 0x2d8   : > { %v3740_v3 = vadd.f32 %v3739_v32, %v3738_v12  ;;  %v3935_v24 = vrot.slane %v3934_v27, 2  ;;  %v3868_v33 = vrot.slane %v3867_v30, 1  ;;  %v3672_v16 = vadd.f32 %v3671_v56, %v3670_v4 }
 0x2da   : > { %v3741_v44 = vrot.slane %v3740_v3, 1  ;;  %v3936_v14 = vadd.f32 %v3935_v24, %v3934_v27  ;;  %v3869_v48 = vadd.f32 %v3868_v33, %v3867_v30 }
 0x2dc   : > { %v3742_v62 = vadd.f32 %v3741_v44, %v3740_v3  ;;  %v3937_v2 = vrot.slane %v3936_v14, 1 }
 0x2de   : > { %v3745_v40 = vcombine.low %v3672_v16, %v3742_v62  ;;  %v3938_v26 = vadd.f32 %v3937_v2, %v3936_v14 }
 0x2e0   : > { %v3752_v46 = vrot.slane %v3745_v40, %v3751_v8  ;;  %v3941_v37 = vcombine.low %v3869_v48, %v3938_v26 }
 0x2e2   : > { %v3759_v58 = vrot.slane %v3752_v46, %v3751_v8  ;;  %v3948_v39 = vrot.slane %v3941_v37, %v3751_v8 }
 0x2e4   : > { %v3761_v49 = vadd.f32 %v3759_v58, %v3635_v9  ;;  %v3955_v52 = vrot.slane %v3948_v39, %v3751_v8 }
 0x2e6   : > { %3766 = vst.msk [vmem:[#allocation4] ss:$2 sm:$0x3] %vm3764_vm13, %v3761_v49  ;;  %v3957_v15 = vadd.f32 %v3955_v52, %v3768_v59 }
 0x2e8   : > { %3958 = vst.msk [vmem:[#allocation4 + $0x1] ss:$2 sm:$0x3] %vm3764_vm13, %v3957_v15 }
 0x2e9 PF: > { %p4706_p5 = scmp.ne.s32.totalorder %s5503_s30, 1 }
 0x2ea   : > { %v3979_v23 = vlaneseq (!%p4706_p5)  ;;  %v3975_v54 = vld [vmem:[%s8869_s7] sm:$0x3] (!%p4706_p5)  ;;  %v3994_v19 = vld [vmem:[#allocation3 + $0x8] sm:$0xff] (!%p4706_p5)  ;;  %v3995_v42 = vld [vmem:[#allocation3 + $0x10] sm:$0xff] (!%p4706_p5)  ;;  %vm4211_vm15 = vcmask (!%p4706_p5), 785408  }
 0x2eb   : > { %3962 = sbr.rel (%p4706_p5) target bundleno = 826 (0x33a), region = 68  ;;  %v3984_v51 = vld [vmem:[%s8870_s8] sm:$0x3] (!%p4706_p5)  ;;  %v3996_v25 = vld [vmem:[#allocation3 + $0x18] sm:$0xff] (!%p4706_p5)  ;;  %v3998_v20 = vld [vmem:[#allocation3 + $0x28] sm:$0xff] (!%p4706_p5) }
 0x2ec   : > { %vm3981_vm14 = vcmp.lt.s32.totalorder (!%p4706_p5), %v3979_v23, 224  ;;  %v4060_v7 = vshrl.u32 (!%p4706_p5), %v3979_v23, 7  ;;  %v3993_v57 = vld [vmem:[#allocation3] sm:$0xff] (!%p4706_p5)  ;;  %v3999_v29 = vld [vmem:[#allocation3 + $0x30] sm:$0xff] (!%p4706_p5)  ;;  %v4000_v28 = vld [vmem:[#allocation3 + $0x38] sm:$0xff] (!%p4706_p5) }
 0x2ed   : > { %v3967_v1 = vld [vmem:[#allocation4] ss:$2 sm:$0x3] (!%p4706_p5)  ;;  %v4002_v53 = vld [vmem:[#allocation3 + $0x48] sm:$0xff] (!%p4706_p5)  ;;  %v4003_v18 = vld [vmem:[#allocation3 + $0x50] sm:$0xff] (!%p4706_p5) }
 0x2ee   : > { %v3968_v11 = vmul.f32 (!%p4706_p5), 0.00390625, %v3967_v1  ;;  %v4061_v35 = vsub.s32 (!%p4706_p5), 0, %v4060_v7  ;;  %v4065_v13 = vsub.s32 (!%p4706_p5), 1, %v4060_v7  ;;  %v3997_v43 = vld [vmem:[#allocation3 + $0x20] sm:$0xff] (!%p4706_p5)  ;;  %v4004_v30 = vld [vmem:[#allocation3 + $0x58] sm:$0xff] (!%p4706_p5)  ;;  %v4006_v27 = vld [vmem:[#allocation3 + $0x68] sm:$0xff] (!%p4706_p5) }
 0x2ef   : > { %v3970_v50 = vld [vmem:[#allocation4 + $0x1] ss:$2 sm:$0x3] (!%p4706_p5)  ;;  %v4007_v9 = vld [vmem:[#allocation3 + $0x70] sm:$0xff] (!%p4706_p5)  ;;  %v4008_v58 = vld [vmem:[#allocation3 + $0x78] sm:$0xff] (!%p4706_p5) }
 0x2f0   : > { %v3971_v63 = vmul.f32 (!%p4706_p5), 0.00390625, %v3970_v50  ;;  %v3972_v34 = vmul.f32 (!%p4706_p5), %v3968_v11, %v3968_v11  ;;  %v4001_v47 = vld [vmem:[#allocation3 + $0x40] sm:$0xff] (!%p4706_p5)  ;;  %v4010_v15 = vld [vmem:[#allocation3 + $0x88] sm:$0xff] (!%p4706_p5)  ;;  %v4011_v1 = vld [vmem:[#allocation3 + $0x90] sm:$0xff] (!%p4706_p5) }
 0x2f1   : > { %v4005_v32 = vld [vmem:[#allocation3 + $0x60] sm:$0xff] (!%p4706_p5)  ;;  %v4012_v50 = vld [vmem:[#allocation3 + $0x98] sm:$0xff] (!%p4706_p5) }
 0x2f2   : > { %v3973_v31 = vsub.f32 %v3971_v63, %v3972_v34  ;;  %v4009_v39 = vld [vmem:[#allocation3 + $0x80] sm:$0xff] }
 0x2f4   : > { %v3974_v22 = vmax.f32 %v3973_v31, 0.0 }
 0x2f6   : > { %v3976_v21 = vadd.f32 1e-05, %v3974_v22  ;;  %v4013_v22 = vld [vmem:[#allocation3 + $0xa0] sm:$0xff] }
 0x2f8   : > { %5487 = vrsqrt.f32 %v3976_v21  ;;  %v4014_v21 = vld [vmem:[#allocation3 + $0xa8] sm:$0xff] }
 0x302   : > { %v5488_v17 = vpop.eup %5487 }
 0x303   : > { %v3978_v38 = vmul.f32 %v5488_v17, %v3975_v54 }
 0x305   : > { %3983 = vst.msk [vmem:[#allocation4] ss:$2 sm:$0x3] %vm3981_vm14, %v3978_v38  ;;  %v3985_v45 = vmul.f32 %v3978_v38, %v3968_v11 }
 0x307   : > { %v3986_v61 = vsub.f32 %v3984_v51, %v3985_v45 }
 0x309   : > { %3987 = vst.msk [vmem:[#allocation4 + $0x1] ss:$2 sm:$0x3] %vm3981_vm14, %v3986_v61 }
 0x30c   : > { %v4057_v5 = vld [vmem:[#allocation4] ss:$2 sm:$0x3] }
 0x30d   : > { %v8493_v55 = vrot.slane %v4057_v5, %v4061_v35  ;;  %v8495_v41 = vrot.slane %v4057_v5, %v4065_v13 }
 0x30f   : > { %v4069_v4 = vmul.f32 %v8493_v55, %v3993_v57  ;;  %v4070_v0 = vmul.f32 %v8495_v41, %v3994_v19  ;;  %v4071_v12 = vmul.f32 %v8493_v55, %v3995_v42  ;;  %v4072_v36 = vmul.f32 %v8495_v41, %v3996_v25  ;;  %v4017_v57 = vld [vmem:[#allocation3 + $0xc0] sm:$0xff] }
 0x310   : > { %v4134_v56 = vld [vmem:[#allocation4 + $0x1] ss:$2 sm:$0x3]  ;;  %v4073_v10 = vmul.f32 %v8493_v55, %v3997_v43  ;;  %v4074_v3 = vmul.f32 %v8495_v41, %v3998_v20  ;;  %v4075_v24 = vmul.f32 %v8493_v55, %v3999_v29  ;;  %v4076_v33 = vmul.f32 %v8495_v41, %v4000_v28  ;;  %v4018_v43 = vld [vmem:[#allocation3 + $0xc8] sm:$0xff]  ;;  %v4019_v20 = vld [vmem:[#allocation3 + $0xd0] sm:$0xff] }
 0x311   : > { %v8505_v44 = vrot.slane %v4134_v56, %v4061_v35  ;;  %v8507_v14 = vrot.slane %v4134_v56, %v4065_v13  ;;  %v4077_v16 = vmul.f32 %v8493_v55, %v4001_v47  ;;  %v4078_v60 = vmul.f32 %v8495_v41, %v4002_v53  ;;  %v4015_v35 = vld [vmem:[#allocation3 + $0xb0] sm:$0xff]  ;;  %v4016_v13 = vld [vmem:[#allocation3 + $0xb8] sm:$0xff] }
 0x312   : > { %v4079_v8 = vmul.f32 %v8493_v55, %v4003_v18  ;;  %v4080_v62 = vmul.f32 %v8495_v41, %v4004_v30  ;;  %v4081_v2 = vmul.f32 %v8493_v55, %v4005_v32  ;;  %v4082_v48 = vmul.f32 %v8495_v41, %v4006_v27  ;;  %v4020_v29 = vld [vmem:[#allocation3 + $0xd8] sm:$0xff] }
 0x313   : > { %v4146_v40 = vadd.f32 %v8505_v44, %v4069_v4  ;;  %v4147_v26 = vadd.f32 %v8507_v14, %v4070_v0  ;;  %v4148_v46 = vadd.f32 %v8505_v44, %v4071_v12  ;;  %v4149_v37 = vadd.f32 %v8507_v14, %v4072_v36  ;;  %v4021_v4 = vld [vmem:[#allocation3 + $0xe0] sm:$0xff]  ;;  %v4022_v0 = vld [vmem:[#allocation3 + $0xe8] sm:$0xff] }
 0x314   : > { %v4150_v6 = vadd.f32 %v8505_v44, %v4073_v10  ;;  %v4151_v59 = vadd.f32 %v8507_v14, %v4074_v3  ;;  %v4152_v49 = vadd.f32 %v8505_v44, %v4075_v24  ;;  %v4153_v52 = vadd.f32 %v8507_v14, %v4076_v33  ;;  %v4023_v24 = vld [vmem:[#allocation3 + $0xf0] sm:$0xff]  ;;  %v4024_v33 = vld [vmem:[#allocation3 + $0xf8] sm:$0xff] }
 0x315   : > { %4210 = vst [vmem:[%s8871_s9] sm:$0xff] %v4146_v40  ;;  %4212 = vst.msk [vmem:[%s8871_s9 + $0x8] sm:$0xff] %vm4211_vm15, %v4147_v26  ;;  %v4154_v11 = vadd.f32 %v8505_v44, %v4077_v16  ;;  %v4155_v63 = vadd.f32 %v8507_v14, %v4078_v60  ;;  %v4156_v34 = vadd.f32 %v8505_v44, %v4079_v8  ;;  %v4025_v16 = vld [vmem:[#allocation3 + $0x100] sm:$0xff]  ;;  %v4027_v40 = vld [vmem:[#allocation3 + $0x110] sm:$0xff] }
 0x316   : > { %4213 = vst [vmem:[%s8871_s9 + $0x10] sm:$0xff] %v4148_v46  ;;  %4214 = vst.msk [vmem:[%s8871_s9 + $0x18] sm:$0xff] %vm4211_vm15, %v4149_v37  ;;  %v4157_v31 = vadd.f32 %v8507_v14, %v4080_v62  ;;  %v4158_v23 = vadd.f32 %v8505_v44, %v4081_v2  ;;  %v4159_v54 = vadd.f32 %v8507_v14, %v4082_v48  ;;  %v4026_v48 = vld [vmem:[#allocation3 + $0x108] sm:$0xff]  ;;  %v4028_v26 = vld [vmem:[#allocation3 + $0x118] sm:$0xff] }
 0x317   : > { %4215 = vst [vmem:[%s8871_s9 + $0x20] sm:$0xff] %v4150_v6  ;;  %4216 = vst.msk [vmem:[%s8871_s9 + $0x28] sm:$0xff] %vm4211_vm15, %v4151_v59  ;;  %v4083_v17 = vmul.f32 %v8493_v55, %v4007_v9  ;;  %v4084_v38 = vmul.f32 %v8495_v41, %v4008_v58  ;;  %v4085_v51 = vmul.f32 %v8493_v55, %v4009_v39  ;;  %v4029_v39 = vld [vmem:[#allocation3 + $0x120] sm:$0xff]  ;;  %v4030_v6 = vld [vmem:[#allocation3 + $0x128] sm:$0xff] }
 0x318   : > { %4217 = vst [vmem:[%s8871_s9 + $0x30] sm:$0xff] %v4152_v49  ;;  %4218 = vst.msk [vmem:[%s8871_s9 + $0x38] sm:$0xff] %vm4211_vm15, %v4153_v52  ;;  %v4086_v45 = vmul.f32 %v8495_v41, %v4010_v15  ;;  %v4087_v7 = vmul.f32 %v8493_v55, %v4011_v1  ;;  %v4088_v61 = vmul.f32 %v8495_v41, %v4012_v50 }
 0x319   : > { %4219 = vst [vmem:[%s8871_s9 + $0x40] sm:$0xff] %v4154_v11  ;;  %4220 = vst.msk [vmem:[%s8871_s9 + $0x48] sm:$0xff] %vm4211_vm15, %v4155_v63  ;;  %v4160_v19 = vadd.f32 %v8505_v44, %v4083_v17  ;;  %v4161_v42 = vadd.f32 %v8507_v14, %v4084_v38  ;;  %v4089_v5 = vmul.f32 %v8493_v55, %v4013_v22  ;;  %v4033_v22 = vld [vmem:[#allocation3 + $0x140] sm:$0xff]  ;;  %v4034_v38 = vld [vmem:[#allocation3 + $0x148] sm:$0xff] }
 0x31a   : > { %4221 = vst [vmem:[%s8871_s9 + $0x50] sm:$0xff] %v4156_v34  ;;  %4222 = vst.msk [vmem:[%s8871_s9 + $0x58] sm:$0xff] %vm4211_vm15, %v4157_v31  ;;  %v4090_v25 = vmul.f32 %v8495_v41, %v4014_v21  ;;  %v4162_v28 = vadd.f32 %v8505_v44, %v4085_v51  ;;  %v4163_v47 = vadd.f32 %v8507_v14, %v4086_v45  ;;  %v4031_v34 = vld [vmem:[#allocation3 + $0x130] sm:$0xff]  ;;  %v4032_v31 = vld [vmem:[#allocation3 + $0x138] sm:$0xff] }
 0x31b   : > { %4223 = vst [vmem:[%s8871_s9 + $0x60] sm:$0xff] %v4158_v23  ;;  %4224 = vst.msk [vmem:[%s8871_s9 + $0x68] sm:$0xff] %vm4211_vm15, %v4159_v54  ;;  %v4164_v53 = vadd.f32 %v8505_v44, %v4087_v7  ;;  %v4165_v18 = vadd.f32 %v8507_v14, %v4088_v61  ;;  %v4166_v12 = vadd.f32 %v8505_v44, %v4089_v5  ;;  %v4035_v51 = vld [vmem:[#allocation3 + $0x150] sm:$0xff]  ;;  %v4036_v45 = vld [vmem:[#allocation3 + $0x158] sm:$0xff] }
 0x31c   : > { %4225 = vst [vmem:[%s8871_s9 + $0x70] sm:$0xff] %v4160_v19  ;;  %4226 = vst.msk [vmem:[%s8871_s9 + $0x78] sm:$0xff] %vm4211_vm15, %v4161_v42  ;;  %v4167_v36 = vadd.f32 %v8507_v14, %v4090_v25  ;;  %v4091_v30 = vmul.f32 %v8493_v55, %v4015_v35  ;;  %v4092_v32 = vmul.f32 %v8495_v41, %v4016_v13  ;;  %v4038_v19 = vld [vmem:[#allocation3 + $0x168] sm:$0xff] }
 0x31d   : > { %4227 = vst [vmem:[%s8871_s9 + $0x80] sm:$0xff] %v4162_v28  ;;  %4228 = vst.msk [vmem:[%s8871_s9 + $0x88] sm:$0xff] %vm4211_vm15, %v4163_v47  ;;  %v4093_v27 = vmul.f32 %v8493_v55, %v4017_v57  ;;  %v4094_v56 = vmul.f32 %v8495_v41, %v4018_v43  ;;  %v4095_v10 = vmul.f32 %v8493_v55, %v4019_v20  ;;  %v4037_v57 = vld [vmem:[#allocation3 + $0x160] sm:$0xff] }
 0x31e   : > { %4229 = vst [vmem:[%s8871_s9 + $0x90] sm:$0xff] %v4164_v53  ;;  %4230 = vst.msk [vmem:[%s8871_s9 + $0x98] sm:$0xff] %vm4211_vm15, %v4165_v18  ;;  %v4096_v3 = vmul.f32 %v8495_v41, %v4020_v29  ;;  %v4168_v60 = vadd.f32 %v8505_v44, %v4091_v30  ;;  %v4169_v8 = vadd.f32 %v8507_v14, %v4092_v32  ;;  %v4039_v53 = vld [vmem:[#allocation3 + $0x170] sm:$0xff]  ;;  %v4040_v18 = vld [vmem:[#allocation3 + $0x178] sm:$0xff] }
 0x31f   : > { %4231 = vst [vmem:[%s8871_s9 + $0xa0] sm:$0xff] %v4166_v12  ;;  %4232 = vst.msk [vmem:[%s8871_s9 + $0xa8] sm:$0xff] %vm4211_vm15, %v4167_v36  ;;  %v4097_v62 = vmul.f32 %v8493_v55, %v4021_v4  ;;  %v4098_v2 = vmul.f32 %v8495_v41, %v4022_v0  ;;  %v4170_v46 = vadd.f32 %v8505_v44, %v4093_v27  ;;  %v4041_v4 = vld [vmem:[#allocation3 + $0x180] sm:$0xff]  ;;  %v4042_v32 = vld [vmem:[#allocation3 + $0x188] sm:$0xff] }
 0x320   : > { %v4171_v37 = vadd.f32 %v8507_v14, %v4094_v56  ;;  %v4172_v9 = vadd.f32 %v8505_v44, %v4095_v10  ;;  %v4173_v58 = vadd.f32 %v8507_v14, %v4096_v3  ;;  %4233 = vst [vmem:[%s8871_s9 + $0xb0] sm:$0xff] %v4168_v60  ;;  %4234 = vst.msk [vmem:[%s8871_s9 + $0xb8] sm:$0xff] %vm4211_vm15, %v4169_v8  ;;  %v4043_v27 = vld [vmem:[#allocation3 + $0x190] sm:$0xff]  ;;  %v4044_v56 = vld [vmem:[#allocation3 + $0x198] sm:$0xff] }
 0x321   : > { %v4174_v59 = vadd.f32 %v8505_v44, %v4097_v62  ;;  %v4175_v49 = vadd.f32 %v8507_v14, %v4098_v2  ;;  %v4099_v52 = vmul.f32 %v8493_v55, %v4023_v24  ;;  %v4100_v15 = vmul.f32 %v8495_v41, %v4024_v33  ;;  %4235 = vst [vmem:[%s8871_s9 + $0xc0] sm:$0xff] %v4170_v46  ;;  %v4046_v60 = vld [vmem:[#allocation3 + $0x1a8] sm:$0xff] }
 0x322   : > { %4236 = vst.msk [vmem:[%s8871_s9 + $0xc8] sm:$0xff] %vm4211_vm15, %v4171_v37  ;;  %4237 = vst [vmem:[%s8871_s9 + $0xd0] sm:$0xff] %v4172_v9  ;;  %v4101_v1 = vmul.f32 %v8493_v55, %v4025_v16  ;;  %v4102_v50 = vmul.f32 %v8495_v41, %v4026_v48  ;;  %v4103_v11 = vmul.f32 %v8493_v55, %v4027_v40  ;;  %v4045_v16 = vld [vmem:[#allocation3 + $0x1a0] sm:$0xff]  ;;  %v4047_v9 = vld [vmem:[#allocation3 + $0x1b0] sm:$0xff] }
 0x323   : > { %4238 = vst.msk [vmem:[%s8871_s9 + $0xd8] sm:$0xff] %vm4211_vm15, %v4173_v58  ;;  %v4104_v63 = vmul.f32 %v8495_v41, %v4028_v26  ;;  %4239 = vst [vmem:[%s8871_s9 + $0xe0] sm:$0xff] %v4174_v59  ;;  %v4176_v21 = vadd.f32 %v8505_v44, %v4099_v52  ;;  %v4177_v23 = vadd.f32 %v8507_v14, %v4100_v15  ;;  %v4048_v58 = vld [vmem:[#allocation3 + $0x1b8] sm:$0xff]  ;;  %v4050_v15 = vld [vmem:[#allocation3 + $0x1c8] sm:$0xff] }
 0x324   : > { %4240 = vst.msk [vmem:[%s8871_s9 + $0xe8] sm:$0xff] %vm4211_vm15, %v4175_v49  ;;  %v4105_v54 = vmul.f32 %v8493_v55, %v4029_v39  ;;  %v4106_v17 = vmul.f32 %v8495_v41, %v4030_v6  ;;  %v4178_v7 = vadd.f32 %v8505_v44, %v4101_v1  ;;  %v4179_v61 = vadd.f32 %v8507_v14, %v4102_v50  ;;  %v4049_v39 = vld [vmem:[#allocation3 + $0x1c0] sm:$0xff]  ;;  %v4051_v1 = vld [vmem:[#allocation3 + $0x1d0] sm:$0xff]  ;;  %v4052_v50 = vld [vmem:[#allocation3 + $0x1d8] sm:$0xff] }
 0x325   : > { %v4180_v35 = vadd.f32 %v8505_v44, %v4103_v11  ;;  %v4181_v13 = vadd.f32 %v8507_v14, %v4104_v63  ;;  %4241 = vst [vmem:[%s8871_s9 + $0xf0] sm:$0xff] %v4176_v21  ;;  %4242 = vst.msk [vmem:[%s8871_s9 + $0xf8] sm:$0xff] %vm4211_vm15, %v4177_v23  ;;  %v4107_v25 = vmul.f32 %v8493_v55, %v4031_v34  ;;  %v4054_v21 = vld [vmem:[#allocation3 + $0x1e8] sm:$0xff] }
 0x326   : > { %v4182_v42 = vadd.f32 %v8505_v44, %v4105_v54  ;;  %v4183_v5 = vadd.f32 %v8507_v14, %v4106_v17  ;;  %v4108_v43 = vmul.f32 %v8495_v41, %v4032_v31  ;;  %4243 = vst [vmem:[%s8871_s9 + $0x100] sm:$0xff] %v4178_v7  ;;  %4244 = vst.msk [vmem:[%s8871_s9 + $0x108] sm:$0xff] %vm4211_vm15, %v4179_v61 }
 0x327   : > { %4245 = vst [vmem:[%s8871_s9 + $0x110] sm:$0xff] %v4180_v35  ;;  %4246 = vst.msk [vmem:[%s8871_s9 + $0x118] sm:$0xff] %vm4211_vm15, %v4181_v13  ;;  %v4109_v20 = vmul.f32 %v8493_v55, %v4033_v22  ;;  %v4110_v29 = vmul.f32 %v8495_v41, %v4034_v38  ;;  %v4111_v28 = vmul.f32 %v8493_v55, %v4035_v51  ;;  %v4053_v22 = vld [vmem:[#allocation3 + $0x1e0] sm:$0xff]  ;;  %v4055_v35 = vld [vmem:[#allocation3 + $0x1f0] sm:$0xff] }
 0x328   : > { %v4112_v47 = vmul.f32 %v8495_v41, %v4036_v45  ;;  %4247 = vst [vmem:[%s8871_s9 + $0x120] sm:$0xff] %v4182_v42  ;;  %4248 = vst.msk [vmem:[%s8871_s9 + $0x128] sm:$0xff] %vm4211_vm15, %v4183_v5  ;;  %v4184_v0 = vadd.f32 %v8505_v44, %v4107_v25  ;;  %v4185_v12 = vadd.f32 %v8507_v14, %v4108_v43  ;;  %v4056_v13 = vld [vmem:[#allocation3 + $0x1f8] sm:$0xff] }
 0x329   : > { %v4113_v36 = vmul.f32 %v8493_v55, %v4037_v57  ;;  %v4114_v30 = vmul.f32 %v8495_v41, %v4038_v19  ;;  %v4186_v10 = vadd.f32 %v8505_v44, %v4109_v20  ;;  %v4187_v3 = vadd.f32 %v8507_v14, %v4110_v29 }
 0x32a   : > { %v4188_v24 = vadd.f32 %v8505_v44, %v4111_v28  ;;  %v4189_v33 = vadd.f32 %v8507_v14, %v4112_v47  ;;  %4249 = vst [vmem:[%s8871_s9 + $0x130] sm:$0xff] %v4184_v0  ;;  %4250 = vst.msk [vmem:[%s8871_s9 + $0x138] sm:$0xff] %vm4211_vm15, %v4185_v12  ;;  %v4115_v2 = vmul.f32 %v8493_v55, %v4039_v53 }
 0x32b   : > { %v4190_v8 = vadd.f32 %v8505_v44, %v4113_v36  ;;  %v4191_v62 = vadd.f32 %v8507_v14, %v4114_v30  ;;  %v4116_v48 = vmul.f32 %v8495_v41, %v4040_v18  ;;  %4251 = vst [vmem:[%s8871_s9 + $0x140] sm:$0xff] %v4186_v10  ;;  %4252 = vst.msk [vmem:[%s8871_s9 + $0x148] sm:$0xff] %vm4211_vm15, %v4187_v3 }
 0x32c   : > { %4253 = vst [vmem:[%s8871_s9 + $0x150] sm:$0xff] %v4188_v24  ;;  %4254 = vst.msk [vmem:[%s8871_s9 + $0x158] sm:$0xff] %vm4211_vm15, %v4189_v33  ;;  %v4117_v40 = vmul.f32 %v8493_v55, %v4041_v4  ;;  %v4118_v26 = vmul.f32 %v8495_v41, %v4042_v32  ;;  %v4119_v46 = vmul.f32 %v8493_v55, %v4043_v27 }
 0x32d   : > { %v4120_v37 = vmul.f32 %v8495_v41, %v4044_v56  ;;  %4255 = vst [vmem:[%s8871_s9 + $0x160] sm:$0xff] %v4190_v8  ;;  %4256 = vst.msk [vmem:[%s8871_s9 + $0x168] sm:$0xff] %vm4211_vm15, %v4191_v62  ;;  %v4192_v6 = vadd.f32 %v8505_v44, %v4115_v2  ;;  %v4193_v59 = vadd.f32 %v8507_v14, %v4116_v48 }
 0x32e   : > { %v4121_v49 = vmul.f32 %v8493_v55, %v4045_v16  ;;  %v4122_v52 = vmul.f32 %v8495_v41, %v4046_v60  ;;  %v4194_v11 = vadd.f32 %v8505_v44, %v4117_v40  ;;  %v4195_v63 = vadd.f32 %v8507_v14, %v4118_v26 }
 0x32f   : > { %v4196_v34 = vadd.f32 %v8505_v44, %v4119_v46  ;;  %v4197_v31 = vadd.f32 %v8507_v14, %v4120_v37  ;;  %4257 = vst [vmem:[%s8871_s9 + $0x170] sm:$0xff] %v4192_v6  ;;  %4258 = vst.msk [vmem:[%s8871_s9 + $0x178] sm:$0xff] %vm4211_vm15, %v4193_v59  ;;  %v4123_v17 = vmul.f32 %v8493_v55, %v4047_v9 }
 0x330   : > { %v4198_v23 = vadd.f32 %v8505_v44, %v4121_v49  ;;  %v4199_v54 = vadd.f32 %v8507_v14, %v4122_v52  ;;  %v4124_v38 = vmul.f32 %v8495_v41, %v4048_v58  ;;  %4259 = vst [vmem:[%s8871_s9 + $0x180] sm:$0xff] %v4194_v11  ;;  %4260 = vst.msk [vmem:[%s8871_s9 + $0x188] sm:$0xff] %vm4211_vm15, %v4195_v63 }
 0x331   : > { %4261 = vst [vmem:[%s8871_s9 + $0x190] sm:$0xff] %v4196_v34  ;;  %4262 = vst.msk [vmem:[%s8871_s9 + $0x198] sm:$0xff] %vm4211_vm15, %v4197_v31  ;;  %v4125_v51 = vmul.f32 %v8493_v55, %v4049_v39  ;;  %v4126_v45 = vmul.f32 %v8495_v41, %v4050_v15  ;;  %v4127_v7 = vmul.f32 %v8493_v55, %v4051_v1 }
 0x332   : > { %v4128_v61 = vmul.f32 %v8495_v41, %v4052_v50  ;;  %4263 = vst [vmem:[%s8871_s9 + $0x1a0] sm:$0xff] %v4198_v23  ;;  %4264 = vst.msk [vmem:[%s8871_s9 + $0x1a8] sm:$0xff] %vm4211_vm15, %v4199_v54  ;;  %v4200_v57 = vadd.f32 %v8505_v44, %v4123_v17  ;;  %v4201_v19 = vadd.f32 %v8507_v14, %v4124_v38 }
 0x333   : > { %v4129_v42 = vmul.f32 %v8493_v55, %v4053_v22  ;;  %v4130_v5 = vmul.f32 %v8495_v41, %v4054_v21  ;;  %v4202_v25 = vadd.f32 %v8505_v44, %v4125_v51  ;;  %v4203_v43 = vadd.f32 %v8507_v14, %v4126_v45 }
 0x334   : > { %v4204_v20 = vadd.f32 %v8505_v44, %v4127_v7  ;;  %v4205_v29 = vadd.f32 %v8507_v14, %v4128_v61  ;;  %4265 = vst [vmem:[%s8871_s9 + $0x1b0] sm:$0xff] %v4200_v57  ;;  %4266 = vst.msk [vmem:[%s8871_s9 + $0x1b8] sm:$0xff] %vm4211_vm15, %v4201_v19  ;;  %v4131_v53 = vmul.f32 %v8493_v55, %v4055_v35 }
 0x335   : > { %v4206_v28 = vadd.f32 %v8505_v44, %v4129_v42  ;;  %v4207_v47 = vadd.f32 %v8507_v14, %v4130_v5  ;;  %v4132_v18 = vmul.f32 %v8495_v41, %v4056_v13  ;;  %4267 = vst [vmem:[%s8871_s9 + $0x1c0] sm:$0xff] %v4202_v25  ;;  %4268 = vst.msk [vmem:[%s8871_s9 + $0x1c8] sm:$0xff] %vm4211_vm15, %v4203_v43 }
 0x336   : > { %4269 = vst [vmem:[%s8871_s9 + $0x1d0] sm:$0xff] %v4204_v20  ;;  %4270 = vst.msk [vmem:[%s8871_s9 + $0x1d8] sm:$0xff] %vm4211_vm15, %v4205_v29  ;;  %v4208_v55 = vadd.f32 %v8505_v44, %v4131_v53 }
 0x337   : > { %4271 = vst [vmem:[%s8871_s9 + $0x1e0] sm:$0xff] %v4206_v28  ;;  %4272 = vst.msk [vmem:[%s8871_s9 + $0x1e8] sm:$0xff] %vm4211_vm15, %v4207_v47  ;;  %v4209_v41 = vadd.f32 %v8507_v14, %v4132_v18 }
 0x338   : > { %4273 = vst [vmem:[%s8871_s9 + $0x1f0] sm:$0xff] %v4208_v55 }
 0x339   : > { %4274 = vst.msk [vmem:[%s8871_s9 + $0x1f8] sm:$0xff] %vm4211_vm15, %v4209_v41 }
 0x33a PF: > { %s19_s11 = sadd.s32 1, %s5511_s11   ;;  %s9018_s30 = smov %s5507_s10 }
 0x33b   : > { %p16_p6 = scmp.ge.s32.totalorder %s19_s11, 4   ;;  %s9019_s10 = smov %s9021_s12 }
 0x33d   :  { %18 = sbr.rel (!%p16_p6) target bundleno = 2 (0x2), region = 126 }

</bundles_post_ra>
